<compile_context>
chip_gen: v6e
topology: v6e:2x2x1
jax: 0.10.0
libtpu: 0.0.40
codegen_flags: <defaults>
</compile_context>

<pallas_src>
import functools

import jax
import jax.numpy as jnp
from jax.experimental import pallas as pl
from jax.experimental.pallas import tpu as pltpu


# PyTorch LSTM weights store gates as row blocks (i, f, g, o).
# Kernel gate order is (i, f, o, g) so the three sigmoid gates are contiguous.
GATE_PERM = (0, 1, 3, 2)


def _round_up(x, m):
    return ((x + m - 1) // m) * m


# ----------------------------------------------------------------------------
# Fused kernel (built per static config)
# ----------------------------------------------------------------------------
def _make_fused_kernel(num_layers, T, Bp, Hp):
    H2, H4, H6, H8 = 2 * Hp, 4 * Hp, 6 * Hp, 8 * Hp

    def kernel(*refs):
        # refs = x, (wih, whh, bias) * num_layers, wfc, bfc, out, gx_scratch, act_scratch
        x_ref = refs[0]
        layer_refs = refs[1:1 + 3 * num_layers]
        wfc_ref = refs[1 + 3 * num_layers]
        bfc_ref = refs[2 + 3 * num_layers]
        out_ref = refs[3 + 3 * num_layers]
        gx_ref = refs[4 + 3 * num_layers]      # (T*Bp, 8*Hp) f32 scratch
        act_ref = refs[5 + 3 * num_layers]     # (T*Bp, 2*Hp) f32 scratch

        # Loop-invariant lane masks (elementwise selects only; we never *slice* at an Hp boundary).
        col8 = jax.lax.broadcasted_iota(jnp.int32, (Bp, H8), 1)
        fwd_gate_cols = (col8 % H2) < Hp       # fwd-direction columns within each gate slab
        col2 = jax.lax.broadcasted_iota(jnp.int32, (Bp, H2), 1)
        fwd_half = col2 < Hp                   # fwd half of a (Bp, 2Hp) state row

        cur = x_ref[...].astype(jnp.bfloat16)  # (T*Bp, d_in) layer input, time-major rows

        for layer in range(num_layers):
            wih = layer_refs[3 * layer][...]       # (d_in, 8Hp) bf16
            whh = layer_refs[3 * layer + 1][...]   # (2Hp, 8Hp)  bf16, block-diagonal per dir
            bias = layer_refs[3 * layer + 2][...]  # (1, 8Hp)    f32
            last = layer == num_layers - 1

            # (a) Hoisted input projection for all T steps & both directions: one big MXU dot.
            gx = jnp.dot(cur, wih, preferred_element_type=jnp.float32) + bias   # (T*Bp, 8Hp)

            # (b) Hoisted direction select: recurrence step s consumes fwd gates of time s and
            #     bwd gates of time T-1-s. Pre-apply the select and park it in VMEM so the
            #     recurrence only reads aligned slices (bounds vreg live ranges).
            for s in range(T):
                g_fwd = gx[s * Bp:(s + 1) * Bp, :]
                g_bwd = gx[(T - 1 - s) * Bp:(T - s) * Bp, :]
                gx_ref[s * Bp:(s + 1) * Bp, :] = jnp.where(fwd_gate_cols, g_fwd, g_bwd)

            # (c) Recurrence: one (Bp,2Hp)x(2Hp,8Hp) dot per step serves both directions.
            h = jnp.zeros((Bp, H2), jnp.float32)   # [h_fwd | h_bwd]
            c = jnp.zeros((Bp, H2), jnp.float32)   # [c_fwd | c_bwd]
            h_steps = []
            # TODO(synk): for large static T replace the full unroll with
            # lax.fori_loop(..., unroll=8) + pl.ds(pl.multiple_of(s*Bp, 8), Bp) indexing.
            for s in range(T):
                gates = gx_ref[s * Bp:(s + 1) * Bp, :] + jnp.dot(
                    h.astype(jnp.bfloat16), whh, preferred_element_type=jnp.float32)
                sig = jax.nn.sigmoid(gates[:, :H6])        # [i | f | o], both directions (f32)
                g_gate = jnp.tanh(gates[:, H6:])           # [g],         both directions (f32)
                c = sig[:, H2:H4] * c + sig[:, :H2] * g_gate   # f*c + i*g
                h = sig[:, H4:H6] * jnp.tanh(c)                # o*tanh(c)
                if not last:
                    h_steps.append(h)

            if not last:
                # (d) ONE lane-dense store of the layer output in original time order:
                #     time t = [fwd output of step t | bwd output of step T-1-t].
                act_rows = [jnp.where(fwd_half, h_steps[t], h_steps[T - 1 - t])
                            for t in range(T)]
                act_ref[...] = jnp.concatenate(act_rows, axis=0)
                cur = act_ref[...].astype(jnp.bfloat16)        # (T*Bp, 2Hp)

        # Final h == cat(h_n[-2], h_n[-1]); dropout is inference-mode identity.
        # TODO(synk): training-mode stochastic dropout not implemented.
        out_ref[...] = jnp.dot(h.astype(jnp.bfloat16), wfc_ref[...],
                               preferred_element_type=jnp.float32) + bfc_ref[...]

    return kernel


# ----------------------------------------------------------------------------
# Parameter construction (PyTorch-style uniform init, PyTorch layout)
# ----------------------------------------------------------------------------
def init_params(key, input_size, hidden_size, num_layers, output_size, n_ahead):
    H = hidden_size
    bound = 1.0 / float(H) ** 0.5

    def u(k, shape, b=bound):
        return jax.random.uniform(k, shape, jnp.float32, -b, b)

    lstm = []
    for layer in range(num_layers):
        d_in = input_size if layer == 0 else 2 * H
        dirs = {}
        for direction in ("fwd", "bwd"):
            key, k1, k2, k3, k4 = jax.random.split(key, 5)
            dirs[direction] = (
                u(k1, (4 * H, d_in)),   # weight_ih (PyTorch gate order i,f,g,o)
                u(k2, (4 * H, H)),      # weight_hh
                u(k3, (4 * H,)),        # bias_ih
                u(k4, (4 * H,)),        # bias_hh
            )
        lstm.append(dirs)

    out_dim = output_size * n_ahead
    fc_bound = 1.0 / float(2 * H) ** 0.5
    key, k1, k2 = jax.random.split(key, 3)
    fc_w = u(k1, (out_dim, 2 * H), fc_bound)
    fc_b = u(k2, (out_dim,), fc_bound)
    return {"lstm": lstm, "fc": (fc_w, fc_b)}


def pack_params(params, hidden_size, compute_dtype=jnp.bfloat16):
    """Convert PyTorch-layout weights to the fused-kernel layout, padding H to a multiple of 64.

    Per layer (Hp = padded hidden, zero padding => padded units stay exactly 0):
      wih : (d_in, 8Hp)  columns [i_f,i_b,f_f,f_b,o_f,o_b,g_f,g_b], each dir slot Hp wide
      whh : (2Hp, 8Hp)   block-diagonal per direction (rows 0:Hp = fwd h, Hp:2Hp = bwd h)
      bias: (1, 8Hp)     b_ih + b_hh (f32)
    FC: wfc (2Hp, Op) / bfc (1, Op) with Op = output padded to a 128 multiple.
    """
    H = hidden_size
    Hp = _round_up(H, 64)   # makes all gate-slab boundaries 128-lane multiples
    packed_layers = []
    for layer_idx, dirs in enumerate(params["lstm"]):
        d_in_t = dirs["fwd"][0].shape[1]
        d_in_p = d_in_t if layer_idx == 0 else 2 * Hp
        wih = jnp.zeros((d_in_p, 8 * Hp), jnp.float32)
        whh = jnp.zeros((2 * Hp, 8 * Hp), jnp.float32)
        bias = jnp.zeros((8 * Hp,), jnp.float32)
        for d, direction in enumerate(("fwd", "bwd")):
            w_ih, w_hh, b_ih, b_hh = dirs[direction]
            for k, pk in enumerate(GATE_PERM):
                cols = slice(k * 2 * Hp + d * Hp, k * 2 * Hp + d * Hp + H)
                rows = slice(pk * H, (pk + 1) * H)
                if layer_idx == 0:
                    wih = wih.at[:, cols].set(jnp.transpose(w_ih[rows, :]))
                else:
                    # Previous-layer output layout is [fwd 0:H, pad | bwd Hp:Hp+H, pad].
                    wih = wih.at[0:H, cols].set(jnp.transpose(w_ih[rows, 0:H]))
                    wih = wih.at[Hp:Hp + H, cols].set(jnp.transpose(w_ih[rows, H:2 * H]))
                whh = whh.at[d * Hp:d * Hp + H, cols].set(jnp.transpose(w_hh[rows, :]))
                bias = bias.at[cols].set(b_ih[rows] + b_hh[rows])
        packed_layers.append((wih.astype(compute_dtype),
                              whh.astype(compute_dtype),
                              bias.reshape(1, 8 * Hp)))

    fc_w, fc_b = params["fc"]                    # (O, 2H), (O,)
    O = fc_w.shape[0]
    Op = _round_up(O, 128)                       # lane-dense output store
    wfc = jnp.zeros((2 * Hp, Op), jnp.float32)
    wfc = wfc.at[0:H, 0:O].set(jnp.transpose(fc_w[:, 0:H]))
    wfc = wfc.at[Hp:Hp + H, 0:O].set(jnp.transpose(fc_w[:, H:2 * H]))
    bfc = jnp.zeros((1, Op), jnp.float32).at[0, 0:O].set(fc_b)
    return {"lstm": packed_layers, "fc": (wfc.astype(compute_dtype), bfc)}


# ----------------------------------------------------------------------------
# Full forward pass (matches BidirectionalLSTM.forward, inference mode)
# ----------------------------------------------------------------------------
@functools.partial(jax.jit, static_argnames=("num_layers", "n_ahead", "output_size"))
def bidirectional_lstm_forward(x, packed, *, num_layers, n_ahead, output_size):
    B, T, D = x.shape
    Hp = packed["lstm"][0][2].shape[1] // 8      # padded hidden size (static)
    Op = packed["fc"][0].shape[1]                # padded FC output width (static)
    O = output_size * n_ahead

    Bp = _round_up(B, 16)   # >=8 sublanes for f32 state, >=16 for bf16 MXU operands

    # Batch-first -> time-major flat rows (row t*Bp + b), zero-padded batch.
    x_tm = jnp.transpose(x, (1, 0, 2)).astype(jnp.float32)      # (T, B, D)
    x_tm = jnp.pad(x_tm, ((0, 0), (0, Bp - B), (0, 0)))
    x_flat = x_tm.reshape(T * Bp, D)

    inputs = [x_flat]
    for layer_params in packed["lstm"]:
        inputs.extend(layer_params)
    inputs.extend(packed["fc"])

    scratch_shapes = [pltpu.VMEM((T * Bp, 8 * Hp), jnp.float32),   # selected gate projections
                      pltpu.VMEM((T * Bp, 2 * Hp), jnp.float32)]   # layer activations

    # Explicit VMEM budget (double-buffered inputs/outputs + scratch + margin),
    # clamped to [16 MiB, 64 MiB] so the limit is valid on v5e / v6e / v7x.
    in_bytes = sum(int(a.size) * a.dtype.itemsize for a in inputs)
    scratch_bytes = (T * Bp * 8 * Hp + T * Bp * 2 * Hp) * 4
    out_bytes = Bp * Op * 4
    vmem_limit = int(min(max(2 * in_bytes + scratch_bytes + 2 * out_bytes + (4 << 20),
                             16 << 20), 64 << 20))

    kernel = _make_fused_kernel(num_layers, T, Bp, Hp)
    in_specs = [pl.BlockSpec(a.shape, (lambda i, nd=a.ndim: (0,) * nd)) for a in inputs]

    # TODO(synk): on v7x (2 TensorCores), add a leading "parallel" grid axis splitting the
    # padded batch across cores once B is large enough to shard.
    out = pl.pallas_call(
        kernel,
        out_shape=jax.ShapeDtypeStruct((Bp, Op), jnp.float32),
        grid=(1,),
        in_specs=in_specs,
        out_specs=pl.BlockSpec((Bp, Op), lambda i: (0, 0)),
        scratch_shapes=scratch_shapes,
        compiler_params=pltpu.CompilerParams(
            dimension_semantics=("arbitrary",), vmem_limit_bytes=vmem_limit),
    )(*inputs)

    return out[:B, :O].reshape(B, n_ahead, O // n_ahead)


# ----------------------------------------------------------------------------
if __name__ == "__main__":
    input_size = 4
    hidden_size = 32
    num_layers = 2
    output_size = 3
    n_ahead = 4
    batch = 2
    seq_len = 8

    key = jax.random.PRNGKey(0)
    key, kx, kp = jax.random.split(key, 3)
    x = jax.random.normal(kx, (batch, seq_len, input_size), jnp.float32)
    params = init_params(kp, input_size, hidden_size, num_layers, output_size, n_ahead)
    packed = pack_params(params, hidden_size)

    out = bidirectional_lstm_forward(x, packed, num_layers=num_layers,
                                     n_ahead=n_ahead, output_size=output_size)
    out = jax.block_until_ready(out)
    assert out.shape == (batch, n_ahead, output_size), out.shape
    assert bool(jnp.isfinite(out).all())
    print("KERNEL_OK")
</pallas_src>

<mosaic_0001>
module attributes {stable_mosaic.version = 11 : i64} {
  func.func @kernel(%arg0: i32, %arg1: memref<128x4xf32, #tpu.memory_space<vmem>>, %arg2: memref<4x512xbf16, #tpu.memory_space<vmem>>, %arg3: memref<128x512xbf16, #tpu.memory_space<vmem>>, %arg4: memref<1x512xf32, #tpu.memory_space<vmem>>, %arg5: memref<128x512xbf16, #tpu.memory_space<vmem>>, %arg6: memref<128x512xbf16, #tpu.memory_space<vmem>>, %arg7: memref<1x512xf32, #tpu.memory_space<vmem>>, %arg8: memref<128x128xbf16, #tpu.memory_space<vmem>>, %arg9: memref<1x128xf32, #tpu.memory_space<vmem>>, %arg10: memref<16x128xf32, #tpu.memory_space<vmem>>, %arg11: memref<128x512xf32, #tpu.memory_space<vmem>>, %arg12: memref<128x128xf32, #tpu.memory_space<vmem>>) attributes {dimension_semantics = [#tpu.dimension_semantics<arbitrary>], iteration_bounds = array<i64: 1>, scalar_prefetch = 0 : i64, scratch_operands = 2 : i64, tpu.core_type = #tpu.core_type<tc>, window_params = [{pipeline_mode = #tpu.pipeline_mode<synchronous>, transform_indices = @transform_0, window_bounds = array<i64: 128, 4>}, {pipeline_mode = #tpu.pipeline_mode<synchronous>, transform_indices = @transform_1, window_bounds = array<i64: 4, 512>}, {pipeline_mode = #tpu.pipeline_mode<synchronous>, transform_indices = @transform_2, window_bounds = array<i64: 128, 512>}, {pipeline_mode = #tpu.pipeline_mode<synchronous>, transform_indices = @transform_3, window_bounds = array<i64: 1, 512>}, {pipeline_mode = #tpu.pipeline_mode<synchronous>, transform_indices = @transform_4, window_bounds = array<i64: 128, 512>}, {pipeline_mode = #tpu.pipeline_mode<synchronous>, transform_indices = @transform_5, window_bounds = array<i64: 128, 512>}, {pipeline_mode = #tpu.pipeline_mode<synchronous>, transform_indices = @transform_6, window_bounds = array<i64: 1, 512>}, {pipeline_mode = #tpu.pipeline_mode<synchronous>, transform_indices = @transform_7, window_bounds = array<i64: 128, 128>}, {pipeline_mode = #tpu.pipeline_mode<synchronous>, transform_indices = @transform_8, window_bounds = array<i64: 1, 128>}, {pipeline_mode = #tpu.pipeline_mode<synchronous>, transform_indices = @transform_9, window_bounds = array<i64: 16, 128>}]} {
    %0 = tpu.iota {dimensions = array<i32: 1>} : vector<16x512xi32>
    %c128_i32 = arith.constant 128 : i32
    %c0_i32 = arith.constant 0 : i32
    %1 = arith.cmpi eq, %c128_i32, %c0_i32 : i32
    %c1_i32 = arith.constant 1 : i32
    %2 = arith.select %1, %c1_i32, %c128_i32 : i32
    %3 = vector.broadcast %2 : i32 to vector<16x512xi32>
    %4 = arith.remsi %0, %3 : vector<16x512xi32>
    %c0_i32_0 = arith.constant 0 : i32
    %5 = vector.broadcast %c0_i32_0 : i32 to vector<16x512xi32>
    %6 = arith.cmpi ne, %4, %5 : vector<16x512xi32>
    %c0_i32_1 = arith.constant 0 : i32
    %7 = vector.broadcast %c0_i32_1 : i32 to vector<16x512xi32>
    %8 = arith.cmpi slt, %4, %7 : vector<16x512xi32>
    %c0_i32_2 = arith.constant 0 : i32
    %9 = arith.cmpi slt, %2, %c0_i32_2 : i32
    %10 = vector.broadcast %9 : i1 to vector<16x512xi1>
    %11 = vector.broadcast %10 : vector<16x512xi1> to vector<16x512xi1>
    %12 = arith.xori %8, %11 : vector<16x512xi1>
    %13 = arith.andi %12, %6 : vector<16x512xi1>
    %14 = vector.broadcast %2 : i32 to vector<16x512xi32>
    %15 = arith.addi %4, %14 : vector<16x512xi32>
    %16 = arith.select %13, %15, %4 : vector<16x512xi1>, vector<16x512xi32>
    %c64_i32 = arith.constant 64 : i32
    %17 = vector.broadcast %c64_i32 : i32 to vector<16x512xi32>
    %18 = arith.cmpi slt, %16, %17 : vector<16x512xi32>
    %19 = tpu.iota {dimensions = array<i32: 1>} : vector<16x128xi32>
    %c64_i32_3 = arith.constant 64 : i32
    %20 = vector.broadcast %c64_i32_3 : i32 to vector<16x128xi32>
    %21 = arith.cmpi slt, %19, %20 : vector<16x128xi32>
    %c0 = arith.constant 0 : index
    %c0_4 = arith.constant 0 : index
    %22 = vector.load %arg1[%c0, %c0_4] : memref<128x4xf32, #tpu.memory_space<vmem>>, vector<128x4xf32>
    %23 = arith.truncf %22 : vector<128x4xf32> to vector<128x4xbf16>
    %c0_5 = arith.constant 0 : index
    %c0_6 = arith.constant 0 : index
    %24 = vector.load %arg2[%c0_5, %c0_6] : memref<4x512xbf16, #tpu.memory_space<vmem>>, vector<4x512xbf16>
    %c0_7 = arith.constant 0 : index
    %c0_8 = arith.constant 0 : index
    %25 = vector.load %arg3[%c0_7, %c0_8] : memref<128x512xbf16, #tpu.memory_space<vmem>>, vector<128x512xbf16>
    %c0_9 = arith.constant 0 : index
    %c0_10 = arith.constant 0 : index
    %26 = vector.load %arg4[%c0_9, %c0_10] : memref<1x512xf32, #tpu.memory_space<vmem>>, vector<1x512xf32>
    %cst = arith.constant dense<0.000000e+00> : vector<128x512xf32>
    %27 = tpu.matmul %23, %24, %cst {dimension_numbers = #tpu.dot_dimension_numbers<[1], [0], [0], [1], [0, 0, 1, 1], [], []>} : vector<128x4xbf16>, vector<4x512xbf16>, vector<128x512xf32> -> vector<128x512xf32>
    %28 = vector.broadcast %26 : vector<1x512xf32> to vector<128x512xf32>
    %29 = arith.addf %27, %28 : vector<128x512xf32>
    %30 = vector.extract_strided_slice %29 {offsets = [0, 0], sizes = [16, 512], strides = [1, 1]} : vector<128x512xf32> to vector<16x512xf32>
    %31 = vector.extract_strided_slice %29 {offsets = [112, 0], sizes = [16, 512], strides = [1, 1]} : vector<128x512xf32> to vector<16x512xf32>
    %32 = arith.select %18, %30, %31 : vector<16x512xi1>, vector<16x512xf32>
    %c0_11 = arith.constant 0 : index
    %c0_12 = arith.constant 0 : index
    %33 = vector.load %arg11[%c0_11, %c0_12] : memref<128x512xf32, #tpu.memory_space<vmem>>, vector<16x512xf32>
    tpu.vector_store %arg11[%c0_11, %c0_12], %32 {strides = array<i32>} : memref<128x512xf32, #tpu.memory_space<vmem>>, vector<16x512xf32>,
    %34 = vector.extract_strided_slice %29 {offsets = [16, 0], sizes = [16, 512], strides = [1, 1]} : vector<128x512xf32> to vector<16x512xf32>
    %35 = vector.extract_strided_slice %29 {offsets = [96, 0], sizes = [16, 512], strides = [1, 1]} : vector<128x512xf32> to vector<16x512xf32>
    %36 = arith.select %18, %34, %35 : vector<16x512xi1>, vector<16x512xf32>
    %c16 = arith.constant 16 : index
    %c0_13 = arith.constant 0 : index
    %37 = vector.load %arg11[%c16, %c0_13] : memref<128x512xf32, #tpu.memory_space<vmem>>, vector<16x512xf32>
    tpu.vector_store %arg11[%c16, %c0_13], %36 {strides = array<i32>} : memref<128x512xf32, #tpu.memory_space<vmem>>, vector<16x512xf32>,
    %38 = vector.extract_strided_slice %29 {offsets = [32, 0], sizes = [16, 512], strides = [1, 1]} : vector<128x512xf32> to vector<16x512xf32>
    %39 = vector.extract_strided_slice %29 {offsets = [80, 0], sizes = [16, 512], strides = [1, 1]} : vector<128x512xf32> to vector<16x512xf32>
    %40 = arith.select %18, %38, %39 : vector<16x512xi1>, vector<16x512xf32>
    %c32 = arith.constant 32 : index
    %c0_14 = arith.constant 0 : index
    %41 = vector.load %arg11[%c32, %c0_14] : memref<128x512xf32, #tpu.memory_space<vmem>>, vector<16x512xf32>
    tpu.vector_store %arg11[%c32, %c0_14], %40 {strides = array<i32>} : memref<128x512xf32, #tpu.memory_space<vmem>>, vector<16x512xf32>,
    %42 = vector.extract_strided_slice %29 {offsets = [48, 0], sizes = [16, 512], strides = [1, 1]} : vector<128x512xf32> to vector<16x512xf32>
    %43 = vector.extract_strided_slice %29 {offsets = [64, 0], sizes = [16, 512], strides = [1, 1]} : vector<128x512xf32> to vector<16x512xf32>
    %44 = arith.select %18, %42, %43 : vector<16x512xi1>, vector<16x512xf32>
    %c48 = arith.constant 48 : index
    %c0_15 = arith.constant 0 : index
    %45 = vector.load %arg11[%c48, %c0_15] : memref<128x512xf32, #tpu.memory_space<vmem>>, vector<16x512xf32>
    tpu.vector_store %arg11[%c48, %c0_15], %44 {strides = array<i32>} : memref<128x512xf32, #tpu.memory_space<vmem>>, vector<16x512xf32>,
    %46 = vector.extract_strided_slice %29 {offsets = [64, 0], sizes = [16, 512], strides = [1, 1]} : vector<128x512xf32> to vector<16x512xf32>
    %47 = vector.extract_strided_slice %29 {offsets = [48, 0], sizes = [16, 512], strides = [1, 1]} : vector<128x512xf32> to vector<16x512xf32>
    %48 = arith.select %18, %46, %47 : vector<16x512xi1>, vector<16x512xf32>
    %c64 = arith.constant 64 : index
    %c0_16 = arith.constant 0 : index
    %49 = vector.load %arg11[%c64, %c0_16] : memref<128x512xf32, #tpu.memory_space<vmem>>, vector<16x512xf32>
    tpu.vector_store %arg11[%c64, %c0_16], %48 {strides = array<i32>} : memref<128x512xf32, #tpu.memory_space<vmem>>, vector<16x512xf32>,
    %50 = vector.extract_strided_slice %29 {offsets = [80, 0], sizes = [16, 512], strides = [1, 1]} : vector<128x512xf32> to vector<16x512xf32>
    %51 = vector.extract_strided_slice %29 {offsets = [32, 0], sizes = [16, 512], strides = [1, 1]} : vector<128x512xf32> to vector<16x512xf32>
    %52 = arith.select %18, %50, %51 : vector<16x512xi1>, vector<16x512xf32>
    %c80 = arith.constant 80 : index
    %c0_17 = arith.constant 0 : index
    %53 = vector.load %arg11[%c80, %c0_17] : memref<128x512xf32, #tpu.memory_space<vmem>>, vector<16x512xf32>
    tpu.vector_store %arg11[%c80, %c0_17], %52 {strides = array<i32>} : memref<128x512xf32, #tpu.memory_space<vmem>>, vector<16x512xf32>,
    %54 = vector.extract_strided_slice %29 {offsets = [96, 0], sizes = [16, 512], strides = [1, 1]} : vector<128x512xf32> to vector<16x512xf32>
    %55 = vector.extract_strided_slice %29 {offsets = [16, 0], sizes = [16, 512], strides = [1, 1]} : vector<128x512xf32> to vector<16x512xf32>
    %56 = arith.select %18, %54, %55 : vector<16x512xi1>, vector<16x512xf32>
    %c96 = arith.constant 96 : index
    %c0_18 = arith.constant 0 : index
    %57 = vector.load %arg11[%c96, %c0_18] : memref<128x512xf32, #tpu.memory_space<vmem>>, vector<16x512xf32>
    tpu.vector_store %arg11[%c96, %c0_18], %56 {strides = array<i32>} : memref<128x512xf32, #tpu.memory_space<vmem>>, vector<16x512xf32>,
    %58 = vector.extract_strided_slice %29 {offsets = [112, 0], sizes = [16, 512], strides = [1, 1]} : vector<128x512xf32> to vector<16x512xf32>
    %59 = vector.extract_strided_slice %29 {offsets = [0, 0], sizes = [16, 512], strides = [1, 1]} : vector<128x512xf32> to vector<16x512xf32>
    %60 = arith.select %18, %58, %59 : vector<16x512xi1>, vector<16x512xf32>
    %c112 = arith.constant 112 : index
    %c0_19 = arith.constant 0 : index
    %61 = vector.load %arg11[%c112, %c0_19] : memref<128x512xf32, #tpu.memory_space<vmem>>, vector<16x512xf32>
    tpu.vector_store %arg11[%c112, %c0_19], %60 {strides = array<i32>} : memref<128x512xf32, #tpu.memory_space<vmem>>, vector<16x512xf32>,
    %cst_20 = arith.constant 0.000000e+00 : f32
    %62 = vector.broadcast %cst_20 : f32 to vector<16x128xf32>
    %cst_21 = arith.constant 0.000000e+00 : f32
    %63 = vector.broadcast %cst_21 : f32 to vector<16x128xf32>
    %c0_22 = arith.constant 0 : index
    %c0_23 = arith.constant 0 : index
    %64 = vector.load %arg11[%c0_22, %c0_23] : memref<128x512xf32, #tpu.memory_space<vmem>>, vector<16x512xf32>
    %65 = arith.truncf %62 : vector<16x128xf32> to vector<16x128xbf16>
    %cst_24 = arith.constant dense<0.000000e+00> : vector<16x512xf32>
    %66 = tpu.matmul %65, %25, %cst_24 {dimension_numbers = #tpu.dot_dimension_numbers<[1], [0], [0], [1], [0, 0, 1, 1], [], []>} : vector<16x128xbf16>, vector<128x512xbf16>, vector<16x512xf32> -> vector<16x512xf32>
    %67 = arith.addf %64, %66 : vector<16x512xf32>
    %68 = vector.extract_strided_slice %67 {offsets = [0, 0], sizes = [16, 384], strides = [1, 1]} : vector<16x512xf32> to vector<16x384xf32>
    %69 = arith.negf %68 : vector<16x384xf32>
    %70 = math.exp %69 : vector<16x384xf32>
    %cst_25 = arith.constant 1.000000e+00 : f32
    %71 = vector.broadcast %cst_25 : f32 to vector<16x384xf32>
    %72 = arith.addf %71, %70 : vector<16x384xf32>
    %73 = arith.divf %71, %72 : vector<16x384xf32>
    %74 = vector.extract_strided_slice %67 {offsets = [0, 384], sizes = [16, 128], strides = [1, 1]} : vector<16x512xf32> to vector<16x128xf32>
    %75 = math.tanh %74 : vector<16x128xf32>
    %76 = vector.extract_strided_slice %73 {offsets = [0, 128], sizes = [16, 128], strides = [1, 1]} : vector<16x384xf32> to vector<16x128xf32>
    %77 = arith.mulf %76, %63 : vector<16x128xf32>
    %78 = vector.extract_strided_slice %73 {offsets = [0, 0], sizes = [16, 128], strides = [1, 1]} : vector<16x384xf32> to vector<16x128xf32>
    %79 = arith.mulf %78, %75 : vector<16x128xf32>
    %80 = arith.addf %77, %79 : vector<16x128xf32>
    %81 = vector.extract_strided_slice %73 {offsets = [0, 256], sizes = [16, 128], strides = [1, 1]} : vector<16x384xf32> to vector<16x128xf32>
    %82 = math.tanh %80 : vector<16x128xf32>
    %83 = arith.mulf %81, %82 : vector<16x128xf32>
    %c16_26 = arith.constant 16 : index
    %c0_27 = arith.constant 0 : index
    %84 = vector.load %arg11[%c16_26, %c0_27] : memref<128x512xf32, #tpu.memory_space<vmem>>, vector<16x512xf32>
    %85 = arith.truncf %83 : vector<16x128xf32> to vector<16x128xbf16>
    %cst_28 = arith.constant dense<0.000000e+00> : vector<16x512xf32>
    %86 = tpu.matmul %85, %25, %cst_28 {dimension_numbers = #tpu.dot_dimension_numbers<[1], [0], [0], [1], [0, 0, 1, 1], [], []>} : vector<16x128xbf16>, vector<128x512xbf16>, vector<16x512xf32> -> vector<16x512xf32>
    %87 = arith.addf %84, %86 : vector<16x512xf32>
    %88 = vector.extract_strided_slice %87 {offsets = [0, 0], sizes = [16, 384], strides = [1, 1]} : vector<16x512xf32> to vector<16x384xf32>
    %89 = arith.negf %88 : vector<16x384xf32>
    %90 = math.exp %89 : vector<16x384xf32>
    %cst_29 = arith.constant 1.000000e+00 : f32
    %91 = vector.broadcast %cst_29 : f32 to vector<16x384xf32>
    %92 = arith.addf %91, %90 : vector<16x384xf32>
    %93 = arith.divf %91, %92 : vector<16x384xf32>
    %94 = vector.extract_strided_slice %87 {offsets = [0, 384], sizes = [16, 128], strides = [1, 1]} : vector<16x512xf32> to vector<16x128xf32>
    %95 = math.tanh %94 : vector<16x128xf32>
    %96 = vector.extract_strided_slice %93 {offsets = [0, 128], sizes = [16, 128], strides = [1, 1]} : vector<16x384xf32> to vector<16x128xf32>
    %97 = arith.mulf %96, %80 : vector<16x128xf32>
    %98 = vector.extract_strided_slice %93 {offsets = [0, 0], sizes = [16, 128], strides = [1, 1]} : vector<16x384xf32> to vector<16x128xf32>
    %99 = arith.mulf %98, %95 : vector<16x128xf32>
    %100 = arith.addf %97, %99 : vector<16x128xf32>
    %101 = vector.extract_strided_slice %93 {offsets = [0, 256], sizes = [16, 128], strides = [1, 1]} : vector<16x384xf32> to vector<16x128xf32>
    %102 = math.tanh %100 : vector<16x128xf32>
    %103 = arith.mulf %101, %102 : vector<16x128xf32>
    %c32_30 = arith.constant 32 : index
    %c0_31 = arith.constant 0 : index
    %104 = vector.load %arg11[%c32_30, %c0_31] : memref<128x512xf32, #tpu.memory_space<vmem>>, vector<16x512xf32>
    %105 = arith.truncf %103 : vector<16x128xf32> to vector<16x128xbf16>
    %cst_32 = arith.constant dense<0.000000e+00> : vector<16x512xf32>
    %106 = tpu.matmul %105, %25, %cst_32 {dimension_numbers = #tpu.dot_dimension_numbers<[1], [0], [0], [1], [0, 0, 1, 1], [], []>} : vector<16x128xbf16>, vector<128x512xbf16>, vector<16x512xf32> -> vector<16x512xf32>
    %107 = arith.addf %104, %106 : vector<16x512xf32>
    %108 = vector.extract_strided_slice %107 {offsets = [0, 0], sizes = [16, 384], strides = [1, 1]} : vector<16x512xf32> to vector<16x384xf32>
    %109 = arith.negf %108 : vector<16x384xf32>
    %110 = math.exp %109 : vector<16x384xf32>
    %cst_33 = arith.constant 1.000000e+00 : f32
    %111 = vector.broadcast %cst_33 : f32 to vector<16x384xf32>
    %112 = arith.addf %111, %110 : vector<16x384xf32>
    %113 = arith.divf %111, %112 : vector<16x384xf32>
    %114 = vector.extract_strided_slice %107 {offsets = [0, 384], sizes = [16, 128], strides = [1, 1]} : vector<16x512xf32> to vector<16x128xf32>
    %115 = math.tanh %114 : vector<16x128xf32>
    %116 = vector.extract_strided_slice %113 {offsets = [0, 128], sizes = [16, 128], strides = [1, 1]} : vector<16x384xf32> to vector<16x128xf32>
    %117 = arith.mulf %116, %100 : vector<16x128xf32>
    %118 = vector.extract_strided_slice %113 {offsets = [0, 0], sizes = [16, 128], strides = [1, 1]} : vector<16x384xf32> to vector<16x128xf32>
    %119 = arith.mulf %118, %115 : vector<16x128xf32>
    %120 = arith.addf %117, %119 : vector<16x128xf32>
    %121 = vector.extract_strided_slice %113 {offsets = [0, 256], sizes = [16, 128], strides = [1, 1]} : vector<16x384xf32> to vector<16x128xf32>
    %122 = math.tanh %120 : vector<16x128xf32>
    %123 = arith.mulf %121, %122 : vector<16x128xf32>
    %c48_34 = arith.constant 48 : index
    %c0_35 = arith.constant 0 : index
    %124 = vector.load %arg11[%c48_34, %c0_35] : memref<128x512xf32, #tpu.memory_space<vmem>>, vector<16x512xf32>
    %125 = arith.truncf %123 : vector<16x128xf32> to vector<16x128xbf16>
    %cst_36 = arith.constant dense<0.000000e+00> : vector<16x512xf32>
    %126 = tpu.matmul %125, %25, %cst_36 {dimension_numbers = #tpu.dot_dimension_numbers<[1], [0], [0], [1], [0, 0, 1, 1], [], []>} : vector<16x128xbf16>, vector<128x512xbf16>, vector<16x512xf32> -> vector<16x512xf32>
    %127 = arith.addf %124, %126 : vector<16x512xf32>
    %128 = vector.extract_strided_slice %127 {offsets = [0, 0], sizes = [16, 384], strides = [1, 1]} : vector<16x512xf32> to vector<16x384xf32>
    %129 = arith.negf %128 : vector<16x384xf32>
    %130 = math.exp %129 : vector<16x384xf32>
    %cst_37 = arith.constant 1.000000e+00 : f32
    %131 = vector.broadcast %cst_37 : f32 to vector<16x384xf32>
    %132 = arith.addf %131, %130 : vector<16x384xf32>
    %133 = arith.divf %131, %132 : vector<16x384xf32>
    %134 = vector.extract_strided_slice %127 {offsets = [0, 384], sizes = [16, 128], strides = [1, 1]} : vector<16x512xf32> to vector<16x128xf32>
    %135 = math.tanh %134 : vector<16x128xf32>
    %136 = vector.extract_strided_slice %133 {offsets = [0, 128], sizes = [16, 128], strides = [1, 1]} : vector<16x384xf32> to vector<16x128xf32>
    %137 = arith.mulf %136, %120 : vector<16x128xf32>
    %138 = vector.extract_strided_slice %133 {offsets = [0, 0], sizes = [16, 128], strides = [1, 1]} : vector<16x384xf32> to vector<16x128xf32>
    %139 = arith.mulf %138, %135 : vector<16x128xf32>
    %140 = arith.addf %137, %139 : vector<16x128xf32>
    %141 = vector.extract_strided_slice %133 {offsets = [0, 256], sizes = [16, 128], strides = [1, 1]} : vector<16x384xf32> to vector<16x128xf32>
    %142 = math.tanh %140 : vector<16x128xf32>
    %143 = arith.mulf %141, %142 : vector<16x128xf32>
    %c64_38 = arith.constant 64 : index
    %c0_39 = arith.constant 0 : index
    %144 = vector.load %arg11[%c64_38, %c0_39] : memref<128x512xf32, #tpu.memory_space<vmem>>, vector<16x512xf32>
    %145 = arith.truncf %143 : vector<16x128xf32> to vector<16x128xbf16>
    %cst_40 = arith.constant dense<0.000000e+00> : vector<16x512xf32>
    %146 = tpu.matmul %145, %25, %cst_40 {dimension_numbers = #tpu.dot_dimension_numbers<[1], [0], [0], [1], [0, 0, 1, 1], [], []>} : vector<16x128xbf16>, vector<128x512xbf16>, vector<16x512xf32> -> vector<16x512xf32>
    %147 = arith.addf %144, %146 : vector<16x512xf32>
    %148 = vector.extract_strided_slice %147 {offsets = [0, 0], sizes = [16, 384], strides = [1, 1]} : vector<16x512xf32> to vector<16x384xf32>
    %149 = arith.negf %148 : vector<16x384xf32>
    %150 = math.exp %149 : vector<16x384xf32>
    %cst_41 = arith.constant 1.000000e+00 : f32
    %151 = vector.broadcast %cst_41 : f32 to vector<16x384xf32>
    %152 = arith.addf %151, %150 : vector<16x384xf32>
    %153 = arith.divf %151, %152 : vector<16x384xf32>
    %154 = vector.extract_strided_slice %147 {offsets = [0, 384], sizes = [16, 128], strides = [1, 1]} : vector<16x512xf32> to vector<16x128xf32>
    %155 = math.tanh %154 : vector<16x128xf32>
    %156 = vector.extract_strided_slice %153 {offsets = [0, 128], sizes = [16, 128], strides = [1, 1]} : vector<16x384xf32> to vector<16x128xf32>
    %157 = arith.mulf %156, %140 : vector<16x128xf32>
    %158 = vector.extract_strided_slice %153 {offsets = [0, 0], sizes = [16, 128], strides = [1, 1]} : vector<16x384xf32> to vector<16x128xf32>
    %159 = arith.mulf %158, %155 : vector<16x128xf32>
    %160 = arith.addf %157, %159 : vector<16x128xf32>
    %161 = vector.extract_strided_slice %153 {offsets = [0, 256], sizes = [16, 128], strides = [1, 1]} : vector<16x384xf32> to vector<16x128xf32>
    %162 = math.tanh %160 : vector<16x128xf32>
    %163 = arith.mulf %161, %162 : vector<16x128xf32>
    %c80_42 = arith.constant 80 : index
    %c0_43 = arith.constant 0 : index
    %164 = vector.load %arg11[%c80_42, %c0_43] : memref<128x512xf32, #tpu.memory_space<vmem>>, vector<16x512xf32>
    %165 = arith.truncf %163 : vector<16x128xf32> to vector<16x128xbf16>
    %cst_44 = arith.constant dense<0.000000e+00> : vector<16x512xf32>
    %166 = tpu.matmul %165, %25, %cst_44 {dimension_numbers = #tpu.dot_dimension_numbers<[1], [0], [0], [1], [0, 0, 1, 1], [], []>} : vector<16x128xbf16>, vector<128x512xbf16>, vector<16x512xf32> -> vector<16x512xf32>
    %167 = arith.addf %164, %166 : vector<16x512xf32>
    %168 = vector.extract_strided_slice %167 {offsets = [0, 0], sizes = [16, 384], strides = [1, 1]} : vector<16x512xf32> to vector<16x384xf32>
    %169 = arith.negf %168 : vector<16x384xf32>
    %170 = math.exp %169 : vector<16x384xf32>
    %cst_45 = arith.constant 1.000000e+00 : f32
    %171 = vector.broadcast %cst_45 : f32 to vector<16x384xf32>
    %172 = arith.addf %171, %170 : vector<16x384xf32>
    %173 = arith.divf %171, %172 : vector<16x384xf32>
    %174 = vector.extract_strided_slice %167 {offsets = [0, 384], sizes = [16, 128], strides = [1, 1]} : vector<16x512xf32> to vector<16x128xf32>
    %175 = math.tanh %174 : vector<16x128xf32>
    %176 = vector.extract_strided_slice %173 {offsets = [0, 128], sizes = [16, 128], strides = [1, 1]} : vector<16x384xf32> to vector<16x128xf32>
    %177 = arith.mulf %176, %160 : vector<16x128xf32>
    %178 = vector.extract_strided_slice %173 {offsets = [0, 0], sizes = [16, 128], strides = [1, 1]} : vector<16x384xf32> to vector<16x128xf32>
    %179 = arith.mulf %178, %175 : vector<16x128xf32>
    %180 = arith.addf %177, %179 : vector<16x128xf32>
    %181 = vector.extract_strided_slice %173 {offsets = [0, 256], sizes = [16, 128], strides = [1, 1]} : vector<16x384xf32> to vector<16x128xf32>
    %182 = math.tanh %180 : vector<16x128xf32>
    %183 = arith.mulf %181, %182 : vector<16x128xf32>
    %c96_46 = arith.constant 96 : index
    %c0_47 = arith.constant 0 : index
    %184 = vector.load %arg11[%c96_46, %c0_47] : memref<128x512xf32, #tpu.memory_space<vmem>>, vector<16x512xf32>
    %185 = arith.truncf %183 : vector<16x128xf32> to vector<16x128xbf16>
    %cst_48 = arith.constant dense<0.000000e+00> : vector<16x512xf32>
    %186 = tpu.matmul %185, %25, %cst_48 {dimension_numbers = #tpu.dot_dimension_numbers<[1], [0], [0], [1], [0, 0, 1, 1], [], []>} : vector<16x128xbf16>, vector<128x512xbf16>, vector<16x512xf32> -> vector<16x512xf32>
    %187 = arith.addf %184, %186 : vector<16x512xf32>
    %188 = vector.extract_strided_slice %187 {offsets = [0, 0], sizes = [16, 384], strides = [1, 1]} : vector<16x512xf32> to vector<16x384xf32>
    %189 = arith.negf %188 : vector<16x384xf32>
    %190 = math.exp %189 : vector<16x384xf32>
    %cst_49 = arith.constant 1.000000e+00 : f32
    %191 = vector.broadcast %cst_49 : f32 to vector<16x384xf32>
    %192 = arith.addf %191, %190 : vector<16x384xf32>
    %193 = arith.divf %191, %192 : vector<16x384xf32>
    %194 = vector.extract_strided_slice %187 {offsets = [0, 384], sizes = [16, 128], strides = [1, 1]} : vector<16x512xf32> to vector<16x128xf32>
    %195 = math.tanh %194 : vector<16x128xf32>
    %196 = vector.extract_strided_slice %193 {offsets = [0, 128], sizes = [16, 128], strides = [1, 1]} : vector<16x384xf32> to vector<16x128xf32>
    %197 = arith.mulf %196, %180 : vector<16x128xf32>
    %198 = vector.extract_strided_slice %193 {offsets = [0, 0], sizes = [16, 128], strides = [1, 1]} : vector<16x384xf32> to vector<16x128xf32>
    %199 = arith.mulf %198, %195 : vector<16x128xf32>
    %200 = arith.addf %197, %199 : vector<16x128xf32>
    %201 = vector.extract_strided_slice %193 {offsets = [0, 256], sizes = [16, 128], strides = [1, 1]} : vector<16x384xf32> to vector<16x128xf32>
    %202 = math.tanh %200 : vector<16x128xf32>
    %203 = arith.mulf %201, %202 : vector<16x128xf32>
    %c112_50 = arith.constant 112 : index
    %c0_51 = arith.constant 0 : index
    %204 = vector.load %arg11[%c112_50, %c0_51] : memref<128x512xf32, #tpu.memory_space<vmem>>, vector<16x512xf32>
    %205 = arith.truncf %203 : vector<16x128xf32> to vector<16x128xbf16>
    %cst_52 = arith.constant dense<0.000000e+00> : vector<16x512xf32>
    %206 = tpu.matmul %205, %25, %cst_52 {dimension_numbers = #tpu.dot_dimension_numbers<[1], [0], [0], [1], [0, 0, 1, 1], [], []>} : vector<16x128xbf16>, vector<128x512xbf16>, vector<16x512xf32> -> vector<16x512xf32>
    %207 = arith.addf %204, %206 : vector<16x512xf32>
    %208 = vector.extract_strided_slice %207 {offsets = [0, 0], sizes = [16, 384], strides = [1, 1]} : vector<16x512xf32> to vector<16x384xf32>
    %209 = arith.negf %208 : vector<16x384xf32>
    %210 = math.exp %209 : vector<16x384xf32>
    %cst_53 = arith.constant 1.000000e+00 : f32
    %211 = vector.broadcast %cst_53 : f32 to vector<16x384xf32>
    %212 = arith.addf %211, %210 : vector<16x384xf32>
    %213 = arith.divf %211, %212 : vector<16x384xf32>
    %214 = vector.extract_strided_slice %207 {offsets = [0, 384], sizes = [16, 128], strides = [1, 1]} : vector<16x512xf32> to vector<16x128xf32>
    %215 = math.tanh %214 : vector<16x128xf32>
    %216 = vector.extract_strided_slice %213 {offsets = [0, 128], sizes = [16, 128], strides = [1, 1]} : vector<16x384xf32> to vector<16x128xf32>
    %217 = arith.mulf %216, %200 : vector<16x128xf32>
    %218 = vector.extract_strided_slice %213 {offsets = [0, 0], sizes = [16, 128], strides = [1, 1]} : vector<16x384xf32> to vector<16x128xf32>
    %219 = arith.mulf %218, %215 : vector<16x128xf32>
    %220 = arith.addf %217, %219 : vector<16x128xf32>
    %221 = vector.extract_strided_slice %213 {offsets = [0, 256], sizes = [16, 128], strides = [1, 1]} : vector<16x384xf32> to vector<16x128xf32>
    %222 = math.tanh %220 : vector<16x128xf32>
    %223 = arith.mulf %221, %222 : vector<16x128xf32>
    %224 = arith.select %21, %83, %223 : vector<16x128xi1>, vector<16x128xf32>
    %225 = arith.select %21, %103, %203 : vector<16x128xi1>, vector<16x128xf32>
    %226 = arith.select %21, %123, %183 : vector<16x128xi1>, vector<16x128xf32>
    %227 = arith.select %21, %143, %163 : vector<16x128xi1>, vector<16x128xf32>
    %228 = arith.select %21, %163, %143 : vector<16x128xi1>, vector<16x128xf32>
    %229 = arith.select %21, %183, %123 : vector<16x128xi1>, vector<16x128xf32>
    %230 = arith.select %21, %203, %103 : vector<16x128xi1>, vector<16x128xf32>
    %231 = arith.select %21, %223, %83 : vector<16x128xi1>, vector<16x128xf32>
    %232 = tpu.concatenate %224, %225, %226, %227, %228, %229, %230, %231 in 0 : vector<16x128xf32>, vector<16x128xf32>, vector<16x128xf32>, vector<16x128xf32>, vector<16x128xf32>, vector<16x128xf32>, vector<16x128xf32>, vector<16x128xf32> -> vector<128x128xf32>
    %c0_54 = arith.constant 0 : index
    %c0_55 = arith.constant 0 : index
    %233 = vector.load %arg12[%c0_54, %c0_55] : memref<128x128xf32, #tpu.memory_space<vmem>>, vector<128x128xf32>
    tpu.vector_store %arg12[%c0_54, %c0_55], %232 {strides = array<i32>} : memref<128x128xf32, #tpu.memory_space<vmem>>, vector<128x128xf32>,
    %c0_56 = arith.constant 0 : index
    %c0_57 = arith.constant 0 : index
    %234 = vector.load %arg12[%c0_56, %c0_57] : memref<128x128xf32, #tpu.memory_space<vmem>>, vector<128x128xf32>
    %235 = arith.truncf %234 : vector<128x128xf32> to vector<128x128xbf16>
    %c0_58 = arith.constant 0 : index
    %c0_59 = arith.constant 0 : index
    %236 = vector.load %arg5[%c0_58, %c0_59] : memref<128x512xbf16, #tpu.memory_space<vmem>>, vector<128x512xbf16>
    %c0_60 = arith.constant 0 : index
    %c0_61 = arith.constant 0 : index
    %237 = vector.load %arg6[%c0_60, %c0_61] : memref<128x512xbf16, #tpu.memory_space<vmem>>, vector<128x512xbf16>
    %c0_62 = arith.constant 0 : index
    %c0_63 = arith.constant 0 : index
    %238 = vector.load %arg7[%c0_62, %c0_63] : memref<1x512xf32, #tpu.memory_space<vmem>>, vector<1x512xf32>
    %cst_64 = arith.constant dense<0.000000e+00> : vector<128x512xf32>
    %239 = tpu.matmul %235, %236, %cst_64 {dimension_numbers = #tpu.dot_dimension_numbers<[1], [0], [0], [1], [0, 0, 1, 1], [], []>} : vector<128x128xbf16>, vector<128x512xbf16>, vector<128x512xf32> -> vector<128x512xf32>
    %240 = vector.broadcast %238 : vector<1x512xf32> to vector<128x512xf32>
    %241 = arith.addf %239, %240 : vector<128x512xf32>
    %242 = vector.extract_strided_slice %241 {offsets = [0, 0], sizes = [16, 512], strides = [1, 1]} : vector<128x512xf32> to vector<16x512xf32>
    %243 = vector.extract_strided_slice %241 {offsets = [112, 0], sizes = [16, 512], strides = [1, 1]} : vector<128x512xf32> to vector<16x512xf32>
    %244 = arith.select %18, %242, %243 : vector<16x512xi1>, vector<16x512xf32>
    %c0_65 = arith.constant 0 : index
    %c0_66 = arith.constant 0 : index
    %245 = vector.load %arg11[%c0_65, %c0_66] : memref<128x512xf32, #tpu.memory_space<vmem>>, vector<16x512xf32>
    tpu.vector_store %arg11[%c0_65, %c0_66], %244 {strides = array<i32>} : memref<128x512xf32, #tpu.memory_space<vmem>>, vector<16x512xf32>,
    %246 = vector.extract_strided_slice %241 {offsets = [16, 0], sizes = [16, 512], strides = [1, 1]} : vector<128x512xf32> to vector<16x512xf32>
    %247 = vector.extract_strided_slice %241 {offsets = [96, 0], sizes = [16, 512], strides = [1, 1]} : vector<128x512xf32> to vector<16x512xf32>
    %248 = arith.select %18, %246, %247 : vector<16x512xi1>, vector<16x512xf32>
    %c16_67 = arith.constant 16 : index
    %c0_68 = arith.constant 0 : index
    %249 = vector.load %arg11[%c16_67, %c0_68] : memref<128x512xf32, #tpu.memory_space<vmem>>, vector<16x512xf32>
    tpu.vector_store %arg11[%c16_67, %c0_68], %248 {strides = array<i32>} : memref<128x512xf32, #tpu.memory_space<vmem>>, vector<16x512xf32>,
    %250 = vector.extract_strided_slice %241 {offsets = [32, 0], sizes = [16, 512], strides = [1, 1]} : vector<128x512xf32> to vector<16x512xf32>
    %251 = vector.extract_strided_slice %241 {offsets = [80, 0], sizes = [16, 512], strides = [1, 1]} : vector<128x512xf32> to vector<16x512xf32>
    %252 = arith.select %18, %250, %251 : vector<16x512xi1>, vector<16x512xf32>
    %c32_69 = arith.constant 32 : index
    %c0_70 = arith.constant 0 : index
    %253 = vector.load %arg11[%c32_69, %c0_70] : memref<128x512xf32, #tpu.memory_space<vmem>>, vector<16x512xf32>
    tpu.vector_store %arg11[%c32_69, %c0_70], %252 {strides = array<i32>} : memref<128x512xf32, #tpu.memory_space<vmem>>, vector<16x512xf32>,
    %254 = vector.extract_strided_slice %241 {offsets = [48, 0], sizes = [16, 512], strides = [1, 1]} : vector<128x512xf32> to vector<16x512xf32>
    %255 = vector.extract_strided_slice %241 {offsets = [64, 0], sizes = [16, 512], strides = [1, 1]} : vector<128x512xf32> to vector<16x512xf32>
    %256 = arith.select %18, %254, %255 : vector<16x512xi1>, vector<16x512xf32>
    %c48_71 = arith.constant 48 : index
    %c0_72 = arith.constant 0 : index
    %257 = vector.load %arg11[%c48_71, %c0_72] : memref<128x512xf32, #tpu.memory_space<vmem>>, vector<16x512xf32>
    tpu.vector_store %arg11[%c48_71, %c0_72], %256 {strides = array<i32>} : memref<128x512xf32, #tpu.memory_space<vmem>>, vector<16x512xf32>,
    %258 = vector.extract_strided_slice %241 {offsets = [64, 0], sizes = [16, 512], strides = [1, 1]} : vector<128x512xf32> to vector<16x512xf32>
    %259 = vector.extract_strided_slice %241 {offsets = [48, 0], sizes = [16, 512], strides = [1, 1]} : vector<128x512xf32> to vector<16x512xf32>
    %260 = arith.select %18, %258, %259 : vector<16x512xi1>, vector<16x512xf32>
    %c64_73 = arith.constant 64 : index
    %c0_74 = arith.constant 0 : index
    %261 = vector.load %arg11[%c64_73, %c0_74] : memref<128x512xf32, #tpu.memory_space<vmem>>, vector<16x512xf32>
    tpu.vector_store %arg11[%c64_73, %c0_74], %260 {strides = array<i32>} : memref<128x512xf32, #tpu.memory_space<vmem>>, vector<16x512xf32>,
    %262 = vector.extract_strided_slice %241 {offsets = [80, 0], sizes = [16, 512], strides = [1, 1]} : vector<128x512xf32> to vector<16x512xf32>
    %263 = vector.extract_strided_slice %241 {offsets = [32, 0], sizes = [16, 512], strides = [1, 1]} : vector<128x512xf32> to vector<16x512xf32>
    %264 = arith.select %18, %262, %263 : vector<16x512xi1>, vector<16x512xf32>
    %c80_75 = arith.constant 80 : index
    %c0_76 = arith.constant 0 : index
    %265 = vector.load %arg11[%c80_75, %c0_76] : memref<128x512xf32, #tpu.memory_space<vmem>>, vector<16x512xf32>
    tpu.vector_store %arg11[%c80_75, %c0_76], %264 {strides = array<i32>} : memref<128x512xf32, #tpu.memory_space<vmem>>, vector<16x512xf32>,
    %266 = vector.extract_strided_slice %241 {offsets = [96, 0], sizes = [16, 512], strides = [1, 1]} : vector<128x512xf32> to vector<16x512xf32>
    %267 = vector.extract_strided_slice %241 {offsets = [16, 0], sizes = [16, 512], strides = [1, 1]} : vector<128x512xf32> to vector<16x512xf32>
    %268 = arith.select %18, %266, %267 : vector<16x512xi1>, vector<16x512xf32>
    %c96_77 = arith.constant 96 : index
    %c0_78 = arith.constant 0 : index
    %269 = vector.load %arg11[%c96_77, %c0_78] : memref<128x512xf32, #tpu.memory_space<vmem>>, vector<16x512xf32>
    tpu.vector_store %arg11[%c96_77, %c0_78], %268 {strides = array<i32>} : memref<128x512xf32, #tpu.memory_space<vmem>>, vector<16x512xf32>,
    %270 = vector.extract_strided_slice %241 {offsets = [112, 0], sizes = [16, 512], strides = [1, 1]} : vector<128x512xf32> to vector<16x512xf32>
    %271 = vector.extract_strided_slice %241 {offsets = [0, 0], sizes = [16, 512], strides = [1, 1]} : vector<128x512xf32> to vector<16x512xf32>
    %272 = arith.select %18, %270, %271 : vector<16x512xi1>, vector<16x512xf32>
    %c112_79 = arith.constant 112 : index
    %c0_80 = arith.constant 0 : index
    %273 = vector.load %arg11[%c112_79, %c0_80] : memref<128x512xf32, #tpu.memory_space<vmem>>, vector<16x512xf32>
    tpu.vector_store %arg11[%c112_79, %c0_80], %272 {strides = array<i32>} : memref<128x512xf32, #tpu.memory_space<vmem>>, vector<16x512xf32>,
    %cst_81 = arith.constant 0.000000e+00 : f32
    %274 = vector.broadcast %cst_81 : f32 to vector<16x128xf32>
    %cst_82 = arith.constant 0.000000e+00 : f32
    %275 = vector.broadcast %cst_82 : f32 to vector<16x128xf32>
    %c0_83 = arith.constant 0 : index
    %c0_84 = arith.constant 0 : index
    %276 = vector.load %arg11[%c0_83, %c0_84] : memref<128x512xf32, #tpu.memory_space<vmem>>, vector<16x512xf32>
    %277 = arith.truncf %274 : vector<16x128xf32> to vector<16x128xbf16>
    %cst_85 = arith.constant dense<0.000000e+00> : vector<16x512xf32>
    %278 = tpu.matmul %277, %237, %cst_85 {dimension_numbers = #tpu.dot_dimension_numbers<[1], [0], [0], [1], [0, 0, 1, 1], [], []>} : vector<16x128xbf16>, vector<128x512xbf16>, vector<16x512xf32> -> vector<16x512xf32>
    %279 = arith.addf %276, %278 : vector<16x512xf32>
    %280 = vector.extract_strided_slice %279 {offsets = [0, 0], sizes = [16, 384], strides = [1, 1]} : vector<16x512xf32> to vector<16x384xf32>
    %281 = arith.negf %280 : vector<16x384xf32>
    %282 = math.exp %281 : vector<16x384xf32>
    %cst_86 = arith.constant 1.000000e+00 : f32
    %283 = vector.broadcast %cst_86 : f32 to vector<16x384xf32>
    %284 = arith.addf %283, %282 : vector<16x384xf32>
    %285 = arith.divf %283, %284 : vector<16x384xf32>
    %286 = vector.extract_strided_slice %279 {offsets = [0, 384], sizes = [16, 128], strides = [1, 1]} : vector<16x512xf32> to vector<16x128xf32>
    %287 = math.tanh %286 : vector<16x128xf32>
    %288 = vector.extract_strided_slice %285 {offsets = [0, 128], sizes = [16, 128], strides = [1, 1]} : vector<16x384xf32> to vector<16x128xf32>
    %289 = arith.mulf %288, %275 : vector<16x128xf32>
    %290 = vector.extract_strided_slice %285 {offsets = [0, 0], sizes = [16, 128], strides = [1, 1]} : vector<16x384xf32> to vector<16x128xf32>
    %291 = arith.mulf %290, %287 : vector<16x128xf32>
    %292 = arith.addf %289, %291 : vector<16x128xf32>
    %293 = vector.extract_strided_slice %285 {offsets = [0, 256], sizes = [16, 128], strides = [1, 1]} : vector<16x384xf32> to vector<16x128xf32>
    %294 = math.tanh %292 : vector<16x128xf32>
    %295 = arith.mulf %293, %294 : vector<16x128xf32>
    %c16_87 = arith.constant 16 : index
    %c0_88 = arith.constant 0 : index
    %296 = vector.load %arg11[%c16_87, %c0_88] : memref<128x512xf32, #tpu.memory_space<vmem>>, vector<16x512xf32>
    %297 = arith.truncf %295 : vector<16x128xf32> to vector<16x128xbf16>
    %cst_89 = arith.constant dense<0.000000e+00> : vector<16x512xf32>
    %298 = tpu.matmul %297, %237, %cst_89 {dimension_numbers = #tpu.dot_dimension_numbers<[1], [0], [0], [1], [0, 0, 1, 1], [], []>} : vector<16x128xbf16>, vector<128x512xbf16>, vector<16x512xf32> -> vector<16x512xf32>
    %299 = arith.addf %296, %298 : vector<16x512xf32>
    %300 = vector.extract_strided_slice %299 {offsets = [0, 0], sizes = [16, 384], strides = [1, 1]} : vector<16x512xf32> to vector<16x384xf32>
    %301 = arith.negf %300 : vector<16x384xf32>
    %302 = math.exp %301 : vector<16x384xf32>
    %cst_90 = arith.constant 1.000000e+00 : f32
    %303 = vector.broadcast %cst_90 : f32 to vector<16x384xf32>
    %304 = arith.addf %303, %302 : vector<16x384xf32>
    %305 = arith.divf %303, %304 : vector<16x384xf32>
    %306 = vector.extract_strided_slice %299 {offsets = [0, 384], sizes = [16, 128], strides = [1, 1]} : vector<16x512xf32> to vector<16x128xf32>
    %307 = math.tanh %306 : vector<16x128xf32>
    %308 = vector.extract_strided_slice %305 {offsets = [0, 128], sizes = [16, 128], strides = [1, 1]} : vector<16x384xf32> to vector<16x128xf32>
    %309 = arith.mulf %308, %292 : vector<16x128xf32>
    %310 = vector.extract_strided_slice %305 {offsets = [0, 0], sizes = [16, 128], strides = [1, 1]} : vector<16x384xf32> to vector<16x128xf32>
    %311 = arith.mulf %310, %307 : vector<16x128xf32>
    %312 = arith.addf %309, %311 : vector<16x128xf32>
    %313 = vector.extract_strided_slice %305 {offsets = [0, 256], sizes = [16, 128], strides = [1, 1]} : vector<16x384xf32> to vector<16x128xf32>
    %314 = math.tanh %312 : vector<16x128xf32>
    %315 = arith.mulf %313, %314 : vector<16x128xf32>
    %c32_91 = arith.constant 32 : index
    %c0_92 = arith.constant 0 : index
    %316 = vector.load %arg11[%c32_91, %c0_92] : memref<128x512xf32, #tpu.memory_space<vmem>>, vector<16x512xf32>
    %317 = arith.truncf %315 : vector<16x128xf32> to vector<16x128xbf16>
    %cst_93 = arith.constant dense<0.000000e+00> : vector<16x512xf32>
    %318 = tpu.matmul %317, %237, %cst_93 {dimension_numbers = #tpu.dot_dimension_numbers<[1], [0], [0], [1], [0, 0, 1, 1], [], []>} : vector<16x128xbf16>, vector<128x512xbf16>, vector<16x512xf32> -> vector<16x512xf32>
    %319 = arith.addf %316, %318 : vector<16x512xf32>
    %320 = vector.extract_strided_slice %319 {offsets = [0, 0], sizes = [16, 384], strides = [1, 1]} : vector<16x512xf32> to vector<16x384xf32>
    %321 = arith.negf %320 : vector<16x384xf32>
    %322 = math.exp %321 : vector<16x384xf32>
    %cst_94 = arith.constant 1.000000e+00 : f32
    %323 = vector.broadcast %cst_94 : f32 to vector<16x384xf32>
    %324 = arith.addf %323, %322 : vector<16x384xf32>
    %325 = arith.divf %323, %324 : vector<16x384xf32>
    %326 = vector.extract_strided_slice %319 {offsets = [0, 384], sizes = [16, 128], strides = [1, 1]} : vector<16x512xf32> to vector<16x128xf32>
    %327 = math.tanh %326 : vector<16x128xf32>
    %328 = vector.extract_strided_slice %325 {offsets = [0, 128], sizes = [16, 128], strides = [1, 1]} : vector<16x384xf32> to vector<16x128xf32>
    %329 = arith.mulf %328, %312 : vector<16x128xf32>
    %330 = vector.extract_strided_slice %325 {offsets = [0, 0], sizes = [16, 128], strides = [1, 1]} : vector<16x384xf32> to vector<16x128xf32>
    %331 = arith.mulf %330, %327 : vector<16x128xf32>
    %332 = arith.addf %329, %331 : vector<16x128xf32>
    %333 = vector.extract_strided_slice %325 {offsets = [0, 256], sizes = [16, 128], strides = [1, 1]} : vector<16x384xf32> to vector<16x128xf32>
    %334 = math.tanh %332 : vector<16x128xf32>
    %335 = arith.mulf %333, %334 : vector<16x128xf32>
    %c48_95 = arith.constant 48 : index
    %c0_96 = arith.constant 0 : index
    %336 = vector.load %arg11[%c48_95, %c0_96] : memref<128x512xf32, #tpu.memory_space<vmem>>, vector<16x512xf32>
    %337 = arith.truncf %335 : vector<16x128xf32> to vector<16x128xbf16>
    %cst_97 = arith.constant dense<0.000000e+00> : vector<16x512xf32>
    %338 = tpu.matmul %337, %237, %cst_97 {dimension_numbers = #tpu.dot_dimension_numbers<[1], [0], [0], [1], [0, 0, 1, 1], [], []>} : vector<16x128xbf16>, vector<128x512xbf16>, vector<16x512xf32> -> vector<16x512xf32>
    %339 = arith.addf %336, %338 : vector<16x512xf32>
    %340 = vector.extract_strided_slice %339 {offsets = [0, 0], sizes = [16, 384], strides = [1, 1]} : vector<16x512xf32> to vector<16x384xf32>
    %341 = arith.negf %340 : vector<16x384xf32>
    %342 = math.exp %341 : vector<16x384xf32>
    %cst_98 = arith.constant 1.000000e+00 : f32
    %343 = vector.broadcast %cst_98 : f32 to vector<16x384xf32>
    %344 = arith.addf %343, %342 : vector<16x384xf32>
    %345 = arith.divf %343, %344 : vector<16x384xf32>
    %346 = vector.extract_strided_slice %339 {offsets = [0, 384], sizes = [16, 128], strides = [1, 1]} : vector<16x512xf32> to vector<16x128xf32>
    %347 = math.tanh %346 : vector<16x128xf32>
    %348 = vector.extract_strided_slice %345 {offsets = [0, 128], sizes = [16, 128], strides = [1, 1]} : vector<16x384xf32> to vector<16x128xf32>
    %349 = arith.mulf %348, %332 : vector<16x128xf32>
    %350 = vector.extract_strided_slice %345 {offsets = [0, 0], sizes = [16, 128], strides = [1, 1]} : vector<16x384xf32> to vector<16x128xf32>
    %351 = arith.mulf %350, %347 : vector<16x128xf32>
    %352 = arith.addf %349, %351 : vector<16x128xf32>
    %353 = vector.extract_strided_slice %345 {offsets = [0, 256], sizes = [16, 128], strides = [1, 1]} : vector<16x384xf32> to vector<16x128xf32>
    %354 = math.tanh %352 : vector<16x128xf32>
    %355 = arith.mulf %353, %354 : vector<16x128xf32>
    %c64_99 = arith.constant 64 : index
    %c0_100 = arith.constant 0 : index
    %356 = vector.load %arg11[%c64_99, %c0_100] : memref<128x512xf32, #tpu.memory_space<vmem>>, vector<16x512xf32>
    %357 = arith.truncf %355 : vector<16x128xf32> to vector<16x128xbf16>
    %cst_101 = arith.constant dense<0.000000e+00> : vector<16x512xf32>
    %358 = tpu.matmul %357, %237, %cst_101 {dimension_numbers = #tpu.dot_dimension_numbers<[1], [0], [0], [1], [0, 0, 1, 1], [], []>} : vector<16x128xbf16>, vector<128x512xbf16>, vector<16x512xf32> -> vector<16x512xf32>
    %359 = arith.addf %356, %358 : vector<16x512xf32>
    %360 = vector.extract_strided_slice %359 {offsets = [0, 0], sizes = [16, 384], strides = [1, 1]} : vector<16x512xf32> to vector<16x384xf32>
    %361 = arith.negf %360 : vector<16x384xf32>
    %362 = math.exp %361 : vector<16x384xf32>
    %cst_102 = arith.constant 1.000000e+00 : f32
    %363 = vector.broadcast %cst_102 : f32 to vector<16x384xf32>
    %364 = arith.addf %363, %362 : vector<16x384xf32>
    %365 = arith.divf %363, %364 : vector<16x384xf32>
    %366 = vector.extract_strided_slice %359 {offsets = [0, 384], sizes = [16, 128], strides = [1, 1]} : vector<16x512xf32> to vector<16x128xf32>
    %367 = math.tanh %366 : vector<16x128xf32>
    %368 = vector.extract_strided_slice %365 {offsets = [0, 128], sizes = [16, 128], strides = [1, 1]} : vector<16x384xf32> to vector<16x128xf32>
    %369 = arith.mulf %368, %352 : vector<16x128xf32>
    %370 = vector.extract_strided_slice %365 {offsets = [0, 0], sizes = [16, 128], strides = [1, 1]} : vector<16x384xf32> to vector<16x128xf32>
    %371 = arith.mulf %370, %367 : vector<16x128xf32>
    %372 = arith.addf %369, %371 : vector<16x128xf32>
    %373 = vector.extract_strided_slice %365 {offsets = [0, 256], sizes = [16, 128], strides = [1, 1]} : vector<16x384xf32> to vector<16x128xf32>
    %374 = math.tanh %372 : vector<16x128xf32>
    %375 = arith.mulf %373, %374 : vector<16x128xf32>
    %c80_103 = arith.constant 80 : index
    %c0_104 = arith.constant 0 : index
    %376 = vector.load %arg11[%c80_103, %c0_104] : memref<128x512xf32, #tpu.memory_space<vmem>>, vector<16x512xf32>
    %377 = arith.truncf %375 : vector<16x128xf32> to vector<16x128xbf16>
    %cst_105 = arith.constant dense<0.000000e+00> : vector<16x512xf32>
    %378 = tpu.matmul %377, %237, %cst_105 {dimension_numbers = #tpu.dot_dimension_numbers<[1], [0], [0], [1], [0, 0, 1, 1], [], []>} : vector<16x128xbf16>, vector<128x512xbf16>, vector<16x512xf32> -> vector<16x512xf32>
    %379 = arith.addf %376, %378 : vector<16x512xf32>
    %380 = vector.extract_strided_slice %379 {offsets = [0, 0], sizes = [16, 384], strides = [1, 1]} : vector<16x512xf32> to vector<16x384xf32>
    %381 = arith.negf %380 : vector<16x384xf32>
    %382 = math.exp %381 : vector<16x384xf32>
    %cst_106 = arith.constant 1.000000e+00 : f32
    %383 = vector.broadcast %cst_106 : f32 to vector<16x384xf32>
    %384 = arith.addf %383, %382 : vector<16x384xf32>
    %385 = arith.divf %383, %384 : vector<16x384xf32>
    %386 = vector.extract_strided_slice %379 {offsets = [0, 384], sizes = [16, 128], strides = [1, 1]} : vector<16x512xf32> to vector<16x128xf32>
    %387 = math.tanh %386 : vector<16x128xf32>
    %388 = vector.extract_strided_slice %385 {offsets = [0, 128], sizes = [16, 128], strides = [1, 1]} : vector<16x384xf32> to vector<16x128xf32>
    %389 = arith.mulf %388, %372 : vector<16x128xf32>
    %390 = vector.extract_strided_slice %385 {offsets = [0, 0], sizes = [16, 128], strides = [1, 1]} : vector<16x384xf32> to vector<16x128xf32>
    %391 = arith.mulf %390, %387 : vector<16x128xf32>
    %392 = arith.addf %389, %391 : vector<16x128xf32>
    %393 = vector.extract_strided_slice %385 {offsets = [0, 256], sizes = [16, 128], strides = [1, 1]} : vector<16x384xf32> to vector<16x128xf32>
    %394 = math.tanh %392 : vector<16x128xf32>
    %395 = arith.mulf %393, %394 : vector<16x128xf32>
    %c96_107 = arith.constant 96 : index
    %c0_108 = arith.constant 0 : index
    %396 = vector.load %arg11[%c96_107, %c0_108] : memref<128x512xf32, #tpu.memory_space<vmem>>, vector<16x512xf32>
    %397 = arith.truncf %395 : vector<16x128xf32> to vector<16x128xbf16>
    %cst_109 = arith.constant dense<0.000000e+00> : vector<16x512xf32>
    %398 = tpu.matmul %397, %237, %cst_109 {dimension_numbers = #tpu.dot_dimension_numbers<[1], [0], [0], [1], [0, 0, 1, 1], [], []>} : vector<16x128xbf16>, vector<128x512xbf16>, vector<16x512xf32> -> vector<16x512xf32>
    %399 = arith.addf %396, %398 : vector<16x512xf32>
    %400 = vector.extract_strided_slice %399 {offsets = [0, 0], sizes = [16, 384], strides = [1, 1]} : vector<16x512xf32> to vector<16x384xf32>
    %401 = arith.negf %400 : vector<16x384xf32>
    %402 = math.exp %401 : vector<16x384xf32>
    %cst_110 = arith.constant 1.000000e+00 : f32
    %403 = vector.broadcast %cst_110 : f32 to vector<16x384xf32>
    %404 = arith.addf %403, %402 : vector<16x384xf32>
    %405 = arith.divf %403, %404 : vector<16x384xf32>
    %406 = vector.extract_strided_slice %399 {offsets = [0, 384], sizes = [16, 128], strides = [1, 1]} : vector<16x512xf32> to vector<16x128xf32>
    %407 = math.tanh %406 : vector<16x128xf32>
    %408 = vector.extract_strided_slice %405 {offsets = [0, 128], sizes = [16, 128], strides = [1, 1]} : vector<16x384xf32> to vector<16x128xf32>
    %409 = arith.mulf %408, %392 : vector<16x128xf32>
    %410 = vector.extract_strided_slice %405 {offsets = [0, 0], sizes = [16, 128], strides = [1, 1]} : vector<16x384xf32> to vector<16x128xf32>
    %411 = arith.mulf %410, %407 : vector<16x128xf32>
    %412 = arith.addf %409, %411 : vector<16x128xf32>
    %413 = vector.extract_strided_slice %405 {offsets = [0, 256], sizes = [16, 128], strides = [1, 1]} : vector<16x384xf32> to vector<16x128xf32>
    %414 = math.tanh %412 : vector<16x128xf32>
    %415 = arith.mulf %413, %414 : vector<16x128xf32>
    %c112_111 = arith.constant 112 : index
    %c0_112 = arith.constant 0 : index
    %416 = vector.load %arg11[%c112_111, %c0_112] : memref<128x512xf32, #tpu.memory_space<vmem>>, vector<16x512xf32>
    %417 = arith.truncf %415 : vector<16x128xf32> to vector<16x128xbf16>
    %cst_113 = arith.constant dense<0.000000e+00> : vector<16x512xf32>
    %418 = tpu.matmul %417, %237, %cst_113 {dimension_numbers = #tpu.dot_dimension_numbers<[1], [0], [0], [1], [0, 0, 1, 1], [], []>} : vector<16x128xbf16>, vector<128x512xbf16>, vector<16x512xf32> -> vector<16x512xf32>
    %419 = arith.addf %416, %418 : vector<16x512xf32>
    %420 = vector.extract_strided_slice %419 {offsets = [0, 0], sizes = [16, 384], strides = [1, 1]} : vector<16x512xf32> to vector<16x384xf32>
    %421 = arith.negf %420 : vector<16x384xf32>
    %422 = math.exp %421 : vector<16x384xf32>
    %cst_114 = arith.constant 1.000000e+00 : f32
    %423 = vector.broadcast %cst_114 : f32 to vector<16x384xf32>
    %424 = arith.addf %423, %422 : vector<16x384xf32>
    %425 = arith.divf %423, %424 : vector<16x384xf32>
    %426 = vector.extract_strided_slice %419 {offsets = [0, 384], sizes = [16, 128], strides = [1, 1]} : vector<16x512xf32> to vector<16x128xf32>
    %427 = math.tanh %426 : vector<16x128xf32>
    %428 = vector.extract_strided_slice %425 {offsets = [0, 128], sizes = [16, 128], strides = [1, 1]} : vector<16x384xf32> to vector<16x128xf32>
    %429 = arith.mulf %428, %412 : vector<16x128xf32>
    %430 = vector.extract_strided_slice %425 {offsets = [0, 0], sizes = [16, 128], strides = [1, 1]} : vector<16x384xf32> to vector<16x128xf32>
    %431 = arith.mulf %430, %427 : vector<16x128xf32>
    %432 = arith.addf %429, %431 : vector<16x128xf32>
    %433 = vector.extract_strided_slice %425 {offsets = [0, 256], sizes = [16, 128], strides = [1, 1]} : vector<16x384xf32> to vector<16x128xf32>
    %434 = math.tanh %432 : vector<16x128xf32>
    %435 = arith.mulf %433, %434 : vector<16x128xf32>
    %436 = arith.truncf %435 : vector<16x128xf32> to vector<16x128xbf16>
    %c0_115 = arith.constant 0 : index
    %c0_116 = arith.constant 0 : index
    %437 = vector.load %arg8[%c0_115, %c0_116] : memref<128x128xbf16, #tpu.memory_space<vmem>>, vector<128x128xbf16>
    %cst_117 = arith.constant dense<0.000000e+00> : vector<16x128xf32>
    %438 = tpu.matmul %436, %437, %cst_117 {dimension_numbers = #tpu.dot_dimension_numbers<[1], [0], [0], [1], [0, 0, 1, 1], [], []>} : vector<16x128xbf16>, vector<128x128xbf16>, vector<16x128xf32> -> vector<16x128xf32>
    %c0_118 = arith.constant 0 : index
    %c0_119 = arith.constant 0 : index
    %439 = vector.load %arg9[%c0_118, %c0_119] : memref<1x128xf32, #tpu.memory_space<vmem>>, vector<1x128xf32>
    %440 = vector.broadcast %439 : vector<1x128xf32> to vector<16x128xf32>
    %441 = arith.addf %438, %440 : vector<16x128xf32>
    %c0_120 = arith.constant 0 : index
    %c0_121 = arith.constant 0 : index
    %442 = vector.load %arg10[%c0_120, %c0_121] : memref<16x128xf32, #tpu.memory_space<vmem>>, vector<16x128xf32>
    tpu.vector_store %arg10[%c0_120, %c0_121], %441 {strides = array<i32>} : memref<16x128xf32, #tpu.memory_space<vmem>>, vector<16x128xf32>,
    return
  }
  func.func @transform_0(%arg0: i32) -> (i32, i32) {
    %c0_i32 = arith.constant 0 : i32
    %c0_i32_0 = arith.constant 0 : i32
    %c0_i32_1 = arith.constant 0 : i32
    return %c0_i32, %c0_i32_0 : i32, i32
  }
  func.func @transform_1(%arg0: i32) -> (i32, i32) {
    %c0_i32 = arith.constant 0 : i32
    %c0_i32_0 = arith.constant 0 : i32
    %c0_i32_1 = arith.constant 0 : i32
    return %c0_i32, %c0_i32_0 : i32, i32
  }
  func.func @transform_2(%arg0: i32) -> (i32, i32) {
    %c0_i32 = arith.constant 0 : i32
    %c0_i32_0 = arith.constant 0 : i32
    %c0_i32_1 = arith.constant 0 : i32
    return %c0_i32, %c0_i32_0 : i32, i32
  }
  func.func @transform_3(%arg0: i32) -> (i32, i32) {
    %c0_i32 = arith.constant 0 : i32
    %c0_i32_0 = arith.constant 0 : i32
    %c0_i32_1 = arith.constant 0 : i32
    return %c0_i32, %c0_i32_0 : i32, i32
  }
  func.func @transform_4(%arg0: i32) -> (i32, i32) {
    %c0_i32 = arith.constant 0 : i32
    %c0_i32_0 = arith.constant 0 : i32
    %c0_i32_1 = arith.constant 0 : i32
    return %c0_i32, %c0_i32_0 : i32, i32
  }
  func.func @transform_5(%arg0: i32) -> (i32, i32) {
    %c0_i32 = arith.constant 0 : i32
    %c0_i32_0 = arith.constant 0 : i32
    %c0_i32_1 = arith.constant 0 : i32
    return %c0_i32, %c0_i32_0 : i32, i32
  }
  func.func @transform_6(%arg0: i32) -> (i32, i32) {
    %c0_i32 = arith.constant 0 : i32
    %c0_i32_0 = arith.constant 0 : i32
    %c0_i32_1 = arith.constant 0 : i32
    return %c0_i32, %c0_i32_0 : i32, i32
  }
  func.func @transform_7(%arg0: i32) -> (i32, i32) {
    %c0_i32 = arith.constant 0 : i32
    %c0_i32_0 = arith.constant 0 : i32
    %c0_i32_1 = arith.constant 0 : i32
    return %c0_i32, %c0_i32_0 : i32, i32
  }
  func.func @transform_8(%arg0: i32) -> (i32, i32) {
    %c0_i32 = arith.constant 0 : i32
    %c0_i32_0 = arith.constant 0 : i32
    %c0_i32_1 = arith.constant 0 : i32
    return %c0_i32, %c0_i32_0 : i32, i32
  }
  func.func @transform_9(%arg0: i32) -> (i32, i32) {
    %c0_i32 = arith.constant 0 : i32
    %c0_i32_0 = arith.constant 0 : i32
    %c0_i32_1 = arith.constant 0 : i32
    return %c0_i32, %c0_i32_0 : i32, i32
  }
}

</mosaic_0001>

<bundles_post_ra>
// kernel: bidirectional_lstm_forward.1
= control target key start
LH: loop header
LB: loop body
LE: loop exit
PB: predicated region body
PF: predicated region fallthrough
CT: control target
= control target key end

     0   :  { %14 = vsyncpa [#allocation5], 0  ;;  %s7813_s0 = inlined_call_operand.vmem [shape: f32[128,4], index: 0, kind: input, shape index: {}]   ;;  %s7814_s1 = inlined_call_operand.vmem [shape: bf16[4,512], index: 1, kind: input, shape index: {}]   ;;  %s7815_s2 = inlined_call_operand.hbm [shape: bf16[128,512], index: 2, kind: input, shape index: {}]   ;;  %s7816_s3 = inlined_call_operand.vmem [shape: f32[1,512], index: 3, kind: input, shape index: {}]   ;;  %s7817_s4 = inlined_call_operand.hbm [shape: bf16[128,512], index: 4, kind: input, shape index: {}]   ;;  %s7818_s5 = inlined_call_operand.hbm [shape: bf16[128,512], index: 5, kind: input, shape index: {}]   ;;  %s7819_s6 = inlined_call_operand.vmem [shape: f32[1,512], index: 6, kind: input, shape index: {}]   ;;  %s7820_s7 = inlined_call_operand.vmem [shape: bf16[128,128], index: 7, kind: input, shape index: {}]   ;;  %s7821_s8 = inlined_call_operand.vmem [shape: f32[1,128], index: 8, kind: input, shape index: {}]   ;;  %s7822_s9 = inlined_call_operand.vmem [shape: f32[16,128], index: 9, kind: output, shape index: {}]  }
   0x1   :  { %15 = vsyncpa [#allocation7], 0  ;;  %s5190_s30 = smov [#allocation6]   ;;  %s5191_s11 = smov [#allocation4]  }
   0x2   :  { %s39_s10 = sshll.u32 %s5190_s30, 4  ;;  %s25_s12 = sshll.u32 %s5191_s11, 4  ;;  %s40_s10 = int_to_ptr.vmem [resolvable:$true] %s39_s10  ;;  %s26_s12 = int_to_ptr.vmem [resolvable:$true] %s25_s12 }
   0x3   :  { %s5134_s13 = scalar_lea.vmem %s40_s10, 4096  ;;  %p5139_p1 = scmp.lt.s32.totalorder %s40_s10, %s40_s10 }
   0x4   :  { %p5135_p0 = scmp.ne.s32.totalorder %s40_s10, %s5134_s13  ;;  %p5140_p2 = scmp.lt.s32.totalorder %s5134_s13, %s5134_s13 }
   0x6   :  { %p5141_p3 = por %p5140_p2, %p5139_p1 }
   0x8   :  { %p5142_p4 = pnand %p5141_p3, %p5135_p0 }
   0xa   :  { %5145 = shalt.err (!%p5142_p4)
}
   0xb   :  { %s5192_s14 = smov 256   ;;  %s5193_s15 = smov 16  }
   0xc   :  { %45 = dma.hbm_to_vmem [thread:$0]  %s7817_s4, 4096, %s40_s10, [#allocation7], %s5192_s14, %s5192_s14, %s5193_s15  }
   0xd   :  { %s5154_s18 = scalar_lea.vmem %s26_s12, 4096  ;;  %p5159_p6 = scmp.lt.s32.totalorder %s26_s12, %s26_s12 }
   0xe   :  { %p5155_p5 = scmp.ne.s32.totalorder %s26_s12, %s5154_s18  ;;  %p5160_p7 = scmp.lt.s32.totalorder %s5154_s18, %s5154_s18 }
  0x10   :  { %p5161_p8 = por %p5160_p7, %p5159_p6 }
  0x12   :  { %p5162_p9 = pnand %p5161_p8, %p5155_p5 }
  0x14   :  { %5165 = shalt.err (!%p5162_p9)
}
  0x15   :  { %31 = dma.hbm_to_vmem [thread:$0]  %s7815_s2, 4096, %s26_s12, [#allocation5], %s5192_s14, %s5192_s14, %s5193_s15  }
  0x16   :  { %s5194_s21 = smov [#allocation8]  }
  0x17   :  { %s51_s22 = sshll.u32 %s5194_s21, 4  ;;  %s52_s22 = int_to_ptr.vmem [resolvable:$true] %s51_s22 }
  0x18   :  { %s5174_s23 = scalar_lea.vmem %s52_s22, 4096  ;;  %p5179_p11 = scmp.lt.s32.totalorder %s52_s22, %s52_s22 }
  0x19   :  { %p5175_p10 = scmp.ne.s32.totalorder %s52_s22, %s5174_s23  ;;  %p5180_p12 = scmp.lt.s32.totalorder %s5174_s23, %s5174_s23 }
  0x1b   :  { %p5181_p13 = por %p5180_p12, %p5179_p11 }
  0x1d   :  { %p5182_p0 = pnand %p5181_p13, %p5175_p10 }
  0x1f   :  { %5185 = shalt.err (!%p5182_p0)
}
  0x20   :  { %57 = dma.hbm_to_vmem [thread:$0]  %s7818_s5, 4096, %s52_s22, [#allocation7], %s5192_s14, %s5192_s14, %s5193_s15  }
  0x21   :  { %5186 = dma.done.wait [#allocation5], 4096  }
  0x22   :  { %5187 = vsyncadd [#allocation5], 4294963200 }
  0x23   :  { %5188 = dma.done.wait [#allocation7], 8192  }
  0x24   :  { %5189 = vsyncadd [#allocation7], 4294959104  ;;  %v74_v0 = vlaneseq  ;;  %v5195_v1 = vmov 1983009808   ;;  %v7827_v3 = vmov 0   ;;  %v156_v7 = vld [vmem:[%s7814_s1] sm:$0xff] }
  0x25   :  { %v214_v2 = vunpack.c.l.s4 %v5195_v1  ;;  %299 = vmatprep.mubr.bf16.mxu0 %v7827_v3  ;;  %359 = vmatprep.mubr.bf16.mxu1 %v7827_v3  ;;  %v212_v8 = vcombine.high %v156_v7, %v156_v7  ;;  %vm254_vm0 = vcmask 1041408   ;;  %v132_v10 = vld [vmem:[%s7813_s0] sm:$0xff]  ;;  %v133_v11 = vld [vmem:[%s7813_s0 + $0x8] sm:$0xff]  ;;  %vm229_vm1 = vcmask 31744   ;;  %v134_v25 = vld [vmem:[%s7813_s0 + $0x10] sm:$0xff] }
  0x26   :  { %v5261_v4 = vshrl.u32 %v74_v0, 7  ;;  %v144_v13 = vld [vmem:[%s7813_s0 + $0x60] sm:$0xff]  ;;  %v145_v14 = vld [vmem:[%s7813_s0 + $0x68] sm:$0xff]  ;;  %v148_v19 = vpack.c.bf16 %v133_v11, %v132_v10  ;;  %v135_v26 = vld [vmem:[%s7813_s0 + $0x18] sm:$0xff]  ;;  %vm5198_vm6 = vmmov 0  }
  0x27   :  { %v215_v5 = vunpack.c.0.s8 %v214_v2  ;;  %v5280_v17 = vld [vmem:[#allocation4 + $0xe4] ss:$16 sps:$4 sm:$0xff]   ;;  %v5284_v20 = vpack.c.bf16 %v145_v14, %v144_v13  ;;  %v5286_v21 = vld [vmem:[#allocation4 + $0xe0] ss:$16 sps:$4 sm:$0xff]   ;;  %v5291_v23 = vld [vmem:[#allocation4 + $0xec] ss:$16 sps:$4 sm:$0xff]   ;;  %v149_v31 = vpack.c.bf16 %v135_v26, %v134_v25 }
  0x28   :  { %8027 = vst [vmem:[#allocation11_spill] sm:$0xff] %v5261_v4  ;;  %v5293_v24 = vld [vmem:[#allocation4 + $0xc4] ss:$16 sps:$4 sm:$0xff]   ;;  %v147_v28 = vld [vmem:[%s7813_s0 + $0x78] sm:$0xff]  ;;  %v5313_v29 = vld [vmem:[#allocation4 + $0xc0] ss:$16 sps:$4 sm:$0xff]  }
  0x29   :  { %v218_v6 = vsub.s32 %v215_v5, %v5261_v4  ;;  %v146_v27 = vld [vmem:[%s7813_s0 + $0x70] sm:$0xff]  ;;  %v136_v35 = vld [vmem:[%s7813_s0 + $0x20] sm:$0xff]  ;;  %v137_v36 = vld [vmem:[%s7813_s0 + $0x28] sm:$0xff]  ;;  %v7826_v10 = vsub.s32 0, %v5261_v4  ;;  %v5504_v14 = vand.u32 127, %v74_v0 }
  0x2a   :  { %v5317_v30 = vld [vmem:[#allocation4 + $0xa4] ss:$16 sps:$4 sm:$0xff]   ;;  %v5319_v32 = vpack.c.bf16 %v147_v28, %v146_v27  ;;  %v5322_v33 = vld [vmem:[#allocation4 + $0xa0] ss:$16 sps:$4 sm:$0xff]   ;;  %v150_v39 = vpack.c.bf16 %v137_v36, %v136_v35  ;;  %v5344_v40 = vld [vmem:[#allocation4 + $0xe8] ss:$16 sps:$4 sm:$0xff]  }
  0x2b   :  { %v219_v9 = vrot.slane %v156_v7, %v218_v6  ;;  %v226_v12 = vrot.slane %v212_v8, %v218_v6  ;;  %v5325_v34 = vld [vmem:[#allocation4 + $0x84] ss:$16 sps:$4 sm:$0xff]   ;;  %v5339_v37 = vld [vmem:[#allocation4 + $0x80] ss:$16 sps:$4 sm:$0xff]   ;;  %v5346_v41 = vld [vmem:[#allocation4 + $0xcc] ss:$16 sps:$4 sm:$0xff]  }
  0x2c   :  { %v5342_v38 = vld [vmem:[#allocation4 + $0x64] ss:$16 sps:$4 sm:$0xff]   ;;  %v139_v43 = vld [vmem:[%s7813_s0 + $0x38] sm:$0xff]  ;;  %v5358_v45 = vld [vmem:[#allocation4 + $0x60] ss:$16 sps:$4 sm:$0xff]   ;;  %8032 = vst [vmem:[#allocation16_spill] sm:$0xff] %v5504_v14 }
  0x2d   :  { %v227_v15 = vcombine.high %v219_v9, %v219_v9  ;;  %v256_v16 = vsel %vm254_vm0, %v219_v9, 0  ;;  %v228_v18 = vcombine.high %v226_v12, %v226_v12  ;;  %v262_v22 = vsel %vm254_vm0, %v226_v12, 0  ;;  %v138_v42 = vld [vmem:[%s7813_s0 + $0x30] sm:$0xff]  ;;  %v5355_v44 = vld [vmem:[#allocation4 + $0xc8] ss:$16 sps:$4 sm:$0xff]   ;;  %v140_v55 = vld [vmem:[%s7813_s0 + $0x40] sm:$0xff] }
  0x2e   :  { %v5362_v46 = vld [vmem:[#allocation4 + $0xac] ss:$16 sps:$4 sm:$0xff]   ;;  %v5364_v47 = vld [vmem:[#allocation4 + $0x44] ss:$16 sps:$4 sm:$0xff]   ;;  %v5368_v48 = vld [vmem:[#allocation4 + $0x40] ss:$16 sps:$4 sm:$0xff]   ;;  %v151_v49 = vpack.c.bf16 %v139_v43, %v138_v42 }
  0x2f   :  { %4132 = vmatprep.subr.msk.bf16.mxu0 %vm254_vm0, %v227_v15  ;;  %4380 = vmatprep.subr.msk.bf16.mxu1 %vm254_vm0, %v227_v15  ;;  %v5373_v50 = vld [vmem:[#allocation4 + $0xa8] ss:$16 sps:$4 sm:$0xff]   ;;  %v5376_v51 = vld [vmem:[#allocation4 + $0x24] ss:$16 sps:$4 sm:$0xff]   ;;  %v5379_v52 = vld [vmem:[#allocation4 + $0x8c] ss:$16 sps:$4 sm:$0xff]  }
  0x30   :  { %282 = vmatpush1.bf16.msra.mxu0 %v256_v16  ;;  %4381 = vmatpush1.bf16.msra.mxu1 %v256_v16  ;;  %v5381_v53 = vld [vmem:[#allocation4 + $0x20] ss:$16 sps:$4 sm:$0xff]   ;;  %v5384_v54 = vld [vmem:[#allocation4 + $0x4] ss:$16 sps:$4 sm:$0xff]   ;;  %v141_v56 = vld [vmem:[%s7813_s0 + $0x48] sm:$0xff]  ;;  %v7824_v12 = vsub.s32 1, %v5261_v4 }
  0x31   :  { %4141 = vmatprep.subr.msk.bf16.mxu1 %vm254_vm0, %v228_v18  ;;  %789 = vmatprep.subr.bf16.mxu0 %v5280_v17  ;;  %8028 = vst [vmem:[#allocation12_spill] sm:$0xff] %v5384_v54  ;;  %v5395_v57 = vld [vmem:[#allocation4 + $0x88] ss:$16 sps:$4 sm:$0xff]   ;;  %v5399_v58 = vld [vmem:[#allocation4] ss:$16 sps:$4 sm:$0xff]   ;;  %v152_v60 = vpack.c.bf16 %v141_v56, %v140_v55  ;;  %vm127_vm2 = vcmp.lt.s32.totalorder %v5504_v14, 64 }
  0x32   :  { %8029 = vst [vmem:[#allocation13_spill] sm:$0xff] %v5399_v58  ;;  %v5401_v59 = vld [vmem:[#allocation4 + $0x6c] ss:$16 sps:$4 sm:$0xff]   ;;  %v5408_v61 = vld [vmem:[#allocation4 + $0x68] ss:$16 sps:$4 sm:$0xff]   ;;  %v142_v63 = vld [vmem:[%s7813_s0 + $0x50] sm:$0xff] }
  0x33   :  { %4133 = vmatmul.mubr.msk.bf16.vlgmr.msra.gmra.mxu0 %vm229_vm1, %v148_v19  ;;  %4139 = vmatmul.mubr.msk.bf16.vlgmr.msra.gmra.mxu1 %vm229_vm1, %v5284_v20  ;;  %v5410_v62 = vld [vmem:[#allocation4 + $0x4c] ss:$16 sps:$4 sm:$0xff]   ;;  %v5423_v2 = vld [vmem:[#allocation4 + $0x48] ss:$16 sps:$4 sm:$0xff]   ;;  %v189_v11 = vld [vmem:[%s7816_s3] sm:$0xf] }
  0x34   :  { %395 = vmatpush1.bf16.msra.mxu1 %v262_v22  ;;  %309 = vmatprep.mubr.bf16.mxu0 %v7827_v3  ;;  %v143_v1 = vld [vmem:[%s7813_s0 + $0x58] sm:$0xff]  ;;  %v5501_v13 = vrot.slane %v189_v11, %v7826_v10  ;;  %v5508_v15 = vrot.slane %v189_v11, %v7824_v12  ;;  %v7823_v42 = vsub.s32 3, %v5261_v4 }
  0x35   :  { %369 = vmatprep.mubr.bf16.mxu1 %v7827_v3  ;;  %790 = vmatpush1.bf16.msra.mxu0 %v5286_v21  ;;  %v5427_v5 = vld [vmem:[#allocation4 + $0x2c] ss:$16 sps:$4 sm:$0xff]   ;;  %v153_v6 = vpack.c.bf16 %v143_v1, %v142_v63  ;;  %v5432_v7 = vld [vmem:[#allocation4 + $0x28] ss:$16 sps:$4 sm:$0xff]  }
  0x36   :  { %832 = vmatprep.subr.bf16.mxu1 %v5291_v23  ;;  %791 = vmatprep.subr.bf16.mxu0 %v5293_v24  ;;  %v5434_v8 = vld [vmem:[#allocation4 + $0xc] ss:$16 sps:$4 sm:$0xff]   ;;  %v5440_v9 = vld [vmem:[#allocation4 + $0x8] ss:$16 sps:$4 sm:$0xff]  }
  0x37   :  { %8030 = vst [vmem:[#allocation14_spill] sm:$0xff] %v5434_v8  ;;  %8031 = vst [vmem:[#allocation15_spill] sm:$0xff] %v5440_v9 }
  0x39   :  { %792 = vmatpush1.bf16.msra.mxu0 %v5313_v29 }
  0x3a   :  { %793 = vmatprep.subr.bf16.mxu0 %v5317_v30 }
  0x3b   :  { %4134 = vmatmul.mubr.msk.bf16.gmra.mxu0 %vm229_vm1, %v149_v31  ;;  %4140 = vmatmul.mubr.msk.bf16.gmra.mxu1 %vm229_vm1, %v5319_v32 }
  0x3c   :  { %319 = vmatprep.mubr.bf16.mxu0 %v7827_v3  ;;  %412 = vmatprep.mubr.bf16.mxu1 %v7827_v3 }
  0x3d   :  { %794 = vmatpush1.bf16.msra.mxu0 %v5322_v33 }
  0x3e   :  { %795 = vmatprep.subr.bf16.mxu0 %v5325_v34 }
  0x41   :  { %796 = vmatpush1.bf16.msra.mxu0 %v5339_v37 }
  0x42   :  { %797 = vmatprep.subr.bf16.mxu0 %v5342_v38 }
  0x43   :  { %4135 = vmatmul.mubr.msk.bf16.gmra.mxu0 %vm229_vm1, %v150_v39  ;;  %4142 = vmatmul.mubr.msk.bf16.vlgmr.msra.gmra.mxu1 %vm229_vm1, %v148_v19  ;;  %v76_v19 = vadd.s32 128, %v5504_v14 }
  0x44   :  { %833 = vmatpush1.bf16.msra.mxu1 %v5344_v40  ;;  %329 = vmatprep.mubr.bf16.mxu0 %v7827_v3 }
  0x45   :  { %422 = vmatprep.mubr.bf16.mxu1 %v7827_v3  ;;  %834 = vmatprep.subr.bf16.mxu1 %v5346_v41  ;;  %v90_v25 = vand.u32 127, %v76_v19 }
  0x46   :  { %798 = vmatpush1.bf16.msra.mxu0 %v5358_v45 }
  0x47   :  { %799 = vmatprep.subr.bf16.mxu0 %v5364_v47  ;;  %vm5525_vm3 = vcmp.lt.s32.totalorder %v90_v25, 64 }
  0x48   :  { %835 = vmatpush1.bf16.msra.mxu1 %v5355_v44 }
  0x49   :  { %836 = vmatprep.subr.bf16.mxu1 %v5362_v46 }
  0x4a   :  { %800 = vmatpush1.bf16.msra.mxu0 %v5368_v48 }
  0x4b   :  { %4136 = vmatmul.mubr.msk.bf16.gmra.mxu0 %vm229_vm1, %v151_v49  ;;  %4143 = vmatmul.mubr.msk.bf16.gmra.mxu1 %vm229_vm1, %v149_v31  ;;  %v7825_v31 = vsub.s32 2, %v5261_v4 }
  0x4c   :  { %339 = vmatprep.mubr.bf16.mxu0 %v7827_v3  ;;  %432 = vmatprep.mubr.bf16.mxu1 %v7827_v3 }
  0x4d   :  { %837 = vmatpush1.bf16.msra.mxu1 %v5373_v50  ;;  %801 = vmatprep.subr.bf16.mxu0 %v5376_v51 }
  0x4e   :  { %838 = vmatprep.subr.bf16.mxu1 %v5379_v52  ;;  %802 = vmatpush1.bf16.msra.mxu0 %v5381_v53 }
  0x4f   :  { %803 = vmatprep.subr.bf16.mxu0 %v5384_v54 }
  0x51   :  { %839 = vmatpush1.bf16.msra.mxu1 %v5395_v57 }
  0x52   :  { %804 = vmatpush1.bf16.msra.mxu0 %v5399_v58  ;;  %840 = vmatprep.subr.bf16.mxu1 %v5401_v59 }
  0x53   :  { %4137 = vmatmul.mubr.msk.bf16.gmra.mxu0 %vm229_vm1, %v152_v60  ;;  %4144 = vmatmul.mubr.msk.bf16.gmra.mxu1 %vm229_vm1, %v150_v39 }
  0x54   :  { %349 = vmatprep.mubr.bf16.mxu0 %v7827_v3  ;;  %442 = vmatprep.mubr.bf16.mxu1 %v7827_v3 }
  0x55   :  { %841 = vmatpush1.bf16.msra.mxu1 %v5408_v61  ;;  %940 = vmatprep.subr.bf16.mxu0 %v5280_v17 }
  0x56   :  { %842 = vmatprep.subr.bf16.mxu1 %v5410_v62 }
  0x59   :  { %843 = vmatpush1.bf16.msra.mxu1 %v5423_v2 }
  0x5a   :  { %844 = vmatprep.subr.bf16.mxu1 %v5427_v5 }
  0x5b   :  { %4138 = vmatmul.mubr.msk.bf16.gmra.mxu0 %vm229_vm1, %v153_v6  ;;  %4145 = vmatmul.mubr.msk.bf16.gmra.mxu1 %vm229_vm1, %v151_v49 }
  0x5c   :  { %452 = vmatprep.mubr.bf16.mxu1 %v7827_v3  ;;  %821 = vmatprep.mubr.bf16.mxu0 %v7827_v3 }
  0x5d   :  { %845 = vmatpush1.bf16.msra.mxu1 %v5432_v7 }
  0x5e   :  { %846 = vmatprep.subr.bf16.mxu1 %v5434_v8 }
  0x61   :  { %847 = vmatpush1.bf16.msra.mxu1 %v5440_v9 }
  0x62   :  { %983 = vmatprep.subr.bf16.mxu1 %v5291_v23 }
  0x63   :  { %4146 = vmatmul.mubr.msk.bf16.gmra.mxu1 %vm229_vm1, %v152_v60  ;;  %822 = vmatmul.mubr.bf16.vlgmr.msra.gmra.mxu0 %v7827_v3 }
  0x64   :  { %462 = vmatprep.mubr.bf16.mxu1 %v7827_v3  ;;  %941 = vmatpush1.bf16.msra.mxu0 %v5286_v21 }
  0x65   :  { %942 = vmatprep.subr.bf16.mxu0 %v5293_v24  ;;  %972 = vmatprep.mubr.bf16.mxu0 %v7827_v3 }
  0x68   :  { %943 = vmatpush1.bf16.msra.mxu0 %v5313_v29 }
  0x69   :  { %944 = vmatprep.subr.bf16.mxu0 %v5317_v30 }
  0x6b   :  { %4147 = vmatmul.mubr.msk.bf16.gmra.mxu1 %vm229_vm1, %v153_v6 }
  0x6c   :  { %472 = vmatprep.mubr.bf16.mxu1 %v7827_v3  ;;  %945 = vmatpush1.bf16.msra.mxu0 %v5322_v33 }
  0x6d   :  { %946 = vmatprep.subr.bf16.mxu0 %v5325_v34 }
  0x70   :  { %947 = vmatpush1.bf16.msra.mxu0 %v5339_v37 }
  0x71   :  { %948 = vmatprep.subr.bf16.mxu0 %v5342_v38 }
  0x73   :  { %4148 = vmatmul.mubr.msk.bf16.gmra.mxu1 %vm229_vm1, %v5284_v20 }
  0x74   :  { %482 = vmatprep.mubr.bf16.mxu1 %v7827_v3  ;;  %949 = vmatpush1.bf16.msra.mxu0 %v5358_v45 }
  0x75   :  { %950 = vmatprep.subr.bf16.mxu0 %v5364_v47 }
  0x78   :  { %951 = vmatpush1.bf16.msra.mxu0 %v5368_v48 }
  0x79   :  { %952 = vmatprep.subr.bf16.mxu0 %v5376_v51 }
  0x7b   :  { %4149 = vmatmul.mubr.msk.bf16.gmra.mxu1 %vm229_vm1, %v5319_v32 }
  0x7c   :  { %864 = vmatprep.mubr.bf16.mxu1 %v7827_v3  ;;  %953 = vmatpush1.bf16.msra.mxu0 %v5381_v53 }
  0x7d   :  { %954 = vmatprep.subr.bf16.mxu0 %v5384_v54 }
  0x80   :  { %955 = vmatpush1.bf16.msra.mxu0 %v5399_v58 }
  0x81   :  { %1091 = vmatprep.subr.bf16.mxu0 %v5280_v17 }
  0x83   :  { %865 = vmatmul.mubr.bf16.vlgmr.msra.gmra.mxu1 %v7827_v3 }
  0x84   :  { %984 = vmatpush1.bf16.msra.mxu1 %v5344_v40  ;;  %1015 = vmatprep.mubr.bf16.mxu1 %v7827_v3 }
  0x85   :  { %985 = vmatprep.subr.bf16.mxu1 %v5346_v41 }
  0x88   :  { %986 = vmatpush1.bf16.msra.mxu1 %v5355_v44 }
  0x89   :  { %987 = vmatprep.subr.bf16.mxu1 %v5362_v46 }
  0x8c   :  { %988 = vmatpush1.bf16.msra.mxu1 %v5373_v50 }
  0x8d   :  { %989 = vmatprep.subr.bf16.mxu1 %v5379_v52 }
  0x90   :  { %990 = vmatpush1.bf16.msra.mxu1 %v5395_v57 }
  0x91   :  { %991 = vmatprep.subr.bf16.mxu1 %v5401_v59 }
  0x94   :  { %992 = vmatpush1.bf16.msra.mxu1 %v5408_v61 }
  0x95   :  { %993 = vmatprep.subr.bf16.mxu1 %v5410_v62 }
  0x98   :  { %994 = vmatpush1.bf16.msra.mxu1 %v5423_v2 }
  0x99   :  { %995 = vmatprep.subr.bf16.mxu1 %v5427_v5 }
  0x9c   :  { %996 = vmatpush1.bf16.msra.mxu1 %v5432_v7 }
  0x9d   :  { %997 = vmatprep.subr.bf16.mxu1 %v5434_v8 }
  0xa0   :  { %998 = vmatpush1.bf16.msra.mxu1 %v5440_v9 }
  0xa1   :  { %1134 = vmatprep.subr.bf16.mxu1 %v5291_v23 }
  0xf3   :  { %v301_v16 = vpop.f32.mrf.mxu0  ;;  %v361_v17 = vpop.f32.mrf.mxu1 }
  0xf4   :  { %v362_v18 = vadd.f32 %v361_v17, %v5501_v13  ;;  %v5518_v28 = vadd.f32 %v301_v16, %v5501_v13  ;;  %v5558_v16 = vrot.slane %v189_v11, %v7825_v31 }
  0xf5   :  { %v303_v20 = vpop.f32.mrf.mxu0  ;;  %v363_v21 = vpop.f32.mrf.mxu1 }
  0xf6   :  { %v5513_v22 = vadd.f32 %v363_v21, %v5508_v15  ;;  %v5530_v35 = vadd.f32 %v303_v20, %v5508_v15 }
  0xf7   :  { %v305_v23 = vpop.f32.mrf.mxu0  ;;  %v365_v24 = vpop.f32.mrf.mxu1 }
  0xf8   :  { %8033 = vst [vmem:[#allocation17_spill] sm:$0xff] %v5513_v22  ;;  %v366_v0 = vadd.f32 %v365_v24, %v5501_v13  ;;  %8036 = vst [vmem:[#allocation18_spill] sm:$0xff] %v5530_v35  ;;  %v5544_v56 = vadd.f32 %v305_v23, %v5501_v13 }
  0xf9   :  { %v307_v26 = vpop.f32.mrf.mxu0  ;;  %v367_v27 = vpop.f32.mrf.mxu1 }
  0xfa   :  { %v5569_v20 = vadd.f32 %v307_v26, %v5508_v15 }
  0xfb   :  { %v311_v29 = vpop.f32.mrf.mxu0  ;;  %v371_v30 = vpop.f32.mrf.mxu1 }
  0xfc   :  { %v312_v32 = vadd.f32 %v311_v29, %v5501_v13  ;;  %v5523_v33 = vadd.f32 %v371_v30, %v5501_v13  ;;  %8042 = vst [vmem:[#allocation24_spill] sm:$0xff] %v5569_v20  ;;  %v5581_v29 = vrot.slane %v189_v11, %v7823_v42 }
  0xfd   :  { %v313_v36 = vpop.f32.mrf.mxu0  ;;  %v373_v39 = vpop.f32.mrf.mxu1 }
  0xfe   :  { %v5534_v43 = vadd.f32 %v313_v36, %v5508_v15  ;;  %v5537_v49 = vadd.f32 %v373_v39, %v5508_v15  ;;  %v5541_v55 = vsel %vm127_vm2, %v312_v32, %v362_v18  ;;  %v5548_v1 = vsel %vm127_vm2, %v362_v18, %v312_v32 }
  0xff   :  { %8039 = vst [vmem:[#allocation21_spill] sm:$0xff] %v5541_v55  ;;  %v315_v60 = vpop.f32.mrf.mxu0  ;;  %v375_v63 = vpop.f32.mrf.mxu1  ;;  %8040 = vst [vmem:[#allocation22_spill] sm:$0xff] %v5548_v1  ;;  %v5554_v6 = vsel %vm127_vm2, %v5523_v33, %v5518_v28  ;;  %v5594_v36 = vadd.f32 %v367_v27, %v5508_v15 }
 0x100   :  { %8037 = vst [vmem:[#allocation19_spill] sm:$0xff] %v5534_v43  ;;  %8038 = vst [vmem:[#allocation20_spill] sm:$0xff] %v5537_v49  ;;  %v316_v17 = vadd.f32 %v315_v60, %v5501_v13  ;;  %v5562_v19 = vadd.f32 %v375_v63, %v5501_v13 }
 0x101   :  { %8041 = vst [vmem:[#allocation23_spill] sm:$0xff] %v5554_v6  ;;  %v317_v21 = vpop.f32.mrf.mxu0  ;;  %v377_v23 = vpop.f32.mrf.mxu1  ;;  %8046 = vst [vmem:[#allocation28_spill] sm:$0xff] %v5594_v36 }
 0x102   :  { %v5584_v30 = vadd.f32 %v317_v21, %v5508_v15  ;;  %v5587_v26 = vadd.f32 %v377_v23, %v5508_v15  ;;  %v5591_v32 = vsel %vm127_vm2, %v316_v17, %v366_v0  ;;  %v5598_v63 = vsel %vm127_vm2, %v366_v0, %v316_v17 }
 0x103   :  { %8045 = vst [vmem:[#allocation27_spill] sm:$0xff] %v5591_v32  ;;  %v321_v39 = vpop.f32.mrf.mxu0  ;;  %v414_v60 = vpop.f32.mrf.mxu1  ;;  %8047 = vst [vmem:[#allocation29_spill] sm:$0xff] %v5598_v63  ;;  %v5604_v11 = vsel %vm127_vm2, %v5562_v19, %v5544_v56 }
 0x104   :  { %8043 = vst [vmem:[#allocation25_spill] sm:$0xff] %v5584_v30  ;;  %8044 = vst [vmem:[#allocation26_spill] sm:$0xff] %v5587_v26  ;;  %v5607_v21 = vadd.f32 %v321_v39, %v5501_v13  ;;  %v5610_v23 = vadd.f32 %v414_v60, %v5558_v16 }
 0x105   :  { %8048 = vst [vmem:[#allocation30_spill] sm:$0xff] %v5604_v11  ;;  %v323_v27 = vpop.f32.mrf.mxu0  ;;  %v416_v42 = vpop.f32.mrf.mxu1 }
 0x106   :  { %8049 = vst [vmem:[#allocation31_spill] sm:$0xff] %v5610_v23  ;;  %v5621_v12 = vadd.f32 %v323_v27, %v5508_v15  ;;  %v5624_v39 = vadd.f32 %v416_v42, %v5581_v29 }
 0x107   :  { %v325_v60 = vpop.f32.mrf.mxu0  ;;  %v5626_v31 = vpop.f32.mrf.mxu1 }
 0x108   :  { %8050 = vst [vmem:[#allocation32_spill] sm:$0xff] %v5621_v12  ;;  %8051 = vst [vmem:[#allocation33_spill] sm:$0xff] %v5624_v39  ;;  %v5629_v10 = vadd.f32 %v325_v60, %v5501_v13 }
 0x109   :  { %v327_v25 = vpop.f32.mrf.mxu0  ;;  %v5631_v24 = vpop.f32.mrf.mxu1 }
 0x10b   :  { %v331_v0 = vpop.f32.mrf.mxu0  ;;  %v424_v18 = vpop.f32.mrf.mxu1 }
 0x10c   :  { %v332_v3 = vadd.f32 %v331_v0, %v5501_v13  ;;  %v5635_v17 = vadd.f32 %v424_v18, %v5558_v16 }
 0x10d   :  { %v333_v27 = vpop.f32.mrf.mxu0  ;;  %v426_v4 = vpop.f32.mrf.mxu1 }
 0x10e   :  { %8052 = vst [vmem:[#allocation34_spill] sm:$0xff] %v5635_v17  ;;  %v5638_v42 = vadd.f32 %v333_v27, %v5508_v15  ;;  %v5641_v11 = vadd.f32 %v426_v4, %v5581_v29 }
 0x10f   :  { %v335_v60 = vpop.f32.mrf.mxu0  ;;  %v428_v6 = vpop.f32.mrf.mxu1 }
 0x110   :  { %8053 = vst [vmem:[#allocation35_spill] sm:$0xff] %v5638_v42  ;;  %8054 = vst [vmem:[#allocation36_spill] sm:$0xff] %v5641_v11  ;;  %v336_v63 = vadd.f32 %v335_v60, %v5501_v13  ;;  %v5645_v1 = vadd.f32 %v428_v6, %v5558_v16 }
 0x111   :  { %v337_v30 = vpop.f32.mrf.mxu0  ;;  %v5647_v0 = vpop.f32.mrf.mxu1 }
 0x112   :  { %8055 = vst [vmem:[#allocation37_spill] sm:$0xff] %v5645_v1  ;;  %v5650_v18 = vadd.f32 %v337_v30, %v5508_v15 }
 0x113   :  { %v341_v36 = vpop.f32.mrf.mxu0  ;;  %v434_v32 = vpop.f32.mrf.mxu1 }
 0x114   :  { %8056 = vst [vmem:[#allocation38_spill] sm:$0xff] %v5650_v18  ;;  %v342_v27 = vadd.f32 %v341_v36, %v5501_v13  ;;  %v5654_v4 = vadd.f32 %v434_v32, %v5558_v16 }
 0x115   :  { %v343_v22 = vpop.f32.mrf.mxu0  ;;  %v436_v43 = vpop.f32.mrf.mxu1 }
 0x116   :  { %8057 = vst [vmem:[#allocation39_spill] sm:$0xff] %v5654_v4  ;;  %v5657_v60 = vadd.f32 %v343_v22, %v5508_v15  ;;  %v5660_v6 = vadd.f32 %v436_v43, %v5581_v29  ;;  %v5664_v55 = vsel %vm127_vm2, %v332_v3, %v342_v27  ;;  %v5668_v30 = vsel %vm127_vm2, %v342_v27, %v332_v3 }
 0x117   :  { %8060 = vst [vmem:[#allocation42_spill] sm:$0xff] %v5664_v55  ;;  %8061 = vst [vmem:[#allocation43_spill] sm:$0xff] %v5668_v30  ;;  %v345_v36 = vpop.f32.mrf.mxu0  ;;  %v438_v9 = vpop.f32.mrf.mxu1  ;;  %v77_v22 = vadd.s32 256, %v5504_v14 }
 0x118   :  { %8058 = vst [vmem:[#allocation40_spill] sm:$0xff] %v5657_v60  ;;  %8059 = vst [vmem:[#allocation41_spill] sm:$0xff] %v5660_v6  ;;  %v346_v32 = vadd.f32 %v345_v36, %v5501_v13  ;;  %v5672_v58 = vadd.f32 %v438_v9, %v5558_v16 }
 0x119   :  { %v347_v55 = vpop.f32.mrf.mxu0  ;;  %v5682_v3 = vpop.f32.mrf.mxu1 }
 0x11a   :  { %8062 = vst [vmem:[#allocation44_spill] sm:$0xff] %v5672_v58  ;;  %v5685_v27 = vadd.f32 %v347_v55, %v5508_v15  ;;  %v5689_v9 = vsel %vm127_vm2, %v336_v63, %v346_v32  ;;  %v5693_v36 = vsel %vm127_vm2, %v346_v32, %v336_v63  ;;  %v78_v32 = vadd.s32 384, %v5504_v14 }
 0x11b   :  { %8064 = vst [vmem:[#allocation46_spill] sm:$0xff] %v5689_v9  ;;  %8065 = vst [vmem:[#allocation47_spill] sm:$0xff] %v5693_v36  ;;  %v351_v30 = vpop.f32.mrf.mxu0  ;;  %v444_v8 = vpop.f32.mrf.mxu1  ;;  %v97_v63 = vand.u32 127, %v77_v22  ;;  %v5944_v14 = vadd.f32 %v5626_v31, %v5558_v16 }
 0x11c   :  { %8063 = vst [vmem:[#allocation45_spill] sm:$0xff] %v5685_v27  ;;  %v352_v43 = vadd.f32 %v351_v30, %v5501_v13  ;;  %v5698_v60 = vadd.f32 %v444_v8, %v5558_v16 }
 0x11d   :  { %v353_v36 = vpop.f32.mrf.mxu0  ;;  %v446_v9 = vpop.f32.mrf.mxu1  ;;  %vm5753_vm4 = vcmp.lt.s32.totalorder %v97_v63, 64  ;;  %8097 = vst [vmem:[#allocation75_spill] sm:$0xff] %v5944_v14 }
 0x11e   :  { %v5710_v42 = vadd.f32 %v353_v36, %v5508_v15  ;;  %v5713_v8 = vadd.f32 %v446_v9, %v5581_v29  ;;  %v5718_v30 = vsel %vm127_vm2, %v5607_v21, %v352_v43  ;;  %v5723_v55 = vsel %vm127_vm2, %v352_v43, %v5607_v21 }
 0x11f   :  { %8068 = vst [vmem:[#allocation50_spill] sm:$0xff] %v5718_v30  ;;  %8069 = vst [vmem:[#allocation51_spill] sm:$0xff] %v5723_v55  ;;  %v355_v27 = vpop.f32.mrf.mxu0  ;;  %v448_v18 = vpop.f32.mrf.mxu1  ;;  %v104_v21 = vand.u32 127, %v78_v32  ;;  %v5738_v55 = vadd.f32 %v327_v25, %v5508_v15 }
 0x120   :  { %8066 = vst [vmem:[#allocation48_spill] sm:$0xff] %v5710_v42  ;;  %8067 = vst [vmem:[#allocation49_spill] sm:$0xff] %v5713_v8  ;;  %v356_v54 = vadd.f32 %v355_v27, %v5501_v13  ;;  %v5727_v36 = vadd.f32 %v448_v18, %v5558_v16 }
 0x121   :  { %v357_v43 = vpop.f32.mrf.mxu0  ;;  %v450_v22 = vpop.f32.mrf.mxu1  ;;  %8071 = vst [vmem:[#allocation53_spill] sm:$0xff] %v5738_v55  ;;  %vm5768_vm5 = vcmp.lt.s32.totalorder %v104_v21, 64  ;;  %v493_v21 = vsel %vm127_vm2, %v5518_v28, %v5523_v33  ;;  %v494_v28 = vsel %vm5525_vm3, %v5530_v35, %v5537_v49 }
 0x122   :  { %8070 = vst [vmem:[#allocation52_spill] sm:$0xff] %v5727_v36  ;;  %v5741_v13 = vadd.f32 %v357_v43, %v5508_v15  ;;  %v5746_v18 = vsel %vm127_vm2, %v5629_v10, %v356_v54  ;;  %v5751_v27 = vsel %vm127_vm2, %v356_v54, %v5629_v10  ;;  %v8078_v43 = vmov 0 }
 0x123   :  { %8073 = vst [vmem:[#allocation55_spill] sm:$0xff] %v5746_v18  ;;  %8074 = vst [vmem:[#allocation56_spill] sm:$0xff] %v5751_v27  ;;  %v454_v30 = vpop.f32.mrf.mxu1  ;;  %v823_v25 = vpop.f32.mrf.mxu0  ;;  %v8079_v43 = vsel %vm5768_vm5, 4294967295, %v8078_v43 }
 0x124   :  { %8072 = vst [vmem:[#allocation54_spill] sm:$0xff] %v5741_v13  ;;  %v5758_v9 = vadd.f32 %v454_v30, %v5558_v16  ;;  %8080 = vst [vmem:[#allocation58_spill] sm:$0xff] %v8079_v43  ;;  %v875_v55 = vadd.f32 %v823_v25, %v493_v21 }
 0x125   :  { %v456_v10 = vpop.f32.mrf.mxu1  ;;  %v825_v63 = vpop.f32.mrf.mxu0 }
 0x126   :  { %8077 = vst [vmem:[#allocation57_spill] sm:$0xff] %v5758_v9  ;;  %v5773_v27 = vadd.f32 %v456_v10, %v5581_v29  ;;  %v5799_v9 = vadd.f32 %v450_v22, %v5581_v29  ;;  %v876_v25 = vadd.f32 %v825_v63, %v494_v28  ;;  %v4182_v63 = vmul.f32 -1.442695, %v875_v55 }
 0x127   :  { %v458_v15 = vpop.f32.mrf.mxu1  ;;  %v827_v10 = vpop.f32.mrf.mxu0  ;;  %v497_v28 = vsel %vm127_vm2, %v5544_v56, %v5562_v19  ;;  %v498_v22 = vsel %vm5525_vm3, %v5569_v20, %v5587_v26 }
 0x128   :  { %8081 = vst [vmem:[#allocation59_spill] sm:$0xff] %v5773_v27  ;;  %v5788_v13 = vadd.f32 %v458_v15, %v5558_v16  ;;  %8083 = vst [vmem:[#allocation61_spill] sm:$0xff] %v5799_v9  ;;  %v879_v35 = vadd.f32 %v827_v10, %v497_v28  ;;  %v4183_v55 = vmul.f32 -1.442695, %v876_v25  ;;  %v5859_v28 = vadd.f32 %v5682_v3, %v5581_v29 }
 0x129   :  { %v460_v18 = vpop.f32.mrf.mxu1  ;;  %v829_v54 = vpop.f32.mrf.mxu0  ;;  %4544 = vpow2.f32 %v4182_v63  ;;  %v5907_v10 = vadd.f32 %v5647_v0, %v5581_v29 }
 0x12a   :  { %8082 = vst [vmem:[#allocation60_spill] sm:$0xff] %v5788_v13  ;;  %v5806_v33 = vadd.f32 %v460_v18, %v5581_v29  ;;  %v880_v20 = vadd.f32 %v829_v54, %v498_v22  ;;  %8088 = vst [vmem:[#allocation66_spill] sm:$0xff] %v5859_v28  ;;  %v4185_v25 = vmul.f32 -1.442695, %v879_v35  ;;  %4546 = vpow2.f32 %v4183_v55 }
 0x12b   :  { %v464_v15 = vpop.f32.mrf.mxu1  ;;  %8093 = vst [vmem:[#allocation71_spill] sm:$0xff] %v5907_v10 }
 0x12c   :  { %8084 = vst [vmem:[#allocation62_spill] sm:$0xff] %v5806_v33  ;;  %v5817_v30 = vadd.f32 %v464_v15, %v5558_v16  ;;  %v4186_v19 = vmul.f32 -1.442695, %v880_v20  ;;  %4548 = vpow2.f32 %v4185_v25 }
 0x12d   :  { %v466_v21 = vpop.f32.mrf.mxu1 }
 0x12e   :  { %8085 = vst [vmem:[#allocation63_spill] sm:$0xff] %v5817_v30  ;;  %v5836_v18 = vadd.f32 %v466_v21, %v5581_v29  ;;  %4550 = vpow2.f32 %v4186_v19 }
 0x12f   :  { %v468_v26 = vpop.f32.mrf.mxu1 }
 0x130   :  { %8086 = vst [vmem:[#allocation64_spill] sm:$0xff] %v5836_v18  ;;  %v5847_v49 = vadd.f32 %v468_v26, %v5558_v16 }
 0x131   :  { %v470_v54 = vpop.f32.mrf.mxu1 }
 0x132   :  { %8087 = vst [vmem:[#allocation65_spill] sm:$0xff] %v5847_v49  ;;  %v5862_v26 = vadd.f32 %v470_v54, %v5581_v29 }
 0x133   :  { %v474_v3 = vpop.f32.mrf.mxu1 }
 0x134   :  { %8089 = vst [vmem:[#allocation67_spill] sm:$0xff] %v5862_v26  ;;  %v5873_v63 = vadd.f32 %v474_v3, %v5558_v16 }
 0x135   :  { %v476_v15 = vpop.f32.mrf.mxu1 }
 0x136   :  { %8090 = vst [vmem:[#allocation68_spill] sm:$0xff] %v5873_v63  ;;  %v5884_v21 = vadd.f32 %v476_v15, %v5581_v29  ;;  %v4545_v15 = vpop.eup %4544 }
 0x137   :  { %v478_v3 = vpop.f32.mrf.mxu1  ;;  %v4547_v20 = vpop.eup %4546  ;;  %v901_v31 = vadd.f32 1.0, %v4545_v15 }
 0x138   :  { %8091 = vst [vmem:[#allocation69_spill] sm:$0xff] %v5884_v21  ;;  %v5895_v35 = vadd.f32 %v478_v3, %v5558_v16  ;;  %v902_v9 = vadd.f32 1.0, %v4547_v20 }
 0x139   :  { %v480_v25 = vpop.f32.mrf.mxu1  ;;  %4552 = vrcp.f32 %v901_v31 }
 0x13a   :  { %8092 = vst [vmem:[#allocation70_spill] sm:$0xff] %v5895_v35  ;;  %v5910_v19 = vadd.f32 %v480_v25, %v5581_v29  ;;  %4554 = vrcp.f32 %v902_v9 }
 0x13b   :  { %v484_v55 = vpop.f32.mrf.mxu1 }
 0x13c   :  { %8094 = vst [vmem:[#allocation72_spill] sm:$0xff] %v5910_v19  ;;  %v5921_v54 = vadd.f32 %v484_v55, %v5558_v16 }
 0x13d   :  { %v486_v25 = vpop.f32.mrf.mxu1 }
 0x13e   :  { %8095 = vst [vmem:[#allocation73_spill] sm:$0xff] %v5921_v54  ;;  %v5932_v3 = vadd.f32 %v486_v25, %v5581_v29  ;;  %v495_v55 = vsel %vm5753_vm4, %v5610_v23, %v5921_v54  ;;  %v5959_v23 = vadd.f32 %v5631_v24, %v5581_v29 }
 0x13f   :  { %v488_v0 = vpop.f32.mrf.mxu1 }
 0x140   :  { %8096 = vst [vmem:[#allocation74_spill] sm:$0xff] %v5932_v3  ;;  %v5947_v56 = vadd.f32 %v488_v0, %v5558_v16  ;;  %v496_v25 = vsel %vm5768_vm5, %v5624_v39, %v5932_v3  ;;  %8099 = vst [vmem:[#allocation77_spill] sm:$0xff] %v5959_v23  ;;  %v4549_v0 = vpop.eup %4548 }
 0x141   :  { %v490_v22 = vpop.f32.mrf.mxu1  ;;  %v4551_v8 = vpop.eup %4550  ;;  %v904_v15 = vadd.f32 1.0, %v4549_v0 }
 0x142   :  { %8098 = vst [vmem:[#allocation76_spill] sm:$0xff] %v5947_v56  ;;  %v5962_v54 = vadd.f32 %v490_v22, %v5581_v29  ;;  %v905_v39 = vadd.f32 1.0, %v4551_v8  ;;  %v499_v20 = vsel %vm5753_vm4, %v5944_v14, %v5947_v56  ;;  %v6153_v56 = vld [vmem:[#allocation4] ss:$16 sps:$4 sm:$0xff]  }
 0x143   :  { %v866_v27 = vpop.f32.mrf.mxu1 }
 0x144   :  { %8100 = vst [vmem:[#allocation78_spill] sm:$0xff] %v5962_v54  ;;  %v877_v13 = vadd.f32 %v866_v27, %v495_v55  ;;  %v500_v55 = vsel %vm5768_vm5, %v5959_v23, %v5962_v54 }
 0x145   :  { %v868_v33 = vpop.f32.mrf.mxu1 }
 0x146   :  { %v4184_v29 = vmul.f32 -1.442695, %v877_v13  ;;  %v878_v22 = vadd.f32 %v868_v33, %v496_v25  ;;  %v4553_v8 = vpop.eup %4552 }
 0x147   :  { %v870_v16 = vpop.f32.mrf.mxu1  ;;  %v4555_v9 = vpop.eup %4554 }
 0x148   :  { %4556 = vpow2.f32 %v4184_v29  ;;  %v881_v27 = vadd.f32 %v870_v16, %v499_v20  ;;  %v921_v29 = vmul.f32 0.0, %v4555_v9 }
 0x149   :  { %4558 = vtanh.f32 %v878_v22  ;;  %v872_v31 = vpop.f32.mrf.mxu1 }
 0x14a   :  { %4560 = vrcp.f32 %v904_v15  ;;  %v4187_v13 = vmul.f32 -1.442695, %v881_v27  ;;  %v882_v33 = vadd.f32 %v872_v31, %v500_v55 }
 0x14b   :  { %4562 = vrcp.f32 %v905_v39 }
 0x14c   :  { %4564 = vpow2.f32 %v4187_v13 }
 0x14d   :  { %4566 = vtanh.f32 %v882_v33 }
 0x155   :  { %v4557_v25 = vpop.eup %4556 }
 0x156   :  { %v4559_v0 = vpop.eup %4558  ;;  %v903_v20 = vadd.f32 1.0, %v4557_v25  ;;  %v6002_v25 = vld [vmem:[#allocation4 + $0xc0] ss:$16 sps:$4 sm:$0xff]  }
 0x157   :  { %v4561_v24 = vpop.eup %4560  ;;  %v923_v16 = vmul.f32 %v4559_v0, %v4553_v8  ;;  %v6006_v0 = vld [vmem:[#allocation4 + $0xa4] ss:$16 sps:$4 sm:$0xff]  }
 0x158   :  { %v4563_v22 = vpop.eup %4562  ;;  %4568 = vrcp.f32 %v903_v20  ;;  %v8112_v20 = vld [vmem:[#allocation27_spill] sm:$0xff] }
 0x159   :  { %v4565_v3 = vpop.eup %4564  ;;  %v5980_v14 = vadd.f32 %v923_v16, %v921_v29  ;;  %v922_v15 = vmul.f32 0.0, %v4563_v22 }
 0x15a   :  { %v4567_v23 = vpop.eup %4566  ;;  %v906_v54 = vadd.f32 1.0, %v4565_v3 }
 0x15b   :  { %v924_v27 = vmul.f32 %v4567_v23, %v4561_v24  ;;  %4570 = vtanh.f32 %v5980_v14  ;;  %v5992_v23 = vld [vmem:[#allocation4 + $0xe0] ss:$16 sps:$4 sm:$0xff]   ;;  %v8103_v24 = vmov 0  }
 0x15c   :  { %4572 = vrcp.f32 %v906_v54  ;;  %v5996_v54 = vld [vmem:[#allocation4 + $0xc4] ss:$16 sps:$4 sm:$0xff]  }
 0x15d   :  { %v5983_v39 = vadd.f32 %v924_v27, %v922_v15  ;;  %v8113_v27 = vld [vmem:[#allocation28_spill] sm:$0xff] }
 0x15f   :  { %4574 = vtanh.f32 %v5983_v39 }
 0x165   :  { %v4569_v55 = vpop.eup %4568 }
 0x168   :  { %v4571_v31 = vpop.eup %4570 }
 0x169   :  { %v4573_v13 = vpop.eup %4572  ;;  %v5986_v8 = vmul.f32 %v4571_v31, %v4569_v55  ;;  %v8114_v55 = vld [vmem:[#allocation25_spill] sm:$0xff] }
 0x16a   :  { %v514_v31 = vsel %vm5525_vm3, %v8114_v55, %v8113_v27 }
 0x16b   :  { %8101 = vst [vmem:[#allocation79_spill] sm:$0xff] %v5986_v8 }
 0x16c   :  { %v4575_v33 = vpop.eup %4574 }
 0x16d   :  { %v5988_v9 = vmul.f32 %v4575_v33, %v4573_v13 }
 0x16f   :  { %8102 = vst [vmem:[#allocation80_spill] sm:$0xff] %v5988_v9  ;;  %v939_v3 = vpack.c.bf16 %v5988_v9, %v5986_v8  ;;  %v6145_v9 = vld [vmem:[#allocation4 + $0x20] ss:$16 sps:$4 sm:$0xff]   ;;  %v6149_v8 = vld [vmem:[#allocation4 + $0x4] ss:$16 sps:$4 sm:$0xff]  }
 0x171   :  { %973 = vmatmul.mubr.bf16.vlgmr.msra.gmra.mxu0 %v939_v3  ;;  %1016 = vmatmul.mubr.bf16.vlgmr.msra.gmra.mxu1 %v939_v3 }
 0x172   :  { %1092 = vmatpush1.bf16.msra.mxu0 %v5992_v23  ;;  %1135 = vmatpush1.bf16.msra.mxu1 %v5344_v40  ;;  %v6010_v40 = vld [vmem:[#allocation4 + $0xa0] ss:$16 sps:$4 sm:$0xff]  }
 0x173   :  { %1093 = vmatprep.subr.bf16.mxu0 %v5996_v54  ;;  %1136 = vmatprep.subr.bf16.mxu1 %v5346_v41  ;;  %v6014_v41 = vld [vmem:[#allocation4 + $0x84] ss:$16 sps:$4 sm:$0xff]  }
 0x174   :  { %1123 = vmatprep.mubr.bf16.mxu0 %v8103_v24  ;;  %1166 = vmatprep.mubr.bf16.mxu1 %v8103_v24 }
 0x176   :  { %1094 = vmatpush1.bf16.msra.mxu0 %v6002_v25  ;;  %1137 = vmatpush1.bf16.msra.mxu1 %v5355_v44  ;;  %v8106_v44 = vld [vmem:[#allocation13_spill] sm:$0xff] }
 0x177   :  { %1095 = vmatprep.subr.bf16.mxu0 %v6006_v0  ;;  %1138 = vmatprep.subr.bf16.mxu1 %v5362_v46  ;;  %v6036_v46 = vld [vmem:[#allocation4 + $0xe4] ss:$16 sps:$4 sm:$0xff]  }
 0x17a   :  { %1096 = vmatpush1.bf16.msra.mxu0 %v6010_v40  ;;  %1139 = vmatpush1.bf16.msra.mxu1 %v5373_v50  ;;  %v8108_v50 = vld [vmem:[#allocation21_spill] sm:$0xff] }
 0x17b   :  { %1097 = vmatprep.subr.bf16.mxu0 %v6014_v41  ;;  %1140 = vmatprep.subr.bf16.mxu1 %v5379_v52 }
 0x17e   :  { %1098 = vmatpush1.bf16.msra.mxu0 %v5339_v37  ;;  %1141 = vmatpush1.bf16.msra.mxu1 %v5395_v57  ;;  %v8104_v37 = vld [vmem:[#allocation12_spill] sm:$0xff] }
 0x17f   :  { %1099 = vmatprep.subr.bf16.mxu0 %v5342_v38  ;;  %1142 = vmatprep.subr.bf16.mxu1 %v5401_v59  ;;  %v8105_v38 = vld [vmem:[#allocation14_spill] sm:$0xff]  ;;  %v8109_v59 = vld [vmem:[#allocation19_spill] sm:$0xff] }
 0x182   :  { %1100 = vmatpush1.bf16.msra.mxu0 %v5358_v45  ;;  %1143 = vmatpush1.bf16.msra.mxu1 %v5408_v61  ;;  %v8107_v45 = vld [vmem:[#allocation15_spill] sm:$0xff]  ;;  %v8110_v61 = vld [vmem:[#allocation17_spill] sm:$0xff] }
 0x183   :  { %1101 = vmatprep.subr.bf16.mxu0 %v5364_v47  ;;  %1144 = vmatprep.subr.bf16.mxu1 %v5410_v62  ;;  %v6039_v47 = vld [vmem:[#allocation4 + $0xec] ss:$16 sps:$4 sm:$0xff]   ;;  %v8111_v62 = vsel %vm5525_vm3, %v8109_v59, %v8110_v61 }
 0x186   :  { %1102 = vmatpush1.bf16.msra.mxu0 %v5368_v48  ;;  %1145 = vmatpush1.bf16.msra.mxu1 %v5423_v2 }
 0x187   :  { %1103 = vmatprep.subr.bf16.mxu0 %v5376_v51  ;;  %1146 = vmatprep.subr.bf16.mxu1 %v5427_v5 }
 0x18a   :  { %1104 = vmatpush1.bf16.msra.mxu0 %v5381_v53  ;;  %1147 = vmatpush1.bf16.msra.mxu1 %v5432_v7 }
 0x18b   :  { %1105 = vmatprep.subr.bf16.mxu0 %v8104_v37  ;;  %1148 = vmatprep.subr.bf16.mxu1 %v8105_v38 }
 0x18e   :  { %1106 = vmatpush1.bf16.msra.mxu0 %v8106_v44  ;;  %1149 = vmatpush1.bf16.msra.mxu1 %v8107_v45 }
 0x18f   :  { %1242 = vmatprep.subr.bf16.mxu0 %v6036_v46  ;;  %1285 = vmatprep.subr.bf16.mxu1 %v6039_v47 }
 0x231   :  { %v974_v48 = vpop.f32.mrf.mxu0  ;;  %v1017_v57 = vpop.f32.mrf.mxu1 }
 0x232   :  { %v1026_v51 = vadd.f32 %v974_v48, %v8108_v50  ;;  %v8115_v48 = vsel %vm5753_vm4, %v5635_v17, %v5873_v63 }
 0x233   :  { %v976_v52 = vpop.f32.mrf.mxu0  ;;  %v1019_v33 = vpop.f32.mrf.mxu1  ;;  %v1028_v50 = vadd.f32 %v1017_v57, %v8115_v48 }
 0x234   :  { %v4188_v53 = vmul.f32 -1.442695, %v1026_v51  ;;  %v1027_v29 = vadd.f32 %v976_v52, %v8111_v62  ;;  %v8116_v52 = vsel %vm5753_vm4, %v5645_v1, %v5895_v35 }
 0x235   :  { %v978_v16 = vpop.f32.mrf.mxu0  ;;  %v1021_v51 = vpop.f32.mrf.mxu1  ;;  %v4190_v62 = vmul.f32 -1.442695, %v1028_v50 }
 0x236   :  { %4576 = vpow2.f32 %v4188_v53  ;;  %v4189_v22 = vmul.f32 -1.442695, %v1027_v29  ;;  %v1030_v15 = vadd.f32 %v978_v16, %v8112_v20  ;;  %v1032_v53 = vadd.f32 %v1021_v51, %v8116_v52 }
 0x237   :  { %v980_v13 = vpop.f32.mrf.mxu0  ;;  %v8117_v29 = vsel %vm5768_vm5, %v5641_v11, %v5884_v21 }
 0x238   :  { %4578 = vpow2.f32 %v4189_v22  ;;  %v4191_v3 = vmul.f32 -1.442695, %v1030_v15  ;;  %v1031_v37 = vadd.f32 %v980_v13, %v514_v31  ;;  %v1029_v16 = vadd.f32 %v1019_v33, %v8117_v29  ;;  %v1023_v22 = vpop.f32.mrf.mxu1 }
 0x239   :  { %v4193_v15 = vmul.f32 -1.442695, %v1032_v53  ;;  %v8118_v13 = vsel %vm5768_vm5, %v5907_v10, %v5910_v19 }
 0x23a   :  { %4580 = vpow2.f32 %v4191_v3  ;;  %v4192_v44 = vmul.f32 -1.442695, %v1031_v37  ;;  %v1033_v3 = vadd.f32 %v1023_v22, %v8118_v13 }
 0x23c   :  { %4582 = vpow2.f32 %v4192_v44 }
 0x23d   :  { %4584 = vpow2.f32 %v4190_v62 }
 0x23e   :  { %4586 = vtanh.f32 %v1029_v16 }
 0x243   :  { %v4577_v20 = vpop.eup %4576 }
 0x244   :  { %v1052_v31 = vadd.f32 1.0, %v4577_v20 }
 0x245   :  { %v4579_v57 = vpop.eup %4578 }
 0x246   :  { %4588 = vrcp.f32 %v1052_v31  ;;  %v1053_v37 = vadd.f32 1.0, %v4579_v57 }
 0x247   :  { %v4581_v44 = vpop.eup %4580  ;;  %4590 = vpow2.f32 %v4193_v15 }
 0x248   :  { %4592 = vrcp.f32 %v1053_v37  ;;  %v1055_v48 = vadd.f32 1.0, %v4581_v44 }
 0x249   :  { %v4583_v33 = vpop.eup %4582  ;;  %4594 = vtanh.f32 %v1033_v3 }
 0x24a   :  { %4596 = vrcp.f32 %v1055_v48  ;;  %v1056_v50 = vadd.f32 1.0, %v4583_v33  ;;  %v4585_v51 = vpop.eup %4584 }
 0x24b   :  { %v4587_v52 = vpop.eup %4586  ;;  %v1054_v57 = vadd.f32 1.0, %v4585_v51 }
 0x24c   :  { %4598 = vrcp.f32 %v1056_v50 }
 0x24d   :  { %4600 = vrcp.f32 %v1054_v57  ;;  %v6113_v57 = vld [vmem:[#allocation4 + $0x80] ss:$16 sps:$4 sm:$0xff]  }
 0x253   :  { %v4589_v53 = vpop.eup %4588 }
 0x254   :  { %v4591_v62 = vpop.eup %4590  ;;  %v1074_v29 = vmul.f32 %v4589_v53, %v4587_v52 }
 0x255   :  { %v4593_v16 = vpop.eup %4592  ;;  %v1057_v44 = vadd.f32 1.0, %v4591_v62 }
 0x256   :  { %v4595_v20 = vpop.eup %4594  ;;  %v1072_v22 = vmul.f32 %v4593_v16, %v5980_v14  ;;  %v6098_v16 = vld [vmem:[#allocation4 + $0xc8] ss:$16 sps:$4 sm:$0xff]  }
 0x257   :  { %v4597_v31 = vpop.eup %4596 }
 0x258   :  { %v6074_v13 = vadd.f32 %v1074_v29, %v1072_v22  ;;  %v1075_v15 = vmul.f32 %v4597_v31, %v4595_v20  ;;  %v6092_v29 = vld [vmem:[#allocation4 + $0xcc] ss:$16 sps:$4 sm:$0xff]   ;;  %v6106_v22 = vld [vmem:[#allocation4 + $0xa8] ss:$16 sps:$4 sm:$0xff]  }
 0x259   :  { %v4599_v37 = vpop.eup %4598  ;;  %v6102_v20 = vld [vmem:[#allocation4 + $0xac] ss:$16 sps:$4 sm:$0xff]  }
 0x25a   :  { %v1073_v3 = vmul.f32 %v4599_v37, %v5983_v39  ;;  %4602 = vtanh.f32 %v6074_v13  ;;  %v4601_v33 = vpop.eup %4600  ;;  %v6088_v39 = vld [vmem:[#allocation4 + $0xe8] ss:$16 sps:$4 sm:$0xff]   ;;  %v6110_v31 = vld [vmem:[#allocation4 + $0x8c] ss:$16 sps:$4 sm:$0xff]   ;;  %v6119_v37 = vld [vmem:[#allocation4 + $0x64] ss:$16 sps:$4 sm:$0xff]  }
 0x25b   :  { %4604 = vrcp.f32 %v1057_v44  ;;  %v6122_v44 = vld [vmem:[#allocation4 + $0x6c] ss:$16 sps:$4 sm:$0xff]  }
 0x25c   :  { %v6078_v48 = vadd.f32 %v1075_v15, %v1073_v3  ;;  %v6116_v15 = vld [vmem:[#allocation4 + $0x88] ss:$16 sps:$4 sm:$0xff]   ;;  %v6125_v3 = vld [vmem:[#allocation4 + $0x60] ss:$16 sps:$4 sm:$0xff]  }
 0x25e   :  { %4606 = vtanh.f32 %v6078_v48 }
 0x267   :  { %v4603_v50 = vpop.eup %4602 }
 0x268   :  { %v4605_v14 = vpop.eup %4604  ;;  %v6081_v51 = vmul.f32 %v4603_v50, %v4601_v33  ;;  %v6128_v33 = vld [vmem:[#allocation4 + $0x68] ss:$16 sps:$4 sm:$0xff]   ;;  %v6131_v50 = vld [vmem:[#allocation4 + $0x44] ss:$16 sps:$4 sm:$0xff]  }
 0x26a   :  { %8119 = vst [vmem:[#allocation12_spill] sm:$0xff] %v6081_v51 }
 0x26b   :  { %v4607_v52 = vpop.eup %4606 }
 0x26c   :  { %v6083_v53 = vmul.f32 %v4607_v52, %v4605_v14  ;;  %v6134_v14 = vld [vmem:[#allocation4 + $0x4c] ss:$16 sps:$4 sm:$0xff]   ;;  %v6137_v52 = vld [vmem:[#allocation4 + $0x40] ss:$16 sps:$4 sm:$0xff]  }
 0x26e   :  { %8120 = vst [vmem:[#allocation14_spill] sm:$0xff] %v6083_v53  ;;  %v1090_v62 = vpack.c.bf16 %v6083_v53, %v6081_v51 }
 0x270   :  { %1124 = vmatmul.mubr.bf16.vlgmr.msra.gmra.mxu0 %v1090_v62  ;;  %1167 = vmatmul.mubr.bf16.vlgmr.msra.gmra.mxu1 %v1090_v62  ;;  %v6141_v62 = vld [vmem:[#allocation4 + $0x24] ss:$16 sps:$4 sm:$0xff]  }
 0x271   :  { %1243 = vmatpush1.bf16.msra.mxu0 %v5992_v23  ;;  %1286 = vmatpush1.bf16.msra.mxu1 %v6088_v39 }
 0x272   :  { %1244 = vmatprep.subr.bf16.mxu0 %v5996_v54  ;;  %1287 = vmatprep.subr.bf16.mxu1 %v6092_v29 }
 0x273   :  { %1274 = vmatprep.mubr.bf16.mxu0 %v8103_v24  ;;  %1317 = vmatprep.mubr.bf16.mxu1 %v8103_v24 }
 0x275   :  { %1245 = vmatpush1.bf16.msra.mxu0 %v6002_v25  ;;  %1288 = vmatpush1.bf16.msra.mxu1 %v6098_v16 }
 0x276   :  { %1246 = vmatprep.subr.bf16.mxu0 %v6006_v0  ;;  %1289 = vmatprep.subr.bf16.mxu1 %v6102_v20 }
 0x279   :  { %1247 = vmatpush1.bf16.msra.mxu0 %v6010_v40  ;;  %1290 = vmatpush1.bf16.msra.mxu1 %v6106_v22 }
 0x27a   :  { %1248 = vmatprep.subr.bf16.mxu0 %v6014_v41  ;;  %1291 = vmatprep.subr.bf16.mxu1 %v6110_v31 }
 0x27d   :  { %1249 = vmatpush1.bf16.msra.mxu0 %v6113_v57  ;;  %1292 = vmatpush1.bf16.msra.mxu1 %v6116_v15 }
 0x27e   :  { %1250 = vmatprep.subr.bf16.mxu0 %v6119_v37  ;;  %1293 = vmatprep.subr.bf16.mxu1 %v6122_v44 }
 0x281   :  { %1251 = vmatpush1.bf16.msra.mxu0 %v6125_v3  ;;  %1294 = vmatpush1.bf16.msra.mxu1 %v6128_v33 }
 0x282   :  { %1252 = vmatprep.subr.bf16.mxu0 %v6131_v50  ;;  %1295 = vmatprep.subr.bf16.mxu1 %v6134_v14 }
 0x285   :  { %1253 = vmatpush1.bf16.msra.mxu0 %v6137_v52  ;;  %1296 = vmatpush1.bf16.msra.mxu1 %v5423_v2 }
 0x286   :  { %1254 = vmatprep.subr.bf16.mxu0 %v6141_v62  ;;  %1297 = vmatprep.subr.bf16.mxu1 %v5427_v5  ;;  %v8121_v5 = vld [vmem:[#allocation50_spill] sm:$0xff] }
 0x289   :  { %1255 = vmatpush1.bf16.msra.mxu0 %v6145_v9  ;;  %1298 = vmatpush1.bf16.msra.mxu1 %v5432_v7 }
 0x28a   :  { %1256 = vmatprep.subr.bf16.mxu0 %v6149_v8  ;;  %1299 = vmatprep.subr.bf16.mxu1 %v8105_v38  ;;  %v8122_v38 = vsel %vm5525_vm3, %v5621_v12, %v5710_v42 }
 0x28d   :  { %1257 = vmatpush1.bf16.msra.mxu0 %v6153_v56  ;;  %1300 = vmatpush1.bf16.msra.mxu1 %v8107_v45  ;;  %v8123_v45 = vld [vmem:[#allocation55_spill] sm:$0xff] }
 0x28e   :  { %1393 = vmatprep.subr.bf16.mxu0 %v6036_v46  ;;  %1436 = vmatprep.subr.bf16.mxu1 %v6039_v47 }
 0x330   :  { %v1125_v2 = vpop.f32.mrf.mxu0  ;;  %v1168_v10 = vpop.f32.mrf.mxu1 }
 0x331   :  { %v1177_v53 = vadd.f32 %v1125_v2, %v8121_v5  ;;  %v8124_v2 = vld [vmem:[#allocation53_spill] sm:$0xff] }
 0x332   :  { %v1127_v7 = vpop.f32.mrf.mxu0  ;;  %v1170_v17 = vpop.f32.mrf.mxu1 }
 0x333   :  { %v4194_v51 = vmul.f32 -1.442695, %v1177_v53  ;;  %v1178_v19 = vadd.f32 %v1127_v7, %v8122_v38  ;;  %v8125_v53 = vld [vmem:[#allocation54_spill] sm:$0xff] }
 0x334   :  { %v1129_v11 = vpop.f32.mrf.mxu0  ;;  %v8126_v5 = vsel %vm5525_vm3, %v8124_v2, %v8125_v53  ;;  %v1172_v7 = vpop.f32.mrf.mxu1 }
 0x335   :  { %4608 = vpow2.f32 %v4194_v51  ;;  %v4195_v21 = vmul.f32 -1.442695, %v1178_v19  ;;  %v1181_v1 = vadd.f32 %v1129_v11, %v8123_v45  ;;  %v8127_v51 = vsel %vm5753_vm4, %v5654_v4, %v5817_v30 }
 0x336   :  { %v1131_v35 = vpop.f32.mrf.mxu0  ;;  %v1179_v19 = vadd.f32 %v1168_v10, %v8127_v51 }
 0x337   :  { %4610 = vpow2.f32 %v4195_v21  ;;  %v4197_v63 = vmul.f32 -1.442695, %v1181_v1  ;;  %v1182_v55 = vadd.f32 %v1131_v35, %v8126_v5  ;;  %v8128_v1 = vsel %vm5753_vm4, %v5672_v58, %v5847_v49 }
 0x338   :  { %v1183_v11 = vadd.f32 %v1172_v7, %v8128_v1  ;;  %v4196_v21 = vmul.f32 -1.442695, %v1179_v19 }
 0x339   :  { %4612 = vpow2.f32 %v4197_v63  ;;  %v4198_v27 = vmul.f32 -1.442695, %v1182_v55  ;;  %v8129_v63 = vsel %vm5768_vm5, %v5660_v6, %v5836_v18  ;;  %v1174_v55 = vpop.f32.mrf.mxu1 }
 0x33a   :  { %v1180_v35 = vadd.f32 %v1170_v17, %v8129_v63  ;;  %v4199_v45 = vmul.f32 -1.442695, %v1183_v11 }
 0x33b   :  { %4614 = vpow2.f32 %v4198_v27  ;;  %v8130_v27 = vsel %vm5768_vm5, %v5859_v28, %v5862_v26 }
 0x33c   :  { %4616 = vpow2.f32 %v4196_v21  ;;  %v1184_v51 = vadd.f32 %v1174_v55, %v8130_v27 }
 0x33d   :  { %4618 = vtanh.f32 %v1180_v35 }
 0x342   :  { %v4609_v38 = vpop.eup %4608 }
 0x343   :  { %v1203_v5 = vadd.f32 1.0, %v4609_v38 }
 0x344   :  { %v4611_v10 = vpop.eup %4610 }
 0x345   :  { %4620 = vrcp.f32 %v1203_v5  ;;  %v1204_v19 = vadd.f32 1.0, %v4611_v10 }
 0x346   :  { %v4613_v7 = vpop.eup %4612  ;;  %4622 = vpow2.f32 %v4199_v45 }
 0x347   :  { %4624 = vrcp.f32 %v1204_v19  ;;  %v1206_v1 = vadd.f32 1.0, %v4613_v7 }
 0x348   :  { %v4615_v17 = vpop.eup %4614  ;;  %4626 = vtanh.f32 %v1184_v51 }
 0x349   :  { %4628 = vrcp.f32 %v1206_v1  ;;  %v1207_v11 = vadd.f32 1.0, %v4615_v17  ;;  %v4617_v21 = vpop.eup %4616 }
 0x34a   :  { %v4619_v63 = vpop.eup %4618  ;;  %v1205_v10 = vadd.f32 1.0, %v4617_v21 }
 0x34b   :  { %4630 = vrcp.f32 %v1207_v11 }
 0x34c   :  { %4632 = vrcp.f32 %v1205_v10  ;;  %v8133_v10 = vld [vmem:[#allocation42_spill] sm:$0xff] }
 0x352   :  { %v4621_v35 = vpop.eup %4620 }
 0x353   :  { %v4623_v38 = vpop.eup %4622  ;;  %v1225_v59 = vmul.f32 %v4621_v35, %v4619_v63  ;;  %v6232_v63 = vld [vmem:[#allocation4 + $0x2c] ss:$16 sps:$4 sm:$0xff]   ;;  %v6236_v35 = vld [vmem:[#allocation4 + $0x28] ss:$16 sps:$4 sm:$0xff]  }
 0x354   :  { %v4625_v61 = vpop.eup %4624  ;;  %v1208_v7 = vadd.f32 1.0, %v4623_v38  ;;  %v6240_v38 = vld [vmem:[#allocation4 + $0xc] ss:$16 sps:$4 sm:$0xff]  }
 0x355   :  { %v4627_v6 = vpop.eup %4626  ;;  %v1223_v55 = vmul.f32 %v4625_v61, %v6074_v13 }
 0x356   :  { %v4629_v5 = vpop.eup %4628 }
 0x357   :  { %v6192_v27 = vadd.f32 %v1225_v59, %v1223_v55  ;;  %v1226_v45 = vmul.f32 %v4629_v5, %v4627_v6  ;;  %v6244_v55 = vld [vmem:[#allocation4 + $0x8] ss:$16 sps:$4 sm:$0xff]  }
 0x358   :  { %v4631_v19 = vpop.eup %4630 }
 0x359   :  { %v1224_v51 = vmul.f32 %v4631_v19, %v6078_v48  ;;  %4634 = vtanh.f32 %v6192_v27  ;;  %v4633_v17 = vpop.eup %4632  ;;  %v6228_v48 = vld [vmem:[#allocation4 + $0x48] ss:$16 sps:$4 sm:$0xff]  }
 0x35a   :  { %4636 = vrcp.f32 %v1208_v7 }
 0x35b   :  { %v6196_v1 = vadd.f32 %v1226_v45, %v1224_v51 }
 0x35d   :  { %4638 = vtanh.f32 %v6196_v1 }
 0x366   :  { %v4635_v11 = vpop.eup %4634 }
 0x367   :  { %v4637_v61 = vpop.eup %4636  ;;  %v6199_v21 = vmul.f32 %v4635_v11, %v4633_v17  ;;  %v8134_v17 = vld [vmem:[#allocation35_spill] sm:$0xff]  ;;  %v8135_v11 = vld [vmem:[#allocation40_spill] sm:$0xff] }
 0x369   :  { %8131 = vst [vmem:[#allocation13_spill] sm:$0xff] %v6199_v21 }
 0x36a   :  { %v4639_v13 = vpop.eup %4638 }
 0x36b   :  { %v6201_v59 = vmul.f32 %v4639_v13, %v4637_v61  ;;  %v8136_v61 = vsel %vm5525_vm3, %v8134_v17, %v8135_v11 }
 0x36d   :  { %8132 = vst [vmem:[#allocation15_spill] sm:$0xff] %v6201_v59  ;;  %v1241_v6 = vpack.c.bf16 %v6201_v59, %v6199_v21  ;;  %v8137_v21 = vld [vmem:[#allocation46_spill] sm:$0xff] }
 0x36f   :  { %1275 = vmatmul.mubr.bf16.vlgmr.msra.gmra.mxu0 %v1241_v6  ;;  %1318 = vmatmul.mubr.bf16.vlgmr.msra.gmra.mxu1 %v1241_v6 }
 0x370   :  { %1394 = vmatpush1.bf16.msra.mxu0 %v5992_v23  ;;  %1437 = vmatpush1.bf16.msra.mxu1 %v6088_v39 }
 0x371   :  { %1395 = vmatprep.subr.bf16.mxu0 %v5996_v54  ;;  %1438 = vmatprep.subr.bf16.mxu1 %v6092_v29 }
 0x372   :  { %1425 = vmatprep.mubr.bf16.mxu0 %v8103_v24  ;;  %1468 = vmatprep.mubr.bf16.mxu1 %v8103_v24 }
 0x374   :  { %1396 = vmatpush1.bf16.msra.mxu0 %v6002_v25  ;;  %1439 = vmatpush1.bf16.msra.mxu1 %v6098_v16 }
 0x375   :  { %1397 = vmatprep.subr.bf16.mxu0 %v6006_v0  ;;  %1440 = vmatprep.subr.bf16.mxu1 %v6102_v20 }
 0x378   :  { %1398 = vmatpush1.bf16.msra.mxu0 %v6010_v40  ;;  %1441 = vmatpush1.bf16.msra.mxu1 %v6106_v22 }
 0x379   :  { %1399 = vmatprep.subr.bf16.mxu0 %v6014_v41  ;;  %1442 = vmatprep.subr.bf16.mxu1 %v6110_v31 }
 0x37c   :  { %1400 = vmatpush1.bf16.msra.mxu0 %v6113_v57  ;;  %1443 = vmatpush1.bf16.msra.mxu1 %v6116_v15 }
 0x37d   :  { %1401 = vmatprep.subr.bf16.mxu0 %v6119_v37  ;;  %1444 = vmatprep.subr.bf16.mxu1 %v6122_v44 }
 0x380   :  { %1402 = vmatpush1.bf16.msra.mxu0 %v6125_v3  ;;  %1445 = vmatpush1.bf16.msra.mxu1 %v6128_v33 }
 0x381   :  { %1403 = vmatprep.subr.bf16.mxu0 %v6131_v50  ;;  %1446 = vmatprep.subr.bf16.mxu1 %v6134_v14 }
 0x384   :  { %1404 = vmatpush1.bf16.msra.mxu0 %v6137_v52  ;;  %1447 = vmatpush1.bf16.msra.mxu1 %v6228_v48 }
 0x385   :  { %1405 = vmatprep.subr.bf16.mxu0 %v6141_v62  ;;  %1448 = vmatprep.subr.bf16.mxu1 %v6232_v63 }
 0x388   :  { %1406 = vmatpush1.bf16.msra.mxu0 %v6145_v9  ;;  %1449 = vmatpush1.bf16.msra.mxu1 %v6236_v35 }
 0x389   :  { %1407 = vmatprep.subr.bf16.mxu0 %v6149_v8  ;;  %1450 = vmatprep.subr.bf16.mxu1 %v6240_v38 }
 0x38c   :  { %1408 = vmatpush1.bf16.msra.mxu0 %v6153_v56  ;;  %1451 = vmatpush1.bf16.msra.mxu1 %v6244_v55 }
 0x38d   :  { %1544 = vmatprep.subr.bf16.mxu0 %v6036_v46  ;;  %1587 = vmatprep.subr.bf16.mxu1 %v6039_v47 }
 0x42f   :  { %v1276_v5 = vpop.f32.mrf.mxu0  ;;  %v1319_v51 = vpop.f32.mrf.mxu1 }
 0x430   :  { %v1328_v45 = vadd.f32 %v1276_v5, %v8133_v10  ;;  %v8138_v5 = vld [vmem:[#allocation38_spill] sm:$0xff]  ;;  %v8139_v10 = vld [vmem:[#allocation45_spill] sm:$0xff] }
 0x431   :  { %v1278_v19 = vpop.f32.mrf.mxu0  ;;  %v1321_v18 = vpop.f32.mrf.mxu1 }
 0x432   :  { %v4200_v7 = vmul.f32 -1.442695, %v1328_v45  ;;  %v1329_v13 = vadd.f32 %v1278_v19, %v8136_v61  ;;  %v8140_v45 = vsel %vm5525_vm3, %v8138_v5, %v8139_v10  ;;  %v8141_v19 = vld [vmem:[#allocation57_spill] sm:$0xff] }
 0x433   :  { %v1280_v6 = vpop.f32.mrf.mxu0 }
 0x434   :  { %4640 = vpow2.f32 %v4200_v7  ;;  %v4201_v59 = vmul.f32 -1.442695, %v1329_v13  ;;  %v1332_v28 = vadd.f32 %v1280_v6, %v8137_v21  ;;  %v8142_v7 = vsel %vm5753_vm4, %v5698_v60, %v8141_v19  ;;  %v1323_v13 = vpop.f32.mrf.mxu1 }
 0x435   :  { %v1282_v26 = vpop.f32.mrf.mxu0  ;;  %v1330_v61 = vadd.f32 %v1319_v51, %v8142_v7  ;;  %v8149_v7 = vld [vmem:[#allocation62_spill] sm:$0xff] }
 0x436   :  { %4642 = vpow2.f32 %v4201_v59  ;;  %v4203_v58 = vmul.f32 -1.442695, %v1332_v28  ;;  %v1333_v49 = vadd.f32 %v1282_v26, %v8140_v45  ;;  %v8143_v28 = vld [vmem:[#allocation60_spill] sm:$0xff]  ;;  %v8145_v26 = vld [vmem:[#allocation49_spill] sm:$0xff]  ;;  %v1325_v30 = vpop.f32.mrf.mxu1 }
 0x437   :  { %v8144_v21 = vsel %vm5753_vm4, %v5727_v36, %v8143_v28  ;;  %v4202_v6 = vmul.f32 -1.442695, %v1330_v61 }
 0x438   :  { %4644 = vpow2.f32 %v4203_v58  ;;  %v4204_v4 = vmul.f32 -1.442695, %v1333_v49  ;;  %v1334_v59 = vadd.f32 %v1323_v13, %v8144_v21  ;;  %v8146_v58 = vld [vmem:[#allocation59_spill] sm:$0xff] }
 0x439   :  { %v8147_v49 = vsel %vm5768_vm5, %v8145_v26, %v8146_v58 }
 0x43a   :  { %4646 = vpow2.f32 %v4204_v4  ;;  %v1331_v45 = vadd.f32 %v1321_v18, %v8147_v49  ;;  %v4205_v53 = vmul.f32 -1.442695, %v1334_v59  ;;  %v8148_v4 = vld [vmem:[#allocation61_spill] sm:$0xff] }
 0x43b   :  { %4648 = vpow2.f32 %v4202_v6  ;;  %v8150_v42 = vsel %vm5768_vm5, %v8148_v4, %v8149_v7 }
 0x43c   :  { %4650 = vtanh.f32 %v1331_v45  ;;  %v1335_v13 = vadd.f32 %v1325_v30, %v8150_v42 }
 0x441   :  { %v4641_v2 = vpop.eup %4640 }
 0x442   :  { %v1354_v12 = vadd.f32 1.0, %v4641_v2 }
 0x443   :  { %v4643_v51 = vpop.eup %4642 }
 0x444   :  { %4652 = vrcp.f32 %v1354_v12  ;;  %v1355_v61 = vadd.f32 1.0, %v4643_v51 }
 0x445   :  { %v4645_v21 = vpop.eup %4644  ;;  %4654 = vpow2.f32 %v4205_v53 }
 0x446   :  { %4656 = vrcp.f32 %v1355_v61  ;;  %v1357_v26 = vadd.f32 1.0, %v4645_v21 }
 0x447   :  { %v4647_v18 = vpop.eup %4646  ;;  %4658 = vtanh.f32 %v1335_v13 }
 0x448   :  { %4660 = vrcp.f32 %v1357_v26  ;;  %v1358_v59 = vadd.f32 1.0, %v4647_v18  ;;  %v4649_v2 = vpop.eup %4648 }
 0x449   :  { %v4651_v6 = vpop.eup %4650  ;;  %v1356_v30 = vadd.f32 1.0, %v4649_v2 }
 0x44a   :  { %4662 = vrcp.f32 %v1358_v59 }
 0x44b   :  { %4664 = vrcp.f32 %v1356_v30  ;;  %v8152_v30 = vsel %vm5525_vm3, %v8135_v11, %v8134_v17  ;;  %v8155_v17 = vsel %vm5753_vm4, %v8141_v19, %v5698_v60 }
 0x451   :  { %v4653_v49 = vpop.eup %4652 }
 0x452   :  { %v4655_v45 = vpop.eup %4654  ;;  %v1376_v58 = vmul.f32 %v4653_v49, %v4651_v6  ;;  %v8151_v6 = vld [vmem:[#allocation43_spill] sm:$0xff] }
 0x453   :  { %v4657_v43 = vpop.eup %4656  ;;  %v1359_v21 = vadd.f32 1.0, %v4655_v45 }
 0x454   :  { %v4659_v36 = vpop.eup %4658  ;;  %v1374_v42 = vmul.f32 %v4657_v43, %v6192_v27 }
 0x455   :  { %v4661_v12 = vpop.eup %4660 }
 0x456   :  { %v6282_v51 = vadd.f32 %v1376_v58, %v1374_v42  ;;  %v1377_v53 = vmul.f32 %v4661_v12, %v4659_v36 }
 0x457   :  { %v4663_v61 = vpop.eup %4662 }
 0x458   :  { %v1375_v26 = vmul.f32 %v4663_v61, %v6196_v1  ;;  %4666 = vtanh.f32 %v6282_v51  ;;  %v4665_v18 = vpop.eup %4664 }
 0x459   :  { %4668 = vrcp.f32 %v1359_v21 }
 0x45a   :  { %v6286_v13 = vadd.f32 %v1377_v53, %v1375_v26  ;;  %v8153_v26 = vld [vmem:[#allocation47_spill] sm:$0xff] }
 0x45c   :  { %4670 = vtanh.f32 %v6286_v13 }
 0x465   :  { %v4667_v59 = vpop.eup %4666 }
 0x466   :  { %v4669_v43 = vpop.eup %4668  ;;  %v6289_v2 = vmul.f32 %v4667_v59, %v4665_v18 }
 0x469   :  { %v4671_v27 = vpop.eup %4670 }
 0x46a   :  { %v6291_v58 = vmul.f32 %v4671_v27, %v4669_v43 }
 0x46c   :  { %v1392_v36 = vpack.c.bf16 %v6291_v58, %v6289_v2 }
 0x46e   :  { %1426 = vmatmul.mubr.bf16.vlgmr.msra.gmra.mxu0 %v1392_v36  ;;  %1469 = vmatmul.mubr.bf16.vlgmr.msra.gmra.mxu1 %v1392_v36  ;;  %v8154_v36 = vsel %vm5525_vm3, %v8139_v10, %v8138_v5  ;;  %v8159_v5 = vld [vmem:[#allocation59_spill] sm:$0xff]  ;;  %v8160_v10 = vld [vmem:[#allocation49_spill] sm:$0xff] }
 0x46f   :  { %1545 = vmatpush1.bf16.msra.mxu0 %v5992_v23  ;;  %1588 = vmatpush1.bf16.msra.mxu1 %v6088_v39 }
 0x470   :  { %1546 = vmatprep.subr.bf16.mxu0 %v5996_v54  ;;  %1589 = vmatprep.subr.bf16.mxu1 %v6092_v29 }
 0x471   :  { %1576 = vmatprep.mubr.bf16.mxu0 %v8103_v24  ;;  %1619 = vmatprep.mubr.bf16.mxu1 %v8103_v24 }
 0x473   :  { %1547 = vmatpush1.bf16.msra.mxu0 %v6002_v25  ;;  %1590 = vmatpush1.bf16.msra.mxu1 %v6098_v16 }
 0x474   :  { %1548 = vmatprep.subr.bf16.mxu0 %v6006_v0  ;;  %1591 = vmatprep.subr.bf16.mxu1 %v6102_v20 }
 0x477   :  { %1549 = vmatpush1.bf16.msra.mxu0 %v6010_v40  ;;  %1592 = vmatpush1.bf16.msra.mxu1 %v6106_v22 }
 0x478   :  { %1550 = vmatprep.subr.bf16.mxu0 %v6014_v41  ;;  %1593 = vmatprep.subr.bf16.mxu1 %v6110_v31 }
 0x47b   :  { %1551 = vmatpush1.bf16.msra.mxu0 %v6113_v57  ;;  %1594 = vmatpush1.bf16.msra.mxu1 %v6116_v15 }
 0x47c   :  { %1552 = vmatprep.subr.bf16.mxu0 %v6119_v37  ;;  %1595 = vmatprep.subr.bf16.mxu1 %v6122_v44 }
 0x47f   :  { %1553 = vmatpush1.bf16.msra.mxu0 %v6125_v3  ;;  %1596 = vmatpush1.bf16.msra.mxu1 %v6128_v33 }
 0x480   :  { %1554 = vmatprep.subr.bf16.mxu0 %v6131_v50  ;;  %1597 = vmatprep.subr.bf16.mxu1 %v6134_v14 }
 0x483   :  { %1555 = vmatpush1.bf16.msra.mxu0 %v6137_v52  ;;  %1598 = vmatpush1.bf16.msra.mxu1 %v6228_v48 }
 0x484   :  { %1556 = vmatprep.subr.bf16.mxu0 %v6141_v62  ;;  %1599 = vmatprep.subr.bf16.mxu1 %v6232_v63 }
 0x487   :  { %1557 = vmatpush1.bf16.msra.mxu0 %v6145_v9  ;;  %1600 = vmatpush1.bf16.msra.mxu1 %v6236_v35 }
 0x488   :  { %1558 = vmatprep.subr.bf16.mxu0 %v6149_v8  ;;  %1601 = vmatprep.subr.bf16.mxu1 %v6240_v38 }
 0x48b   :  { %1559 = vmatpush1.bf16.msra.mxu0 %v6153_v56  ;;  %1602 = vmatpush1.bf16.msra.mxu1 %v6244_v55 }
 0x48c   :  { %1695 = vmatprep.subr.bf16.mxu0 %v6036_v46  ;;  %1738 = vmatprep.subr.bf16.mxu1 %v6039_v47 }
 0x52e   :  { %v1427_v1 = vpop.f32.mrf.mxu0  ;;  %v1470_v12 = vpop.f32.mrf.mxu1 }
 0x52f   :  { %v1479_v49 = vadd.f32 %v1427_v1, %v8151_v6  ;;  %v1481_v11 = vadd.f32 %v1470_v12, %v8155_v17 }
 0x530   :  { %v1429_v45 = vpop.f32.mrf.mxu0  ;;  %v1472_v43 = vpop.f32.mrf.mxu1 }
 0x531   :  { %v4206_v42 = vmul.f32 -1.442695, %v1479_v49  ;;  %v1480_v53 = vadd.f32 %v1429_v45, %v8152_v30  ;;  %v8156_v45 = vld [vmem:[#allocation52_spill] sm:$0xff] }
 0x532   :  { %v1431_v61 = vpop.f32.mrf.mxu0  ;;  %v1474_v49 = vpop.f32.mrf.mxu1 }
 0x533   :  { %4672 = vpow2.f32 %v4206_v42  ;;  %v4207_v21 = vmul.f32 -1.442695, %v1480_v53  ;;  %v1483_v18 = vadd.f32 %v1431_v61, %v8153_v26  ;;  %v8157_v42 = vsel %vm5753_vm4, %v8143_v28, %v8156_v45 }
 0x534   :  { %v1433_v59 = vpop.f32.mrf.mxu0  ;;  %v1485_v30 = vadd.f32 %v1474_v49, %v8157_v42  ;;  %v4208_v53 = vmul.f32 -1.442695, %v1481_v11  ;;  %v8162_v28 = vsel %vm5768_vm5, %v8149_v7, %v8148_v4 }
 0x535   :  { %4674 = vpow2.f32 %v4207_v21  ;;  %v4209_v27 = vmul.f32 -1.442695, %v1483_v18  ;;  %v1484_v1 = vadd.f32 %v1433_v59, %v8154_v36  ;;  %v8161_v21 = vsel %vm5768_vm5, %v8159_v5, %v8160_v10  ;;  %v1476_v18 = vpop.f32.mrf.mxu1 }
 0x536   :  { %v1482_v26 = vadd.f32 %v1472_v43, %v8161_v21  ;;  %v1486_v12 = vadd.f32 %v1476_v18, %v8162_v28 }
 0x537   :  { %4676 = vpow2.f32 %v4209_v27  ;;  %v4210_v6 = vmul.f32 -1.442695, %v1484_v1  ;;  %v4211_v27 = vmul.f32 -1.442695, %v1485_v30 }
 0x539   :  { %4678 = vpow2.f32 %v4210_v6 }
 0x53a   :  { %4680 = vpow2.f32 %v4208_v53 }
 0x53b   :  { %4682 = vtanh.f32 %v1482_v26 }
 0x540   :  { %v4673_v59 = vpop.eup %4672 }
 0x541   :  { %v1505_v60 = vadd.f32 1.0, %v4673_v59 }
 0x542   :  { %v4675_v19 = vpop.eup %4674 }
 0x543   :  { %4684 = vrcp.f32 %v1505_v60  ;;  %v1506_v36 = vadd.f32 1.0, %v4675_v19 }
 0x544   :  { %v4677_v1 = vpop.eup %4676  ;;  %4686 = vpow2.f32 %v4211_v27 }
 0x545   :  { %4688 = vrcp.f32 %v1506_v36  ;;  %v1508_v6 = vadd.f32 1.0, %v4677_v1 }
 0x546   :  { %v4679_v43 = vpop.eup %4678  ;;  %4690 = vtanh.f32 %v1486_v12 }
 0x547   :  { %4692 = vrcp.f32 %v1508_v6  ;;  %v1509_v17 = vadd.f32 1.0, %v4679_v43  ;;  %v4681_v11 = vpop.eup %4680 }
 0x548   :  { %v4683_v49 = vpop.eup %4682  ;;  %v1507_v10 = vadd.f32 1.0, %v4681_v11 }
 0x549   :  { %4694 = vrcp.f32 %v1509_v17 }
 0x550   :  { %v4685_v45 = vpop.eup %4684 }
 0x551   :  { %v4687_v42 = vpop.eup %4686  ;;  %v1527_v30 = vmul.f32 %v4685_v45, %v4683_v49 }
 0x552   :  { %v4689_v53 = vpop.eup %4688  ;;  %v1510_v59 = vadd.f32 1.0, %v4687_v42 }
 0x553   :  { %v4691_v5 = vpop.eup %4690  ;;  %v1525_v4 = vmul.f32 %v4689_v53, %v6282_v51 }
 0x554   :  { %v4693_v7 = vpop.eup %4692 }
 0x555   :  { %v6362_v21 = vadd.f32 %v1527_v30, %v1525_v4  ;;  %v1528_v26 = vmul.f32 %v4693_v7, %v4691_v5  ;;  %v8168_v7 = vld [vmem:[#allocation56_spill] sm:$0xff] }
 0x556   :  { %v4695_v18 = vpop.eup %4694 }
 0x557   :  { %4696 = vtanh.f32 %v6362_v21  ;;  %v1526_v27 = vmul.f32 %v4695_v18, %v6286_v13  ;;  %v8169_v18 = vld [vmem:[#allocation54_spill] sm:$0xff] }
 0x558   :  { %4698 = vrcp.f32 %v1507_v10 }
 0x559   :  { %v6366_v60 = vadd.f32 %v1528_v26, %v1526_v27  ;;  %4700 = vrcp.f32 %v1510_v59  ;;  %v8170_v59 = vld [vmem:[#allocation53_spill] sm:$0xff] }
 0x55a   :  { %v8171_v27 = vsel %vm5525_vm3, %v8169_v18, %v8170_v59 }
 0x55b   :  { %4702 = vtanh.f32 %v6366_v60 }
 0x564   :  { %v4697_v19 = vpop.eup %4696 }
 0x565   :  { %v4699_v28 = vpop.eup %4698 }
 0x566   :  { %v1533_v51 = vmul.f32 %v4699_v28, %v4697_v19  ;;  %v4701_v12 = vpop.eup %4700 }
 0x568   :  { %v4703_v36 = vpop.eup %4702  ;;  %v1994_v43 = vsel %vm127_vm2, %v6289_v2, %v1533_v51  ;;  %v1996_v11 = vsel %vm127_vm2, %v1533_v51, %v6289_v2  ;;  %v8165_v2 = vld [vmem:[#allocation48_spill] sm:$0xff] }
 0x569   :  { %v1534_v1 = vmul.f32 %v4703_v36, %v4701_v12  ;;  %v8173_v12 = vld [vmem:[#allocation39_spill] sm:$0xff] }
 0x56b   :  { %v1543_v17 = vpack.c.bf16 %v1534_v1, %v1533_v51  ;;  %v1995_v13 = vsel %vm127_vm2, %v6291_v58, %v1534_v1  ;;  %v1997_v49 = vsel %vm127_vm2, %v1534_v1, %v6291_v58  ;;  %v8166_v58 = vld [vmem:[#allocation32_spill] sm:$0xff]  ;;  %v8172_v51 = vld [vmem:[#allocation63_spill] sm:$0xff] }
 0x56c   :  { %v6381_v45 = vpack.c.bf16 %v1995_v13, %v1994_v43  ;;  %v6383_v42 = vpack.c.bf16 %v1997_v49, %v1996_v11  ;;  %v8167_v30 = vsel %vm5525_vm3, %v8165_v2, %v8166_v58  ;;  %v8174_v36 = vsel %vm5753_vm4, %v8172_v51, %v8173_v12  ;;  %v8176_v13 = vld [vmem:[#allocation44_spill] sm:$0xff] }
 0x56d   :  { %1577 = vmatmul.mubr.bf16.vlgmr.msra.gmra.mxu0 %v1543_v17  ;;  %1620 = vmatmul.mubr.bf16.vlgmr.msra.gmra.mxu1 %v1543_v17  ;;  %v8175_v17 = vld [vmem:[#allocation65_spill] sm:$0xff] }
 0x56e   :  { %1696 = vmatpush1.bf16.msra.mxu0 %v5992_v23  ;;  %1739 = vmatpush1.bf16.msra.mxu1 %v6088_v39  ;;  %v8177_v11 = vsel %vm5753_vm4, %v8175_v17, %v8176_v13 }
 0x56f   :  { %1697 = vmatprep.subr.bf16.mxu0 %v5996_v54  ;;  %1740 = vmatprep.subr.bf16.mxu1 %v6092_v29  ;;  %v8164_v54 = vld [vmem:[#allocation51_spill] sm:$0xff] }
 0x570   :  { %1727 = vmatprep.mubr.bf16.mxu0 %v8103_v24  ;;  %1770 = vmatprep.mubr.bf16.mxu1 %v8103_v24 }
 0x572   :  { %1698 = vmatpush1.bf16.msra.mxu0 %v6002_v25  ;;  %1741 = vmatpush1.bf16.msra.mxu1 %v6098_v16 }
 0x573   :  { %1699 = vmatprep.subr.bf16.mxu0 %v6006_v0  ;;  %1742 = vmatprep.subr.bf16.mxu1 %v6102_v20 }
 0x576   :  { %1700 = vmatpush1.bf16.msra.mxu0 %v6010_v40  ;;  %1743 = vmatpush1.bf16.msra.mxu1 %v6106_v22 }
 0x577   :  { %1701 = vmatprep.subr.bf16.mxu0 %v6014_v41  ;;  %1744 = vmatprep.subr.bf16.mxu1 %v6110_v31 }
 0x57a   :  { %1702 = vmatpush1.bf16.msra.mxu0 %v6113_v57  ;;  %1745 = vmatpush1.bf16.msra.mxu1 %v6116_v15 }
 0x57b   :  { %1703 = vmatprep.subr.bf16.mxu0 %v6119_v37  ;;  %1746 = vmatprep.subr.bf16.mxu1 %v6122_v44 }
 0x57e   :  { %1704 = vmatpush1.bf16.msra.mxu0 %v6125_v3  ;;  %1747 = vmatpush1.bf16.msra.mxu1 %v6128_v33 }
 0x57f   :  { %1705 = vmatprep.subr.bf16.mxu0 %v6131_v50  ;;  %1748 = vmatprep.subr.bf16.mxu1 %v6134_v14 }
 0x582   :  { %1706 = vmatpush1.bf16.msra.mxu0 %v6137_v52  ;;  %1749 = vmatpush1.bf16.msra.mxu1 %v6228_v48 }
 0x583   :  { %1707 = vmatprep.subr.bf16.mxu0 %v6141_v62  ;;  %1750 = vmatprep.subr.bf16.mxu1 %v6232_v63 }
 0x586   :  { %1708 = vmatpush1.bf16.msra.mxu0 %v6145_v9  ;;  %1751 = vmatpush1.bf16.msra.mxu1 %v6236_v35 }
 0x587   :  { %1709 = vmatprep.subr.bf16.mxu0 %v6149_v8  ;;  %1752 = vmatprep.subr.bf16.mxu1 %v6240_v38 }
 0x58a   :  { %1710 = vmatpush1.bf16.msra.mxu0 %v6153_v56  ;;  %1753 = vmatpush1.bf16.msra.mxu1 %v6244_v55 }
 0x58b   :  { %1846 = vmatprep.subr.bf16.mxu0 %v6036_v46  ;;  %1889 = vmatprep.subr.bf16.mxu1 %v6039_v47 }
 0x62d   :  { %v1578_v23 = vpop.f32.mrf.mxu0  ;;  %v1621_v41 = vpop.f32.mrf.mxu1 }
 0x62e   :  { %v1630_v25 = vadd.f32 %v1578_v23, %v8164_v54  ;;  %v1632_v1 = vadd.f32 %v1621_v41, %v8174_v36  ;;  %v8178_v54 = vld [vmem:[#allocation64_spill] sm:$0xff] }
 0x62f   :  { %v1580_v0 = vpop.f32.mrf.mxu0  ;;  %v1623_v47 = vpop.f32.mrf.mxu1 }
 0x630   :  { %v4212_v40 = vmul.f32 -1.442695, %v1630_v25  ;;  %v1631_v53 = vadd.f32 %v1580_v0, %v8167_v30  ;;  %v4214_v23 = vmul.f32 -1.442695, %v1632_v1  ;;  %v8179_v25 = vld [vmem:[#allocation41_spill] sm:$0xff] }
 0x631   :  { %v1582_v5 = vpop.f32.mrf.mxu0  ;;  %v1625_v43 = vpop.f32.mrf.mxu1  ;;  %v8180_v0 = vsel %vm5768_vm5, %v8178_v54, %v8179_v25 }
 0x632   :  { %4704 = vpow2.f32 %v4212_v40  ;;  %v4213_v4 = vmul.f32 -1.442695, %v1631_v53  ;;  %v1634_v10 = vadd.f32 %v1582_v5, %v8168_v7  ;;  %v1636_v49 = vadd.f32 %v1625_v43, %v8177_v11  ;;  %v8181_v5 = vld [vmem:[#allocation67_spill] sm:$0xff] }
 0x633   :  { %v1584_v46 = vpop.f32.mrf.mxu0  ;;  %v1633_v40 = vadd.f32 %v1623_v47, %v8180_v0  ;;  %v1627_v2 = vpop.f32.mrf.mxu1 }
 0x634   :  { %4706 = vpow2.f32 %v4213_v4  ;;  %v4215_v26 = vmul.f32 -1.442695, %v1634_v10  ;;  %v1635_v19 = vadd.f32 %v1584_v46, %v8171_v27  ;;  %v4217_v30 = vmul.f32 -1.442695, %v1636_v49  ;;  %v8182_v4 = vld [vmem:[#allocation66_spill] sm:$0xff] }
 0x635   :  { %v8183_v7 = vsel %vm5768_vm5, %v8181_v5, %v8182_v4 }
 0x636   :  { %4708 = vpow2.f32 %v4215_v26  ;;  %v4216_v28 = vmul.f32 -1.442695, %v1635_v19  ;;  %v1637_v10 = vadd.f32 %v1627_v2, %v8183_v7  ;;  %v8185_v7 = vld [vmem:[#allocation15_spill] sm:$0xff] }
 0x638   :  { %4710 = vpow2.f32 %v4216_v28 }
 0x639   :  { %4712 = vpow2.f32 %v4214_v23 }
 0x63a   :  { %4714 = vtanh.f32 %v1633_v40 }
 0x63f   :  { %v4705_v58 = vpop.eup %4704 }
 0x640   :  { %v1656_v53 = vadd.f32 1.0, %v4705_v58 }
 0x641   :  { %v4707_v41 = vpop.eup %4706 }
 0x642   :  { %4716 = vrcp.f32 %v1656_v53  ;;  %v1657_v46 = vadd.f32 1.0, %v4707_v41  ;;  %v8184_v41 = vld [vmem:[#allocation13_spill] sm:$0xff] }
 0x643   :  { %v4709_v26 = vpop.eup %4708  ;;  %4718 = vpow2.f32 %v4217_v30 }
 0x644   :  { %4720 = vrcp.f32 %v1657_v46  ;;  %v1659_v18 = vadd.f32 1.0, %v4709_v26 }
 0x645   :  { %v4711_v47 = vpop.eup %4710  ;;  %4722 = vtanh.f32 %v1637_v10 }
 0x646   :  { %4724 = vrcp.f32 %v1659_v18  ;;  %v1660_v59 = vadd.f32 1.0, %v4711_v47  ;;  %v4713_v27 = vpop.eup %4712  ;;  %v5088_v47 = vld [vmem:[#allocation4 + $0xe0] ss:$16 sps:$4 sm:$0xff]  }
 0x647   :  { %v4715_v19 = vpop.eup %4714  ;;  %v1658_v13 = vadd.f32 1.0, %v4713_v27  ;;  %v5090_v27 = vld [vmem:[#allocation4 + $0xc0] ss:$16 sps:$4 sm:$0xff]  }
 0x648   :  { %4726 = vrcp.f32 %v1660_v59  ;;  %v5089_v59 = vld [vmem:[#allocation4 + $0xc4] ss:$16 sps:$4 sm:$0xff]  }
 0x64f   :  { %v4717_v28 = vpop.eup %4716 }
 0x650   :  { %v4719_v51 = vpop.eup %4718  ;;  %v1678_v12 = vmul.f32 %v4717_v28, %v4715_v19  ;;  %v5091_v19 = vld [vmem:[#allocation4 + $0xa4] ss:$16 sps:$4 sm:$0xff]   ;;  %v5092_v28 = vld [vmem:[#allocation4 + $0xa0] ss:$16 sps:$4 sm:$0xff]  }
 0x651   :  { %v4721_v36 = vpop.eup %4720  ;;  %v1661_v54 = vadd.f32 1.0, %v4719_v51  ;;  %v8195_v51 = vld [vmem:[#allocation34_spill] sm:$0xff] }
 0x652   :  { %v4723_v1 = vpop.eup %4722  ;;  %v1676_v43 = vmul.f32 %v4721_v36, %v6362_v21 }
 0x653   :  { %v4725_v17 = vpop.eup %4724 }
 0x654   :  { %v6452_v11 = vadd.f32 %v1678_v12, %v1676_v43  ;;  %v1679_v49 = vmul.f32 %v4725_v17, %v4723_v1  ;;  %v8197_v43 = vld [vmem:[#allocation70_spill] sm:$0xff]  ;;  %v8198_v17 = vld [vmem:[#allocation37_spill] sm:$0xff] }
 0x655   :  { %v4727_v23 = vpop.eup %4726 }
 0x656   :  { %4728 = vtanh.f32 %v6452_v11  ;;  %v1677_v25 = vmul.f32 %v4727_v23, %v6366_v60 }
 0x657   :  { %4730 = vrcp.f32 %v1658_v13  ;;  %v8199_v13 = vsel %vm5753_vm4, %v8197_v43, %v8198_v17  ;;  %v4445_v43 = vld [vmem:[#allocation6 + $0xec] ss:$16 sps:$4 sm:$0xff]   ;;  %v4440_v17 = vld [vmem:[#allocation6 + $0xe0] ss:$16 sps:$4 sm:$0xff]  }
 0x658   :  { %v6456_v0 = vadd.f32 %v1679_v49, %v1677_v25  ;;  %4732 = vrcp.f32 %v1661_v54  ;;  %v8200_v54 = vld [vmem:[#allocation69_spill] sm:$0xff]  ;;  %v8201_v25 = vld [vmem:[#allocation36_spill] sm:$0xff] }
 0x65a   :  { %4734 = vtanh.f32 %v6456_v0 }
 0x663   :  { %v4729_v40 = vpop.eup %4728 }
 0x664   :  { %v4731_v2 = vpop.eup %4730 }
 0x665   :  { %v1684_v21 = vmul.f32 %v4731_v2, %v4729_v40  ;;  %v4733_v58 = vpop.eup %4732  ;;  %v8202_v40 = vsel %vm5768_vm5, %v8200_v54, %v8201_v25  ;;  %v4446_v54 = vld [vmem:[#allocation6 + $0xc0] ss:$16 sps:$4 sm:$0xff]   ;;  %v4449_v25 = vld [vmem:[#allocation6 + $0xc8] ss:$16 sps:$4 sm:$0xff]  }
 0x667   :  { %v4735_v30 = vpop.eup %4734  ;;  %v1992_v5 = vsel %vm127_vm2, %v8184_v41, %v1684_v21  ;;  %v1998_v10 = vsel %vm127_vm2, %v1684_v21, %v8184_v41 }
 0x668   :  { %v1685_v53 = vmul.f32 %v4735_v30, %v4733_v58 }
 0x66a   :  { %v1694_v4 = vpack.c.bf16 %v1685_v53, %v1684_v21  ;;  %v1993_v60 = vsel %vm127_vm2, %v8185_v7, %v1685_v53  ;;  %v1999_v46 = vsel %vm127_vm2, %v1685_v53, %v8185_v7 }
 0x66b   :  { %v6471_v26 = vpack.c.bf16 %v1993_v60, %v1992_v5  ;;  %v6473_v18 = vpack.c.bf16 %v1999_v46, %v1998_v10  ;;  %v8203_v5 = vld [vmem:[#allocation72_spill] sm:$0xff] }
 0x66c   :  { %1728 = vmatmul.mubr.bf16.vlgmr.msra.gmra.mxu0 %v1694_v4  ;;  %1771 = vmatmul.mubr.bf16.vlgmr.msra.gmra.mxu1 %v1694_v4  ;;  %v8204_v4 = vld [vmem:[#allocation71_spill] sm:$0xff] }
 0x66d   :  { %1847 = vmatpush1.bf16.msra.mxu0 %v5088_v47  ;;  %1890 = vmatpush1.bf16.msra.mxu1 %v6088_v39  ;;  %v5093_v39 = vld [vmem:[#allocation4 + $0x84] ss:$16 sps:$4 sm:$0xff]   ;;  %v8205_v7 = vsel %vm5768_vm5, %v8203_v5, %v8204_v4  ;;  %v4463_v5 = vld [vmem:[#allocation6 + $0x8c] ss:$16 sps:$4 sm:$0xff]  }
 0x66e   :  { %1848 = vmatprep.subr.bf16.mxu0 %v5089_v59  ;;  %1891 = vmatprep.subr.bf16.mxu1 %v6092_v29  ;;  %v4466_v4 = vld [vmem:[#allocation6 + $0x64] ss:$16 sps:$4 sm:$0xff]  }
 0x66f   :  { %1878 = vmatprep.mubr.bf16.mxu0 %v8103_v24  ;;  %1921 = vmatprep.mubr.bf16.mxu1 %v8103_v24 }
 0x671   :  { %1849 = vmatpush1.bf16.msra.mxu0 %v5090_v27  ;;  %1892 = vmatpush1.bf16.msra.mxu1 %v6098_v16  ;;  %v8186_v16 = vld [vmem:[#allocation22_spill] sm:$0xff] }
 0x672   :  { %1850 = vmatprep.subr.bf16.mxu0 %v5091_v19  ;;  %1893 = vmatprep.subr.bf16.mxu1 %v6102_v20 }
 0x675   :  { %1851 = vmatpush1.bf16.msra.mxu0 %v5092_v28  ;;  %1894 = vmatpush1.bf16.msra.mxu1 %v6106_v22 }
 0x676   :  { %1852 = vmatprep.subr.bf16.mxu0 %v5093_v39  ;;  %1895 = vmatprep.subr.bf16.mxu1 %v6110_v31 }
 0x679   :  { %1853 = vmatpush1.bf16.msra.mxu0 %v6113_v57  ;;  %1896 = vmatpush1.bf16.msra.mxu1 %v6116_v15  ;;  %v8187_v15 = vld [vmem:[#allocation17_spill] sm:$0xff] }
 0x67a   :  { %1854 = vmatprep.subr.bf16.mxu0 %v6119_v37  ;;  %1897 = vmatprep.subr.bf16.mxu1 %v6122_v44 }
 0x67d   :  { %1855 = vmatpush1.bf16.msra.mxu0 %v6125_v3  ;;  %1898 = vmatpush1.bf16.msra.mxu1 %v6128_v33  ;;  %v8190_v33 = vld [vmem:[#allocation29_spill] sm:$0xff] }
 0x67e   :  { %1856 = vmatprep.subr.bf16.mxu0 %v6131_v50  ;;  %1899 = vmatprep.subr.bf16.mxu1 %v6134_v14 }
 0x681   :  { %1857 = vmatpush1.bf16.msra.mxu0 %v6137_v52  ;;  %1900 = vmatpush1.bf16.msra.mxu1 %v6228_v48  ;;  %v8192_v48 = vld [vmem:[#allocation25_spill] sm:$0xff] }
 0x682   :  { %1858 = vmatprep.subr.bf16.mxu0 %v6141_v62  ;;  %1901 = vmatprep.subr.bf16.mxu1 %v6232_v63  ;;  %v8191_v62 = vld [vmem:[#allocation28_spill] sm:$0xff] }
 0x683   :  { %v8193_v63 = vsel %vm5525_vm3, %v8191_v62, %v8192_v48  ;;  %v8206_v48 = vld [vmem:[#allocation12_spill] sm:$0xff] }
 0x685   :  { %1859 = vmatpush1.bf16.msra.mxu0 %v6145_v9  ;;  %1902 = vmatpush1.bf16.msra.mxu1 %v6236_v35  ;;  %v8188_v9 = vld [vmem:[#allocation19_spill] sm:$0xff] }
 0x686   :  { %1860 = vmatprep.subr.bf16.mxu0 %v6149_v8  ;;  %1903 = vmatprep.subr.bf16.mxu1 %v6240_v38  ;;  %v8189_v37 = vsel %vm5525_vm3, %v8187_v15, %v8188_v9 }
 0x689   :  { %1861 = vmatpush1.bf16.msra.mxu0 %v6153_v56  ;;  %1904 = vmatpush1.bf16.msra.mxu1 %v6244_v55  ;;  %v8194_v55 = vld [vmem:[#allocation68_spill] sm:$0xff] }
 0x68a   :  { %v8196_v12 = vsel %vm5753_vm4, %v8194_v55, %v8195_v51  ;;  %2403 = vmatprep.subr.bf16.mxu1 %v4445_v43  ;;  %v8216_v43 = vld [vmem:[#allocation24_spill] sm:$0xff] }
 0x72c   :  { %v1729_v29 = vpop.f32.mrf.mxu0  ;;  %v1772_v57 = vpop.f32.mrf.mxu1 }
 0x72d   :  { %v1781_v20 = vadd.f32 %v1729_v29, %v8186_v16  ;;  %v1783_v36 = vadd.f32 %v1772_v57, %v8196_v12 }
 0x72e   :  { %v1731_v22 = vpop.f32.mrf.mxu0  ;;  %v1774_v14 = vpop.f32.mrf.mxu1 }
 0x72f   :  { %v4218_v31 = vmul.f32 -1.442695, %v1781_v20  ;;  %v1782_v44 = vadd.f32 %v1731_v22, %v8189_v37  ;;  %v4220_v23 = vmul.f32 -1.442695, %v1783_v36  ;;  %v1784_v2 = vadd.f32 %v1774_v14, %v8202_v40  ;;  %v4454_v40 = vld [vmem:[#allocation6 + $0xa4] ss:$16 sps:$4 sm:$0xff]  }
 0x730   :  { %v1733_v3 = vpop.f32.mrf.mxu0  ;;  %v1776_v1 = vpop.f32.mrf.mxu1 }
 0x731   :  { %4736 = vpow2.f32 %v4218_v31  ;;  %v4219_v8 = vmul.f32 -1.442695, %v1782_v44  ;;  %v1785_v50 = vadd.f32 %v1733_v3, %v8190_v33  ;;  %v1787_v49 = vadd.f32 %v1776_v1, %v8199_v13  ;;  %v4442_v1 = vld [vmem:[#allocation6 + $0xe4] ss:$16 sps:$4 sm:$0xff]   ;;  %v4443_v13 = vld [vmem:[#allocation6 + $0xe8] ss:$16 sps:$4 sm:$0xff]  }
 0x732   :  { %v1735_v56 = vpop.f32.mrf.mxu0  ;;  %v1778_v21 = vpop.f32.mrf.mxu1  ;;  %2290 = vmatprep.subr.bf16.mxu0 %v4442_v1  ;;  %v8215_v1 = vld [vmem:[#allocation26_spill] sm:$0xff] }
 0x733   :  { %4738 = vpow2.f32 %v4219_v8  ;;  %v4221_v52 = vmul.f32 -1.442695, %v1785_v50  ;;  %v1786_v35 = vadd.f32 %v1735_v56, %v8193_v63  ;;  %v4223_v30 = vmul.f32 -1.442695, %v1787_v49  ;;  %v4448_v49 = vld [vmem:[#allocation6 + $0xc4] ss:$16 sps:$4 sm:$0xff]  }
 0x734   :  { %v1788_v60 = vadd.f32 %v1778_v21, %v8205_v7  ;;  %v4452_v21 = vld [vmem:[#allocation6 + $0xa0] ss:$16 sps:$4 sm:$0xff]   ;;  %v4469_v7 = vld [vmem:[#allocation6 + $0x6c] ss:$16 sps:$4 sm:$0xff]  }
 0x735   :  { %4740 = vpow2.f32 %v4221_v52  ;;  %v4222_v38 = vmul.f32 -1.442695, %v1786_v35 }
 0x737   :  { %4742 = vpow2.f32 %v4222_v38  ;;  %v8207_v38 = vld [vmem:[#allocation14_spill] sm:$0xff] }
 0x738   :  { %4744 = vpow2.f32 %v4220_v23  ;;  %v4451_v23 = vld [vmem:[#allocation6 + $0xcc] ss:$16 sps:$4 sm:$0xff]  }
 0x739   :  { %4746 = vtanh.f32 %v1784_v2  ;;  %v4457_v2 = vld [vmem:[#allocation6 + $0xac] ss:$16 sps:$4 sm:$0xff]  }
 0x73e   :  { %v4737_v58 = vpop.eup %4736 }
 0x73f   :  { %v1807_v53 = vadd.f32 1.0, %v4737_v58  ;;  %v4455_v58 = vld [vmem:[#allocation6 + $0xa8] ss:$16 sps:$4 sm:$0xff]  }
 0x740   :  { %v4739_v41 = vpop.eup %4738 }
 0x741   :  { %4748 = vrcp.f32 %v1807_v53  ;;  %v1808_v10 = vadd.f32 1.0, %v4739_v41  ;;  %v4460_v53 = vld [vmem:[#allocation6 + $0x84] ss:$16 sps:$4 sm:$0xff]   ;;  %v4461_v41 = vld [vmem:[#allocation6 + $0x88] ss:$16 sps:$4 sm:$0xff]  }
 0x742   :  { %v4741_v46 = vpop.eup %4740  ;;  %4750 = vpow2.f32 %v4223_v30  ;;  %v4458_v30 = vld [vmem:[#allocation6 + $0x80] ss:$16 sps:$4 sm:$0xff]  }
 0x743   :  { %4752 = vrcp.f32 %v1808_v10  ;;  %v1810_v47 = vadd.f32 1.0, %v4741_v46  ;;  %v4467_v10 = vld [vmem:[#allocation6 + $0x68] ss:$16 sps:$4 sm:$0xff]   ;;  %v4472_v46 = vld [vmem:[#allocation6 + $0x44] ss:$16 sps:$4 sm:$0xff]  }
 0x744   :  { %v4743_v59 = vpop.eup %4742  ;;  %4754 = vtanh.f32 %v1788_v60  ;;  %v4464_v60 = vld [vmem:[#allocation6 + $0x60] ss:$16 sps:$4 sm:$0xff]  }
 0x745   :  { %4756 = vrcp.f32 %v1810_v47  ;;  %v1811_v27 = vadd.f32 1.0, %v4743_v59  ;;  %v4745_v19 = vpop.eup %4744  ;;  %v4475_v47 = vld [vmem:[#allocation6 + $0x4c] ss:$16 sps:$4 sm:$0xff]   ;;  %v4470_v59 = vld [vmem:[#allocation6 + $0x40] ss:$16 sps:$4 sm:$0xff]  }
 0x746   :  { %v4747_v28 = vpop.eup %4746  ;;  %v1809_v15 = vadd.f32 1.0, %v4745_v19  ;;  %v4478_v19 = vld [vmem:[#allocation6 + $0x24] ss:$16 sps:$4 sm:$0xff]  }
 0x747   :  { %4758 = vrcp.f32 %v1811_v27  ;;  %v4473_v27 = vld [vmem:[#allocation6 + $0x48] ss:$16 sps:$4 sm:$0xff]  }
 0x74e   :  { %v4749_v39 = vpop.eup %4748 }
 0x74f   :  { %v4751_v29 = vpop.eup %4750  ;;  %v1829_v16 = vmul.f32 %v4749_v39, %v4747_v28  ;;  %v4481_v28 = vld [vmem:[#allocation6 + $0x2c] ss:$16 sps:$4 sm:$0xff]   ;;  %v4476_v39 = vld [vmem:[#allocation6 + $0x20] ss:$16 sps:$4 sm:$0xff]  }
 0x750   :  { %v4753_v20 = vpop.eup %4752  ;;  %v1812_v3 = vadd.f32 1.0, %v4751_v29  ;;  %v4479_v29 = vld [vmem:[#allocation6 + $0x28] ss:$16 sps:$4 sm:$0xff]  }
 0x751   :  { %v4755_v22 = vpop.eup %4754  ;;  %v1827_v31 = vmul.f32 %v4753_v20, %v6452_v11  ;;  %v4487_v20 = vld [vmem:[#allocation6 + $0xc] ss:$16 sps:$4 sm:$0xff]  }
 0x752   :  { %v4757_v57 = vpop.eup %4756 }
 0x753   :  { %v6534_v9 = vadd.f32 %v1829_v16, %v1827_v31  ;;  %v1830_v37 = vmul.f32 %v4757_v57, %v4755_v22  ;;  %v4484_v16 = vld [vmem:[#allocation6 + $0x4] ss:$16 sps:$4 sm:$0xff]   ;;  %v4482_v22 = vld [vmem:[#allocation6] ss:$16 sps:$4 sm:$0xff]   ;;  %v4485_v31 = vld [vmem:[#allocation6 + $0x8] ss:$16 sps:$4 sm:$0xff]  }
 0x754   :  { %v4759_v44 = vpop.eup %4758  ;;  %v6559_v57 = vld [vmem:[#allocation8 + $0xe4] ss:$16 sps:$4 sm:$0xff]  }
 0x755   :  { %4760 = vtanh.f32 %v6534_v9  ;;  %v1828_v8 = vmul.f32 %v4759_v44, %v6456_v0  ;;  %8208 = vst [vmem:[#allocation21_spill] sm:$0xff] %v6559_v57  ;;  %v8210_v44 = vld [vmem:[#allocation23_spill] sm:$0xff] }
 0x756   :  { %4762 = vrcp.f32 %v1809_v15  ;;  %v6562_v15 = vld [vmem:[#allocation8 + $0xec] ss:$16 sps:$4 sm:$0xff]  }
 0x757   :  { %v6538_v33 = vadd.f32 %v1830_v37, %v1828_v8  ;;  %4764 = vrcp.f32 %v1812_v3  ;;  %8209 = vst [vmem:[#allocation27_spill] sm:$0xff] %v6562_v15 }
 0x759   :  { %4766 = vtanh.f32 %v6538_v33 }
 0x762   :  { %v4761_v50 = vpop.eup %4760 }
 0x763   :  { %v4763_v56 = vpop.eup %4762 }
 0x764   :  { %v1835_v11 = vmul.f32 %v4763_v56, %v4761_v50  ;;  %v4765_v14 = vpop.eup %4764 }
 0x766   :  { %v4767_v52 = vpop.eup %4766  ;;  %v1990_v63 = vsel %vm127_vm2, %v8206_v48, %v1835_v11  ;;  %v2000_v55 = vsel %vm127_vm2, %v1835_v11, %v8206_v48 }
 0x767   :  { %v1836_v62 = vmul.f32 %v4767_v52, %v4765_v14  ;;  %v8212_v14 = vld [vmem:[#allocation18_spill] sm:$0xff] }
 0x769   :  { %v1845_v35 = vpack.c.bf16 %v1836_v62, %v1835_v11  ;;  %v1991_v0 = vsel %vm127_vm2, %v8207_v38, %v1836_v62  ;;  %v2001_v51 = vsel %vm127_vm2, %v1836_v62, %v8207_v38  ;;  %v8211_v11 = vld [vmem:[#allocation20_spill] sm:$0xff] }
 0x76a   :  { %v6553_v12 = vpack.c.bf16 %v1991_v0, %v1990_v63  ;;  %v6555_v36 = vpack.c.bf16 %v2001_v51, %v2000_v55  ;;  %v8213_v52 = vsel %vm5525_vm3, %v8211_v11, %v8212_v14 }
 0x76b   :  { %1879 = vmatmul.mubr.bf16.vlgmr.msra.gmra.mxu0 %v1845_v35  ;;  %1922 = vmatmul.mubr.bf16.vlgmr.msra.gmra.mxu1 %v1845_v35  ;;  %v8214_v35 = vld [vmem:[#allocation30_spill] sm:$0xff] }
 0x76c   :  { %2322 = vmatprep.mubr.bf16.mxu0 %v8103_v24  ;;  %2435 = vmatprep.mubr.bf16.mxu1 %v8103_v24 }
 0x76d   :  { %2291 = vmatpush1.bf16.msra.mxu0 %v4440_v17  ;;  %2404 = vmatpush1.bf16.msra.mxu1 %v4443_v13  ;;  %v8217_v17 = vsel %vm5525_vm3, %v8215_v1, %v8216_v43 }
 0x76e   :  { %2292 = vmatprep.subr.bf16.mxu0 %v4448_v49  ;;  %2405 = vmatprep.subr.bf16.mxu1 %v4451_v23  ;;  %v8218_v23 = vld [vmem:[#allocation73_spill] sm:$0xff] }
 0x771   :  { %2293 = vmatpush1.bf16.msra.mxu0 %v4446_v54  ;;  %2406 = vmatpush1.bf16.msra.mxu1 %v4449_v25  ;;  %v8219_v54 = vld [vmem:[#allocation31_spill] sm:$0xff] }
 0x772   :  { %2294 = vmatprep.subr.bf16.mxu0 %v4454_v40  ;;  %2407 = vmatprep.subr.bf16.mxu1 %v4457_v2  ;;  %v8220_v25 = vsel %vm5753_vm4, %v8218_v23, %v8219_v54  ;;  %v8230_v54 = vld [vmem:[#allocation79_spill] sm:$0xff] }
 0x775   :  { %2295 = vmatpush1.bf16.msra.mxu0 %v4452_v21  ;;  %2408 = vmatpush1.bf16.msra.mxu1 %v4455_v58  ;;  %v8221_v21 = vld [vmem:[#allocation76_spill] sm:$0xff]  ;;  %v8222_v58 = vld [vmem:[#allocation75_spill] sm:$0xff] }
 0x776   :  { %2296 = vmatprep.subr.bf16.mxu0 %v4460_v53  ;;  %2409 = vmatprep.subr.bf16.mxu1 %v4463_v5  ;;  %v8224_v5 = vld [vmem:[#allocation74_spill] sm:$0xff] }
 0x779   :  { %2297 = vmatpush1.bf16.msra.mxu0 %v4458_v30  ;;  %2410 = vmatpush1.bf16.msra.mxu1 %v4461_v41  ;;  %v8223_v30 = vsel %vm5753_vm4, %v8221_v21, %v8222_v58 }
 0x77a   :  { %2298 = vmatprep.subr.bf16.mxu0 %v4466_v4  ;;  %2411 = vmatprep.subr.bf16.mxu1 %v4469_v7  ;;  %v8225_v4 = vld [vmem:[#allocation33_spill] sm:$0xff] }
 0x77b   :  { %v8226_v7 = vsel %vm5768_vm5, %v8224_v5, %v8225_v4  ;;  %v6619_v5 = vld [vmem:[#allocation8 + $0xcc] ss:$16 sps:$4 sm:$0xff]   ;;  %v6623_v4 = vld [vmem:[#allocation8 + $0xc0] ss:$16 sps:$4 sm:$0xff]  }
 0x77d   :  { %2299 = vmatpush1.bf16.msra.mxu0 %v4464_v60  ;;  %2412 = vmatpush1.bf16.msra.mxu1 %v4467_v10 }
 0x77e   :  { %2300 = vmatprep.subr.bf16.mxu0 %v4472_v46  ;;  %2413 = vmatprep.subr.bf16.mxu1 %v4475_v47 }
 0x781   :  { %2301 = vmatpush1.bf16.msra.mxu0 %v4470_v59  ;;  %2414 = vmatpush1.bf16.msra.mxu1 %v4473_v27 }
 0x782   :  { %2302 = vmatprep.subr.bf16.mxu0 %v4478_v19  ;;  %2415 = vmatprep.subr.bf16.mxu1 %v4481_v28  ;;  %v8227_v19 = vld [vmem:[#allocation78_spill] sm:$0xff]  ;;  %v8228_v28 = vld [vmem:[#allocation77_spill] sm:$0xff] }
 0x785   :  { %2303 = vmatpush1.bf16.msra.mxu0 %v4476_v39  ;;  %2416 = vmatpush1.bf16.msra.mxu1 %v4479_v29  ;;  %v8229_v39 = vsel %vm5768_vm5, %v8227_v19, %v8228_v28  ;;  %v6651_v19 = vld [vmem:[#allocation8 + $0x80] ss:$16 sps:$4 sm:$0xff]   ;;  %v6655_v28 = vld [vmem:[#allocation8 + $0x64] ss:$16 sps:$4 sm:$0xff]  }
 0x786   :  { %2304 = vmatprep.subr.bf16.mxu0 %v4484_v16  ;;  %2417 = vmatprep.subr.bf16.mxu1 %v4487_v20  ;;  %8232 = vst [vmem:[#allocation50_spill] sm:$0xff] %v6651_v19  ;;  %8233 = vst [vmem:[#allocation55_spill] sm:$0xff] %v6655_v28 }
 0x789   :  { %2305 = vmatpush1.bf16.msra.mxu0 %v4482_v22  ;;  %2418 = vmatpush1.bf16.msra.mxu1 %v4485_v31 }
 0x78a   :  { %2812 = vmatprep.subr.bf16.mxu0 %v6559_v57  ;;  %2855 = vmatprep.subr.bf16.mxu1 %v6562_v15 }
 0x82b   :  { %v1880_v37 = vpop.f32.mrf.mxu0  ;;  %v1923_v56 = vpop.f32.mrf.mxu1 }
 0x82c   :  { %v1932_v3 = vadd.f32 %v1880_v37, %v8210_v44  ;;  %v1934_v40 = vadd.f32 %v1923_v56, %v8220_v25  ;;  %v8231_v25 = vld [vmem:[#allocation80_spill] sm:$0xff] }
 0x82d   :  { %v1882_v8 = vpop.f32.mrf.mxu0  ;;  %v1925_v55 = vpop.f32.mrf.mxu1 }
 0x82e   :  { %v4224_v50 = vmul.f32 -1.442695, %v1932_v3  ;;  %v1933_v62 = vadd.f32 %v1882_v8, %v8213_v52  ;;  %v4226_v41 = vmul.f32 -1.442695, %v1934_v40  ;;  %v1935_v60 = vadd.f32 %v1925_v55, %v8226_v7  ;;  %v6627_v7 = vld [vmem:[#allocation8 + $0xa4] ss:$16 sps:$4 sm:$0xff]  }
 0x82f   :  { %v1884_v48 = vpop.f32.mrf.mxu0  ;;  %v1927_v2 = vpop.f32.mrf.mxu1 }
 0x830   :  { %4768 = vpow2.f32 %v4224_v50  ;;  %v4225_v63 = vmul.f32 -1.442695, %v1933_v62  ;;  %v1936_v38 = vadd.f32 %v1884_v48, %v8214_v35  ;;  %v1938_v53 = vadd.f32 %v1927_v2, %v8223_v30  ;;  %v6605_v2 = vld [vmem:[#allocation8 + $0xe0] ss:$16 sps:$4 sm:$0xff]   ;;  %v6613_v30 = vld [vmem:[#allocation8 + $0xc4] ss:$16 sps:$4 sm:$0xff]  }
 0x831   :  { %v1886_v0 = vpop.f32.mrf.mxu0  ;;  %v1929_v10 = vpop.f32.mrf.mxu1 }
 0x832   :  { %4770 = vpow2.f32 %v4225_v63  ;;  %v4227_v51 = vmul.f32 -1.442695, %v1936_v38  ;;  %v1937_v13 = vadd.f32 %v1886_v0, %v8217_v17  ;;  %v4229_v47 = vmul.f32 -1.442695, %v1938_v53 }
 0x833   :  { %v1939_v29 = vadd.f32 %v1929_v10, %v8229_v39  ;;  %v6635_v10 = vld [vmem:[#allocation8 + $0xa0] ss:$16 sps:$4 sm:$0xff]   ;;  %v6658_v39 = vld [vmem:[#allocation8 + $0x88] ss:$16 sps:$4 sm:$0xff]  }
 0x834   :  { %4772 = vpow2.f32 %v4227_v51  ;;  %v4228_v49 = vmul.f32 -1.442695, %v1937_v13  ;;  %8234 = vst [vmem:[#allocation42_spill] sm:$0xff] %v6658_v39 }
 0x836   :  { %4774 = vpow2.f32 %v4228_v49 }
 0x837   :  { %4776 = vpow2.f32 %v4226_v41  ;;  %v6617_v41 = vld [vmem:[#allocation8 + $0xe8] ss:$16 sps:$4 sm:$0xff]  }
 0x838   :  { %4778 = vtanh.f32 %v1935_v60  ;;  %v6630_v60 = vld [vmem:[#allocation8 + $0xc8] ss:$16 sps:$4 sm:$0xff]  }
 0x83d   :  { %v4769_v46 = vpop.eup %4768 }
 0x83e   :  { %v1958_v59 = vadd.f32 1.0, %v4769_v46  ;;  %v6637_v46 = vld [vmem:[#allocation8 + $0xac] ss:$16 sps:$4 sm:$0xff]  }
 0x83f   :  { %v4771_v27 = vpop.eup %4770 }
 0x840   :  { %4780 = vrcp.f32 %v1958_v59  ;;  %v1959_v16 = vadd.f32 1.0, %v4771_v27  ;;  %v6642_v59 = vld [vmem:[#allocation8 + $0xa8] ss:$16 sps:$4 sm:$0xff]   ;;  %v6646_v27 = vld [vmem:[#allocation8 + $0x8c] ss:$16 sps:$4 sm:$0xff]  }
 0x841   :  { %v4773_v20 = vpop.eup %4772  ;;  %4782 = vpow2.f32 %v4229_v47  ;;  %v6639_v47 = vld [vmem:[#allocation8 + $0x84] ss:$16 sps:$4 sm:$0xff]  }
 0x842   :  { %4784 = vrcp.f32 %v1959_v16  ;;  %v1961_v22 = vadd.f32 1.0, %v4773_v20  ;;  %v6667_v16 = vld [vmem:[#allocation8 + $0x44] ss:$16 sps:$4 sm:$0xff]   ;;  %v6670_v20 = vld [vmem:[#allocation8 + $0x68] ss:$16 sps:$4 sm:$0xff]  }
 0x843   :  { %v4775_v31 = vpop.eup %4774  ;;  %4786 = vtanh.f32 %v1939_v29  ;;  %v6664_v29 = vld [vmem:[#allocation8 + $0x6c] ss:$16 sps:$4 sm:$0xff]   ;;  %8237 = vst [vmem:[#allocation46_spill] sm:$0xff] %v6667_v16  ;;  %8238 = vst [vmem:[#allocation38_spill] sm:$0xff] %v6670_v20 }
 0x844   :  { %4788 = vrcp.f32 %v1961_v22  ;;  %v1962_v37 = vadd.f32 1.0, %v4775_v31  ;;  %v4777_v44 = vpop.eup %4776  ;;  %8236 = vst [vmem:[#allocation40_spill] sm:$0xff] %v6664_v29  ;;  %v6674_v22 = vld [vmem:[#allocation8 + $0x4c] ss:$16 sps:$4 sm:$0xff]   ;;  %v6679_v31 = vld [vmem:[#allocation8 + $0x40] ss:$16 sps:$4 sm:$0xff]  }
 0x845   :  { %v4779_v3 = vpop.eup %4778  ;;  %v1960_v14 = vadd.f32 1.0, %v4777_v44  ;;  %8239 = vst [vmem:[#allocation45_spill] sm:$0xff] %v6674_v22  ;;  %8240 = vst [vmem:[#allocation57_spill] sm:$0xff] %v6679_v31  ;;  %v6686_v44 = vld [vmem:[#allocation8 + $0x48] ss:$16 sps:$4 sm:$0xff]  }
 0x846   :  { %4790 = vrcp.f32 %v1962_v37  ;;  %v6683_v37 = vld [vmem:[#allocation8 + $0x24] ss:$16 sps:$4 sm:$0xff]   ;;  %8242 = vst [vmem:[#allocation61_spill] sm:$0xff] %v6686_v44 }
 0x847   :  { %4792 = vrcp.f32 %v1960_v14  ;;  %8241 = vst [vmem:[#allocation60_spill] sm:$0xff] %v6683_v37  ;;  %v6712_v14 = vld [vmem:[#allocation8 + $0x8] ss:$16 sps:$4 sm:$0xff]  }
 0x848   :  { %8249 = vst [vmem:[#allocation16_spill] sm:$0xff] %v6712_v14 }
 0x84d   :  { %v4781_v8 = vpop.eup %4780 }
 0x84e   :  { %v4783_v50 = vpop.eup %4782  ;;  %v1980_v56 = vmul.f32 %v4781_v8, %v4779_v3  ;;  %v6692_v3 = vld [vmem:[#allocation8 + $0x2c] ss:$16 sps:$4 sm:$0xff]   ;;  %v6696_v8 = vld [vmem:[#allocation8 + $0x4] ss:$16 sps:$4 sm:$0xff]  }
 0x84f   :  { %v4785_v11 = vpop.eup %4784  ;;  %v1963_v0 = vadd.f32 1.0, %v4783_v50  ;;  %8244 = vst [vmem:[#allocation43_spill] sm:$0xff] %v6692_v3  ;;  %8245 = vst [vmem:[#allocation47_spill] sm:$0xff] %v6696_v8  ;;  %v6698_v50 = vld [vmem:[#allocation8 + $0x28] ss:$16 sps:$4 sm:$0xff]  }
 0x850   :  { %v4787_v52 = vpop.eup %4786  ;;  %v1978_v62 = vmul.f32 %v4785_v11, %v6534_v9  ;;  %8246 = vst [vmem:[#allocation52_spill] sm:$0xff] %v6698_v50  ;;  %v6708_v11 = vld [vmem:[#allocation8] ss:$16 sps:$4 sm:$0xff]  }
 0x851   :  { %v4789_v48 = vpop.eup %4788  ;;  %8248 = vst [vmem:[#allocation49_spill] sm:$0xff] %v6708_v11 }
 0x852   :  { %v1982_v63 = vadd.f32 %v1980_v56, %v1978_v62  ;;  %v1981_v35 = vmul.f32 %v4789_v48, %v4787_v52  ;;  %v6702_v56 = vld [vmem:[#allocation8 + $0xc] ss:$16 sps:$4 sm:$0xff]  }
 0x853   :  { %v4791_v38 = vpop.eup %4790  ;;  %8247 = vst [vmem:[#allocation59_spill] sm:$0xff] %v6702_v56 }
 0x854   :  { %4794 = vtanh.f32 %v1982_v63  ;;  %v1979_v55 = vmul.f32 %v4791_v38, %v6538_v33  ;;  %v4793_v1 = vpop.eup %4792 }
 0x855   :  { %4796 = vrcp.f32 %v1963_v0 }
 0x856   :  { %v1983_v51 = vadd.f32 %v1981_v35, %v1979_v55 }
 0x858   :  { %4798 = vtanh.f32 %v1983_v51 }
 0x861   :  { %v4795_v43 = vpop.eup %4794 }
 0x862   :  { %v1986_v17 = vmul.f32 %v4795_v43, %v4793_v1  ;;  %v4797_v13 = vpop.eup %4796 }
 0x864   :  { %v1988_v9 = vsel %vm127_vm2, %v8230_v54, %v1986_v17  ;;  %v2002_v33 = vsel %vm127_vm2, %v1986_v17, %v8230_v54 }
 0x865   :  { %v4799_v49 = vpop.eup %4798 }
 0x866   :  { %v1987_v23 = vmul.f32 %v4799_v49, %v4797_v13 }
 0x868   :  { %v1989_v40 = vsel %vm127_vm2, %v8231_v25, %v1987_v23  ;;  %v2003_v21 = vsel %vm127_vm2, %v1987_v23, %v8231_v25 }
 0x869   :  { %v2036_v58 = vpack.c.bf16 %v1989_v40, %v1988_v9  ;;  %v6615_v53 = vpack.c.bf16 %v2003_v21, %v2002_v33 }
 0x86b   :  { %2323 = vmatmul.mubr.bf16.vlgmr.msra.gmra.mxu0 %v2036_v58  ;;  %2436 = vmatmul.mubr.bf16.vlgmr.msra.gmra.mxu1 %v2036_v58 }
 0x86c   :  { %2813 = vmatpush1.bf16.msra.mxu0 %v6605_v2  ;;  %2332 = vmatprep.mubr.bf16.mxu0 %v8103_v24 }
 0x86d   :  { %2445 = vmatprep.mubr.bf16.mxu1 %v8103_v24  ;;  %2814 = vmatprep.subr.bf16.mxu0 %v6613_v30 }
 0x86e   :  { %2856 = vmatpush1.bf16.msra.mxu1 %v6617_v41 }
 0x86f   :  { %2857 = vmatprep.subr.bf16.mxu1 %v6619_v5 }
 0x870   :  { %2815 = vmatpush1.bf16.msra.mxu0 %v6623_v4 }
 0x871   :  { %2816 = vmatprep.subr.bf16.mxu0 %v6627_v7 }
 0x872   :  { %2858 = vmatpush1.bf16.msra.mxu1 %v6630_v60 }
 0x873   :  { %2333 = vmatmul.mubr.bf16.gmra.mxu0 %v6553_v12  ;;  %2446 = vmatmul.mubr.bf16.gmra.mxu1 %v6553_v12  ;;  %v6662_v12 = vld [vmem:[#allocation8 + $0x60] ss:$16 sps:$4 sm:$0xff]  }
 0x874   :  { %2342 = vmatprep.mubr.bf16.mxu0 %v8103_v24  ;;  %2455 = vmatprep.mubr.bf16.mxu1 %v8103_v24  ;;  %8235 = vst [vmem:[#allocation35_spill] sm:$0xff] %v6662_v12 }
 0x875   :  { %2817 = vmatpush1.bf16.msra.mxu0 %v6635_v10  ;;  %2859 = vmatprep.subr.bf16.mxu1 %v6637_v46 }
 0x876   :  { %2818 = vmatprep.subr.bf16.mxu0 %v6639_v47  ;;  %2860 = vmatpush1.bf16.msra.mxu1 %v6642_v59 }
 0x877   :  { %2861 = vmatprep.subr.bf16.mxu1 %v6646_v27 }
 0x879   :  { %2819 = vmatpush1.bf16.msra.mxu0 %v6651_v19 }
 0x87a   :  { %2820 = vmatprep.subr.bf16.mxu0 %v6655_v28  ;;  %2862 = vmatpush1.bf16.msra.mxu1 %v6658_v39 }
 0x87b   :  { %2343 = vmatmul.mubr.bf16.gmra.mxu0 %v6471_v26  ;;  %2456 = vmatmul.mubr.bf16.gmra.mxu1 %v6471_v26  ;;  %v6690_v26 = vld [vmem:[#allocation8 + $0x20] ss:$16 sps:$4 sm:$0xff]  }
 0x87c   :  { %2352 = vmatprep.mubr.bf16.mxu0 %v8103_v24  ;;  %2465 = vmatprep.mubr.bf16.mxu1 %v8103_v24  ;;  %8243 = vst [vmem:[#allocation62_spill] sm:$0xff] %v6690_v26 }
 0x87d   :  { %2821 = vmatpush1.bf16.msra.mxu0 %v6662_v12  ;;  %2863 = vmatprep.subr.bf16.mxu1 %v6664_v29 }
 0x87e   :  { %2822 = vmatprep.subr.bf16.mxu0 %v6667_v16  ;;  %2864 = vmatpush1.bf16.msra.mxu1 %v6670_v20 }
 0x87f   :  { %2865 = vmatprep.subr.bf16.mxu1 %v6674_v22 }
 0x881   :  { %2823 = vmatpush1.bf16.msra.mxu0 %v6679_v31 }
 0x882   :  { %2824 = vmatprep.subr.bf16.mxu0 %v6683_v37  ;;  %2866 = vmatpush1.bf16.msra.mxu1 %v6686_v44 }
 0x883   :  { %2353 = vmatmul.mubr.bf16.gmra.mxu0 %v6381_v45  ;;  %2466 = vmatmul.mubr.bf16.gmra.mxu1 %v6381_v45  ;;  %v2108_v45 = vld [vmem:[%s7819_s6] sm:$0xf] }
 0x884   :  { %2362 = vmatprep.mubr.bf16.mxu0 %v8103_v24  ;;  %2475 = vmatprep.mubr.bf16.mxu1 %v8103_v24 }
 0x885   :  { %2825 = vmatpush1.bf16.msra.mxu0 %v6690_v26  ;;  %2867 = vmatprep.subr.bf16.mxu1 %v6692_v3 }
 0x886   :  { %2826 = vmatprep.subr.bf16.mxu0 %v6696_v8  ;;  %2868 = vmatpush1.bf16.msra.mxu1 %v6698_v50 }
 0x887   :  { %2869 = vmatprep.subr.bf16.mxu1 %v6702_v56 }
 0x889   :  { %2827 = vmatpush1.bf16.msra.mxu0 %v6708_v11 }
 0x88a   :  { %2870 = vmatpush1.bf16.msra.mxu1 %v6712_v14  ;;  %2963 = vmatprep.subr.bf16.mxu0 %v6559_v57 }
 0x88b   :  { %2363 = vmatmul.mubr.bf16.gmra.mxu0 %v6383_v42  ;;  %2476 = vmatmul.mubr.bf16.gmra.mxu1 %v6383_v42  ;;  %v8250_v42 = vld [vmem:[#allocation11_spill] sm:$0xff] }
 0x88c   :  { %2372 = vmatprep.mubr.bf16.mxu0 %v8103_v24  ;;  %2485 = vmatprep.mubr.bf16.mxu1 %v8103_v24  ;;  %v8252_v52 = vsub.s32 2, %v8250_v42  ;;  %v8253_v48 = vsub.s32 1, %v8250_v42  ;;  %v8254_v35 = vsub.s32 3, %v8250_v42 }
 0x88d   :  { %3006 = vmatprep.subr.bf16.mxu1 %v6562_v15 }
 0x88e   :  { %v6780_v62 = vrot.slane %v2108_v45, %v8252_v52  ;;  %v6784_v63 = vrot.slane %v2108_v45, %v8253_v48  ;;  %v6788_v38 = vrot.slane %v2108_v45, %v8254_v35 }
 0x893   :  { %2373 = vmatmul.mubr.bf16.gmra.mxu0 %v6473_v18  ;;  %2486 = vmatmul.mubr.bf16.gmra.mxu1 %v6473_v18  ;;  %v8251_v18 = vsub.s32 0, %v8250_v42 }
 0x894   :  { %2382 = vmatprep.mubr.bf16.mxu0 %v8103_v24  ;;  %2495 = vmatprep.mubr.bf16.mxu1 %v8103_v24 }
 0x89b   :  { %2383 = vmatmul.mubr.bf16.gmra.mxu0 %v6555_v36  ;;  %2496 = vmatmul.mubr.bf16.gmra.mxu1 %v6555_v36  ;;  %v6776_v36 = vrot.slane %v2108_v45, %v8251_v18 }
 0x89c   :  { %2392 = vmatprep.mubr.bf16.mxu0 %v8103_v24  ;;  %2505 = vmatprep.mubr.bf16.mxu1 %v8103_v24 }
 0x8a3   :  { %2393 = vmatmul.mubr.bf16.gmra.mxu0 %v6615_v53  ;;  %2506 = vmatmul.mubr.bf16.gmra.mxu1 %v6615_v53 }
 0x8a4   :  { %2844 = vmatprep.mubr.bf16.mxu0 %v8103_v24  ;;  %2887 = vmatprep.mubr.bf16.mxu1 %v8103_v24 }
 0x8ab   :  { %2845 = vmatmul.mubr.bf16.vlgmr.msra.gmra.mxu0 %v8103_v24  ;;  %2888 = vmatmul.mubr.bf16.vlgmr.msra.gmra.mxu1 %v8103_v24 }
 0x8ac   :  { %2964 = vmatpush1.bf16.msra.mxu0 %v6605_v2  ;;  %3007 = vmatpush1.bf16.msra.mxu1 %v6617_v41 }
 0x8ad   :  { %2965 = vmatprep.subr.bf16.mxu0 %v6613_v30  ;;  %3008 = vmatprep.subr.bf16.mxu1 %v6619_v5 }
 0x8ae   :  { %2995 = vmatprep.mubr.bf16.mxu0 %v8103_v24  ;;  %3038 = vmatprep.mubr.bf16.mxu1 %v8103_v24 }
 0x8b0   :  { %2966 = vmatpush1.bf16.msra.mxu0 %v6623_v4  ;;  %3009 = vmatpush1.bf16.msra.mxu1 %v6630_v60 }
 0x8b1   :  { %2967 = vmatprep.subr.bf16.mxu0 %v6627_v7  ;;  %3010 = vmatprep.subr.bf16.mxu1 %v6637_v46 }
 0x8b4   :  { %2968 = vmatpush1.bf16.msra.mxu0 %v6635_v10  ;;  %3011 = vmatpush1.bf16.msra.mxu1 %v6642_v59 }
 0x8b5   :  { %2969 = vmatprep.subr.bf16.mxu0 %v6639_v47  ;;  %3012 = vmatprep.subr.bf16.mxu1 %v6646_v27 }
 0x8b8   :  { %2970 = vmatpush1.bf16.msra.mxu0 %v6651_v19  ;;  %3013 = vmatpush1.bf16.msra.mxu1 %v6658_v39 }
 0x8b9   :  { %2971 = vmatprep.subr.bf16.mxu0 %v6655_v28  ;;  %3014 = vmatprep.subr.bf16.mxu1 %v6664_v29 }
 0x8bc   :  { %2972 = vmatpush1.bf16.msra.mxu0 %v6662_v12  ;;  %3015 = vmatpush1.bf16.msra.mxu1 %v6670_v20 }
 0x8bd   :  { %2973 = vmatprep.subr.bf16.mxu0 %v6667_v16  ;;  %3016 = vmatprep.subr.bf16.mxu1 %v6674_v22 }
 0x8c0   :  { %2974 = vmatpush1.bf16.msra.mxu0 %v6679_v31  ;;  %3017 = vmatpush1.bf16.msra.mxu1 %v6686_v44 }
 0x8c1   :  { %2975 = vmatprep.subr.bf16.mxu0 %v6683_v37  ;;  %3018 = vmatprep.subr.bf16.mxu1 %v6692_v3 }
 0x8c4   :  { %2976 = vmatpush1.bf16.msra.mxu0 %v6690_v26  ;;  %3019 = vmatpush1.bf16.msra.mxu1 %v6698_v50 }
 0x8c5   :  { %2977 = vmatprep.subr.bf16.mxu0 %v6696_v8  ;;  %3020 = vmatprep.subr.bf16.mxu1 %v6702_v56 }
 0x8c8   :  { %2978 = vmatpush1.bf16.msra.mxu0 %v6708_v11  ;;  %3021 = vmatpush1.bf16.msra.mxu1 %v6712_v14 }
 0x8c9   :  { %3114 = vmatprep.subr.bf16.mxu0 %v6559_v57  ;;  %3157 = vmatprep.subr.bf16.mxu1 %v6562_v15 }
 0x92b   :  { %v2324_v0 = vpop.f32.mrf.mxu0  ;;  %v2437_v55 = vpop.f32.mrf.mxu1 }
 0x92c   :  { %v6791_v51 = vadd.f32 %v2324_v0, %v6776_v36  ;;  %v6794_v1 = vadd.f32 %v2437_v55, %v6780_v62 }
 0x92d   :  { %v2326_v43 = vpop.f32.mrf.mxu0  ;;  %v2439_v17 = vpop.f32.mrf.mxu1 }
 0x92e   :  { %8255 = vst [vmem:[#allocation51_spill] sm:$0xff] %v6794_v1  ;;  %v6797_v13 = vadd.f32 %v2326_v43, %v6784_v63  ;;  %v6800_v49 = vadd.f32 %v2439_v17, %v6788_v38 }
 0x92f   :  { %v6802_v23 = vpop.f32.mrf.mxu0  ;;  %v6804_v54 = vpop.f32.mrf.mxu1 }
 0x930   :  { %8256 = vst [vmem:[#allocation48_spill] sm:$0xff] %v6797_v13  ;;  %8257 = vst [vmem:[#allocation32_spill] sm:$0xff] %v6800_v49 }
 0x931   :  { %v6806_v9 = vpop.f32.mrf.mxu0  ;;  %v6808_v25 = vpop.f32.mrf.mxu1 }
 0x933   :  { %v2334_v40 = vpop.f32.mrf.mxu0  ;;  %v2447_v33 = vpop.f32.mrf.mxu1 }
 0x934   :  { %v6811_v21 = vadd.f32 %v2334_v40, %v6776_v36  ;;  %v6814_v58 = vadd.f32 %v2447_v33, %v6780_v62 }
 0x935   :  { %v2336_v53 = vpop.f32.mrf.mxu0  ;;  %v2449_v45 = vpop.f32.mrf.mxu1 }
 0x936   :  { %8258 = vst [vmem:[#allocation56_spill] sm:$0xff] %v6814_v58  ;;  %v6817_v42 = vadd.f32 %v2336_v53, %v6784_v63  ;;  %v6820_v18 = vadd.f32 %v2449_v45, %v6788_v38 }
 0x937   :  { %v2338_v52 = vpop.f32.mrf.mxu0  ;;  %v2451_v48 = vpop.f32.mrf.mxu1 }
 0x938   :  { %8259 = vst [vmem:[#allocation54_spill] sm:$0xff] %v6817_v42  ;;  %8260 = vst [vmem:[#allocation53_spill] sm:$0xff] %v6820_v18  ;;  %v6823_v35 = vadd.f32 %v2338_v52, %v6776_v36  ;;  %v6826_v0 = vadd.f32 %v2451_v48, %v6780_v62 }
 0x939   :  { %v2340_v55 = vpop.f32.mrf.mxu0  ;;  %v2453_v43 = vpop.f32.mrf.mxu1 }
 0x93a   :  { %8261 = vst [vmem:[#allocation63_spill] sm:$0xff] %v6826_v0  ;;  %v6829_v17 = vadd.f32 %v2340_v55, %v6784_v63  ;;  %v6832_v40 = vadd.f32 %v2453_v43, %v6788_v38 }
 0x93b   :  { %v2344_v33 = vpop.f32.mrf.mxu0  ;;  %v2457_v53 = vpop.f32.mrf.mxu1 }
 0x93c   :  { %8262 = vst [vmem:[#allocation39_spill] sm:$0xff] %v6829_v17  ;;  %8263 = vst [vmem:[#allocation65_spill] sm:$0xff] %v6832_v40  ;;  %v6835_v45 = vadd.f32 %v2344_v33, %v6776_v36  ;;  %v6838_v15 = vadd.f32 %v2457_v53, %v6780_v62 }
 0x93d   :  { %v2346_v52 = vpop.f32.mrf.mxu0  ;;  %v2459_v57 = vpop.f32.mrf.mxu1 }
 0x93e   :  { %8264 = vst [vmem:[#allocation44_spill] sm:$0xff] %v6838_v15  ;;  %v6841_v48 = vadd.f32 %v2346_v52, %v6784_v63  ;;  %v6844_v14 = vadd.f32 %v2459_v57, %v6788_v38 }
 0x93f   :  { %v2348_v55 = vpop.f32.mrf.mxu0  ;;  %v2461_v11 = vpop.f32.mrf.mxu1 }
 0x940   :  { %8265 = vst [vmem:[#allocation64_spill] sm:$0xff] %v6841_v48  ;;  %8266 = vst [vmem:[#allocation41_spill] sm:$0xff] %v6844_v14  ;;  %v6847_v43 = vadd.f32 %v2348_v55, %v6776_v36  ;;  %v6850_v56 = vadd.f32 %v2461_v11, %v6780_v62 }
 0x941   :  { %v2350_v33 = vpop.f32.mrf.mxu0  ;;  %v2463_v8 = vpop.f32.mrf.mxu1 }
 0x942   :  { %8267 = vst [vmem:[#allocation67_spill] sm:$0xff] %v6850_v56  ;;  %v6853_v53 = vadd.f32 %v2350_v33, %v6784_v63  ;;  %v6856_v50 = vadd.f32 %v2463_v8, %v6788_v38 }
 0x943   :  { %v2354_v52 = vpop.f32.mrf.mxu0  ;;  %v2467_v26 = vpop.f32.mrf.mxu1 }
 0x944   :  { %8268 = vst [vmem:[#allocation66_spill] sm:$0xff] %v6853_v53  ;;  %8269 = vst [vmem:[#allocation13_spill] sm:$0xff] %v6856_v50  ;;  %v2355_v57 = vadd.f32 %v2354_v52, %v6776_v36  ;;  %v6860_v3 = vadd.f32 %v2467_v26, %v6780_v62 }
 0x945   :  { %v2356_v55 = vpop.f32.mrf.mxu0  ;;  %v2469_v37 = vpop.f32.mrf.mxu1 }
 0x946   :  { %8270 = vst [vmem:[#allocation15_spill] sm:$0xff] %v6860_v3  ;;  %v6863_v11 = vadd.f32 %v2356_v55, %v6784_v63  ;;  %v6866_v44 = vadd.f32 %v2469_v37, %v6788_v38 }
 0x947   :  { %v2358_v33 = vpop.f32.mrf.mxu0  ;;  %v2471_v31 = vpop.f32.mrf.mxu1 }
 0x948   :  { %8271 = vst [vmem:[#allocation22_spill] sm:$0xff] %v6863_v11  ;;  %8272 = vst [vmem:[#allocation17_spill] sm:$0xff] %v6866_v44  ;;  %v2359_v8 = vadd.f32 %v2358_v33, %v6776_v36  ;;  %v6870_v22 = vadd.f32 %v2471_v31, %v6780_v62 }
 0x949   :  { %v2360_v16 = vpop.f32.mrf.mxu0  ;;  %v2473_v52 = vpop.f32.mrf.mxu1 }
 0x94a   :  { %8273 = vst [vmem:[#allocation19_spill] sm:$0xff] %v6870_v22  ;;  %v6873_v26 = vadd.f32 %v2360_v16, %v6784_v63  ;;  %v6876_v20 = vadd.f32 %v2473_v52, %v6788_v38 }
 0x94b   :  { %v2364_v55 = vpop.f32.mrf.mxu0  ;;  %v2477_v12 = vpop.f32.mrf.mxu1 }
 0x94c   :  { %8274 = vst [vmem:[#allocation29_spill] sm:$0xff] %v6873_v26  ;;  %8275 = vst [vmem:[#allocation28_spill] sm:$0xff] %v6876_v20  ;;  %v2365_v37 = vadd.f32 %v2364_v55, %v6776_v36  ;;  %v6880_v29 = vadd.f32 %v2477_v12, %v6780_v62 }
 0x94d   :  { %v2366_v28 = vpop.f32.mrf.mxu0  ;;  %v2479_v33 = vpop.f32.mrf.mxu1 }
 0x94e   :  { %8276 = vst [vmem:[#allocation25_spill] sm:$0xff] %v6880_v29  ;;  %v6883_v31 = vadd.f32 %v2366_v28, %v6784_v63  ;;  %v6886_v39 = vadd.f32 %v2479_v33, %v6788_v38  ;;  %v6890_v16 = vsel %vm127_vm2, %v2355_v57, %v2365_v37  ;;  %v6898_v19 = vsel %vm127_vm2, %v2365_v37, %v2355_v57 }
 0x94f   :  { %8279 = vst [vmem:[#allocation70_spill] sm:$0xff] %v6890_v16  ;;  %v2368_v55 = vpop.f32.mrf.mxu0  ;;  %v2481_v12 = vpop.f32.mrf.mxu1  ;;  %8280 = vst [vmem:[#allocation37_spill] sm:$0xff] %v6898_v19 }
 0x950   :  { %8277 = vst [vmem:[#allocation68_spill] sm:$0xff] %v6883_v31  ;;  %8278 = vst [vmem:[#allocation34_spill] sm:$0xff] %v6886_v39  ;;  %v2369_v33 = vadd.f32 %v2368_v55, %v6776_v36  ;;  %v6906_v16 = vadd.f32 %v2481_v12, %v6780_v62 }
 0x951   :  { %v2370_v37 = vpop.f32.mrf.mxu0  ;;  %v2483_v19 = vpop.f32.mrf.mxu1 }
 0x952   :  { %8281 = vst [vmem:[#allocation69_spill] sm:$0xff] %v6906_v16  ;;  %v6925_v28 = vadd.f32 %v2370_v37, %v6784_v63  ;;  %v6928_v52 = vadd.f32 %v2483_v19, %v6788_v38  ;;  %v6932_v57 = vsel %vm127_vm2, %v2359_v8, %v2369_v33  ;;  %v6940_v12 = vsel %vm127_vm2, %v2369_v33, %v2359_v8 }
 0x953   :  { %8284 = vst [vmem:[#allocation71_spill] sm:$0xff] %v6932_v57  ;;  %v2374_v29 = vpop.f32.mrf.mxu0  ;;  %v2487_v3 = vpop.f32.mrf.mxu1  ;;  %8285 = vst [vmem:[#allocation12_spill] sm:$0xff] %v6940_v12 }
 0x954   :  { %8282 = vst [vmem:[#allocation36_spill] sm:$0xff] %v6925_v28  ;;  %8283 = vst [vmem:[#allocation72_spill] sm:$0xff] %v6928_v52  ;;  %v2375_v37 = vadd.f32 %v2374_v29, %v6776_v36  ;;  %v6948_v39 = vadd.f32 %v2487_v3, %v6780_v62 }
 0x955   :  { %v2376_v33 = vpop.f32.mrf.mxu0  ;;  %v2489_v12 = vpop.f32.mrf.mxu1 }
 0x956   :  { %8286 = vst [vmem:[#allocation14_spill] sm:$0xff] %v6948_v39  ;;  %v6967_v19 = vadd.f32 %v2376_v33, %v6784_v63  ;;  %v6970_v55 = vadd.f32 %v2489_v12, %v6788_v38  ;;  %v6975_v8 = vsel %vm127_vm2, %v6835_v45, %v2375_v37  ;;  %v6984_v33 = vsel %vm127_vm2, %v2375_v37, %v6835_v45 }
 0x957   :  { %v2378_v44 = vpop.f32.mrf.mxu0  ;;  %v2491_v16 = vpop.f32.mrf.mxu1  ;;  %8289 = vst [vmem:[#allocation18_spill] sm:$0xff] %v6984_v33 }
 0x958   :  { %8287 = vst [vmem:[#allocation23_spill] sm:$0xff] %v6967_v19  ;;  %8288 = vst [vmem:[#allocation20_spill] sm:$0xff] %v6970_v55  ;;  %v2379_v3 = vadd.f32 %v2378_v44, %v6776_v36  ;;  %v6992_v52 = vadd.f32 %v2491_v16, %v6780_v62 }
 0x959   :  { %v2380_v37 = vpop.f32.mrf.mxu0  ;;  %v2493_v33 = vpop.f32.mrf.mxu1 }
 0x95a   :  { %8290 = vst [vmem:[#allocation30_spill] sm:$0xff] %v6992_v52  ;;  %v7011_v12 = vadd.f32 %v2380_v37, %v6784_v63  ;;  %v7014_v29 = vadd.f32 %v2493_v33, %v6788_v38  ;;  %v7019_v45 = vsel %vm127_vm2, %v6847_v43, %v2379_v3  ;;  %v7028_v37 = vsel %vm127_vm2, %v2379_v3, %v6847_v43 }
 0x95b   :  { %8293 = vst [vmem:[#allocation73_spill] sm:$0xff] %v7019_v45  ;;  %v2384_v20 = vpop.f32.mrf.mxu0  ;;  %v2497_v22 = vpop.f32.mrf.mxu1  ;;  %8294 = vst [vmem:[#allocation31_spill] sm:$0xff] %v7028_v37 }
 0x95c   :  { %8291 = vst [vmem:[#allocation26_spill] sm:$0xff] %v7011_v12  ;;  %8292 = vst [vmem:[#allocation24_spill] sm:$0xff] %v7014_v29  ;;  %v2385_v16 = vadd.f32 %v2384_v20, %v6776_v36  ;;  %v7036_v28 = vadd.f32 %v2497_v22, %v6780_v62 }
 0x95d   :  { %v2386_v3 = vpop.f32.mrf.mxu0  ;;  %v2499_v37 = vpop.f32.mrf.mxu1 }
 0x95e   :  { %8295 = vst [vmem:[#allocation76_spill] sm:$0xff] %v7036_v28  ;;  %v7055_v33 = vadd.f32 %v2386_v3, %v6784_v63  ;;  %v7058_v44 = vadd.f32 %v2499_v37, %v6788_v38  ;;  %v7063_v43 = vsel %vm127_vm2, %v6811_v21, %v2385_v16  ;;  %v7072_v3 = vsel %vm127_vm2, %v2385_v16, %v6811_v21 }
 0x95f   :  { %v2388_v26 = vpop.f32.mrf.mxu0  ;;  %v2501_v57 = vpop.f32.mrf.mxu1  ;;  %8298 = vst [vmem:[#allocation33_spill] sm:$0xff] %v7072_v3 }
 0x960   :  { %8296 = vst [vmem:[#allocation75_spill] sm:$0xff] %v7055_v33  ;;  %8297 = vst [vmem:[#allocation74_spill] sm:$0xff] %v7058_v44  ;;  %v2389_v22 = vadd.f32 %v2388_v26, %v6776_v36  ;;  %v7080_v31 = vadd.f32 %v2501_v57, %v6780_v62  ;;  %v8334_v15 = vsel %vm5525_vm3, %v6817_v42, %v7055_v33  ;;  %v8363_v42 = vld [vmem:[#allocation71_spill] sm:$0xff] }
 0x961   :  { %v2390_v16 = vpop.f32.mrf.mxu0  ;;  %v2503_v3 = vpop.f32.mrf.mxu1 }
 0x962   :  { %8299 = vst [vmem:[#allocation78_spill] sm:$0xff] %v7080_v31  ;;  %v7099_v37 = vadd.f32 %v2390_v16, %v6784_v63  ;;  %v7102_v20 = vadd.f32 %v2503_v3, %v6788_v38  ;;  %v7107_v21 = vsel %vm127_vm2, %v6823_v35, %v2389_v22  ;;  %v7116_v16 = vsel %vm127_vm2, %v2389_v22, %v6823_v35 }
 0x963   :  { %v2394_v11 = vpop.f32.mrf.mxu0  ;;  %v2507_v29 = vpop.f32.mrf.mxu1  ;;  %8302 = vst [vmem:[#allocation80_spill] sm:$0xff] %v7116_v16 }
 0x964   :  { %8300 = vst [vmem:[#allocation77_spill] sm:$0xff] %v7099_v37  ;;  %8301 = vst [vmem:[#allocation79_spill] sm:$0xff] %v7102_v20  ;;  %v2395_v57 = vadd.f32 %v2394_v11, %v6776_v36  ;;  %v7124_v50 = vadd.f32 %v2507_v29, %v6780_v62 }
 0x965   :  { %v2396_v22 = vpop.f32.mrf.mxu0  ;;  %v2509_v16 = vpop.f32.mrf.mxu1 }
 0x966   :  { %8303 = vst [vmem:[#allocation11_spill] sm:$0xff] %v7124_v50  ;;  %v7143_v3 = vadd.f32 %v2396_v22, %v6784_v63  ;;  %v7146_v26 = vadd.f32 %v2509_v16, %v6788_v38  ;;  %v2516_v35 = vsel %vm127_vm2, %v6791_v51, %v2395_v57  ;;  %v2518_v11 = vsel %vm5753_vm4, %v6794_v1, %v7124_v50 }
 0x967   :  { %v2398_v55 = vpop.f32.mrf.mxu0  ;;  %v2511_v14 = vpop.f32.mrf.mxu1  ;;  %v7158_v29 = vsel %vm127_vm2, %v2395_v57, %v6791_v51  ;;  %v2329_v57 = vadd.f32 %v6802_v23, %v6776_v36  ;;  %v7180_v16 = vadd.f32 %v6804_v54, %v6780_v62  ;;  %v7202_v23 = vadd.f32 %v6808_v25, %v6788_v38 }
 0x968   :  { %8304 = vst [vmem:[#allocation81_spill] sm:$0xff] %v7143_v3  ;;  %8305 = vst [vmem:[#allocation82_spill] sm:$0xff] %v7146_v26  ;;  %v2399_v22 = vadd.f32 %v2398_v55, %v6776_v36  ;;  %v7166_v52 = vadd.f32 %v2511_v14, %v6780_v62  ;;  %v2517_v56 = vsel %vm5525_vm3, %v6797_v13, %v7143_v3 }
 0x969   :  { %8306 = vst [vmem:[#allocation83_spill] sm:$0xff] %v7158_v29  ;;  %v2519_v51 = vsel %vm5768_vm5, %v6800_v49, %v7146_v26  ;;  %8308 = vst [vmem:[#allocation85_spill] sm:$0xff] %v7180_v16  ;;  %v2400_v55 = vpop.f32.mrf.mxu0  ;;  %v2513_v14 = vpop.f32.mrf.mxu1  ;;  %v7198_v62 = vadd.f32 %v6806_v9, %v6784_v63 }
 0x96a   :  { %8307 = vst [vmem:[#allocation84_spill] sm:$0xff] %v7166_v52  ;;  %v7191_v29 = vadd.f32 %v2400_v55, %v6784_v63  ;;  %v7194_v36 = vadd.f32 %v2513_v14, %v6788_v38  ;;  %8312 = vst [vmem:[#allocation89_spill] sm:$0xff] %v7202_v23  ;;  %v7206_v1 = vsel %vm127_vm2, %v2399_v22, %v2329_v57 }
 0x96b   :  { %8311 = vst [vmem:[#allocation88_spill] sm:$0xff] %v7198_v62  ;;  %v2846_v54 = vpop.f32.mrf.mxu0  ;;  %8313 = vst [vmem:[#allocation90_spill] sm:$0xff] %v7206_v1  ;;  %v2889_v25 = vpop.f32.mrf.mxu1  ;;  %v2520_v26 = vsel %vm127_vm2, %v2329_v57, %v2399_v22  ;;  %v2522_v6 = vsel %vm5753_vm4, %v7180_v16, %v7166_v52 }
 0x96c   :  { %8309 = vst [vmem:[#allocation86_spill] sm:$0xff] %v7191_v29  ;;  %8310 = vst [vmem:[#allocation87_spill] sm:$0xff] %v7194_v36  ;;  %v2898_v14 = vadd.f32 %v2846_v54, %v2516_v35  ;;  %v2521_v55 = vsel %vm5525_vm3, %v7198_v62, %v7191_v29 }
 0x96d   :  { %v2848_v50 = vpop.f32.mrf.mxu0  ;;  %v2891_v13 = vpop.f32.mrf.mxu1 }
 0x96e   :  { %v4294_v9 = vmul.f32 -1.442695, %v2898_v14  ;;  %v2899_v49 = vadd.f32 %v2848_v50, %v2517_v56  ;;  %v2900_v50 = vadd.f32 %v2889_v25, %v2518_v11 }
 0x96f   :  { %v2850_v1 = vpop.f32.mrf.mxu0  ;;  %v2893_v56 = vpop.f32.mrf.mxu1 }
 0x970   :  { %4800 = vpow2.f32 %v4294_v9  ;;  %v4295_v35 = vmul.f32 -1.442695, %v2899_v49  ;;  %v2902_v54 = vadd.f32 %v2850_v1, %v2520_v26  ;;  %v2904_v1 = vadd.f32 %v2893_v56, %v2522_v6 }
 0x971   :  { %v2852_v63 = vpop.f32.mrf.mxu0  ;;  %v4296_v49 = vmul.f32 -1.442695, %v2900_v50  ;;  %v2901_v26 = vadd.f32 %v2891_v13, %v2519_v51  ;;  %v2895_v22 = vpop.f32.mrf.mxu1 }
 0x972   :  { %4802 = vpow2.f32 %v4295_v35  ;;  %v4297_v3 = vmul.f32 -1.442695, %v2902_v54  ;;  %v2903_v38 = vadd.f32 %v2852_v63, %v2521_v55  ;;  %v4299_v9 = vmul.f32 -1.442695, %v2904_v1 }
 0x973   :  { %v8448_v32 = vld [vmem:[#allocation87_spill] sm:$0xff] }
 0x974   :  { %4804 = vpow2.f32 %v4297_v3  ;;  %v4298_v14 = vmul.f32 -1.442695, %v2903_v38  ;;  %v2523_v3 = vsel %vm5768_vm5, %v7202_v23, %v7194_v36  ;;  %v8332_v23 = vld [vmem:[#allocation21_spill] sm:$0xff]  ;;  %v8333_v36 = vld [vmem:[#allocation27_spill] sm:$0xff] }
 0x975   :  { %v2905_v55 = vadd.f32 %v2895_v22, %v2523_v3 }
 0x976   :  { %4806 = vpow2.f32 %v4298_v14 }
 0x977   :  { %4808 = vpow2.f32 %v4296_v49 }
 0x978   :  { %4810 = vtanh.f32 %v2901_v26 }
 0x97d   :  { %v4801_v57 = vpop.eup %4800 }
 0x97e   :  { %v2924_v35 = vadd.f32 1.0, %v4801_v57 }
 0x97f   :  { %v4803_v11 = vpop.eup %4802 }
 0x980   :  { %4812 = vrcp.f32 %v2924_v35  ;;  %v2925_v63 = vadd.f32 1.0, %v4803_v11 }
 0x981   :  { %v4805_v38 = vpop.eup %4804  ;;  %4814 = vpow2.f32 %v4299_v9 }
 0x982   :  { %4816 = vrcp.f32 %v2925_v63  ;;  %v2927_v25 = vadd.f32 1.0, %v4805_v38 }
 0x983   :  { %v4807_v13 = vpop.eup %4806  ;;  %4818 = vtanh.f32 %v2905_v55 }
 0x984   :  { %4820 = vrcp.f32 %v2927_v25  ;;  %v2928_v51 = vadd.f32 1.0, %v4807_v13  ;;  %v4809_v54 = vpop.eup %4808 }
 0x985   :  { %v4811_v14 = vpop.eup %4810  ;;  %v2926_v57 = vadd.f32 1.0, %v4809_v54 }
 0x986   :  { %4822 = vrcp.f32 %v2928_v51 }
 0x987   :  { %4824 = vrcp.f32 %v2926_v57  ;;  %v8320_v57 = vld [vmem:[#allocation46_spill] sm:$0xff] }
 0x98d   :  { %v4813_v50 = vpop.eup %4812 }
 0x98e   :  { %v4815_v56 = vpop.eup %4814  ;;  %v2946_v6 = vmul.f32 %v4813_v50, %v4811_v14 }
 0x98f   :  { %v4817_v1 = vpop.eup %4816  ;;  %v2929_v11 = vadd.f32 1.0, %v4815_v56  ;;  %v8314_v56 = vld [vmem:[#allocation50_spill] sm:$0xff] }
 0x990   :  { %v4819_v49 = vpop.eup %4818  ;;  %v2944_v26 = vmul.f32 0.0, %v4817_v1  ;;  %v8316_v1 = vld [vmem:[#allocation55_spill] sm:$0xff] }
 0x991   :  { %v4821_v22 = vpop.eup %4820 }
 0x992   :  { %v7234_v35 = vadd.f32 %v2946_v6, %v2944_v26  ;;  %v2947_v9 = vmul.f32 %v4821_v22, %v4819_v49  ;;  %v8315_v6 = vld [vmem:[#allocation42_spill] sm:$0xff]  ;;  %v8317_v49 = vld [vmem:[#allocation40_spill] sm:$0xff]  ;;  %v8318_v26 = vld [vmem:[#allocation35_spill] sm:$0xff] }
 0x993   :  { %v4823_v3 = vpop.eup %4822  ;;  %v8319_v22 = vld [vmem:[#allocation38_spill] sm:$0xff] }
 0x994   :  { %v2945_v63 = vmul.f32 0.0, %v4823_v3  ;;  %4826 = vtanh.f32 %v7234_v35  ;;  %v4825_v38 = vpop.eup %4824  ;;  %v8322_v3 = vld [vmem:[#allocation57_spill] sm:$0xff] }
 0x995   :  { %4828 = vrcp.f32 %v2929_v11  ;;  %v8323_v11 = vld [vmem:[#allocation61_spill] sm:$0xff] }
 0x996   :  { %v7237_v55 = vadd.f32 %v2947_v9, %v2945_v63  ;;  %v8321_v9 = vld [vmem:[#allocation45_spill] sm:$0xff]  ;;  %v8324_v63 = vld [vmem:[#allocation60_spill] sm:$0xff] }
 0x998   :  { %4830 = vtanh.f32 %v7237_v55 }
 0x9a1   :  { %v4827_v25 = vpop.eup %4826 }
 0x9a2   :  { %v4829_v13 = vpop.eup %4828  ;;  %v2952_v14 = vmul.f32 %v4827_v25, %v4825_v38  ;;  %v8325_v38 = vld [vmem:[#allocation43_spill] sm:$0xff]  ;;  %v8326_v25 = vld [vmem:[#allocation62_spill] sm:$0xff] }
 0x9a5   :  { %v4831_v51 = vpop.eup %4830 }
 0x9a6   :  { %v2953_v54 = vmul.f32 %v4831_v51, %v4829_v13  ;;  %v8327_v13 = vld [vmem:[#allocation52_spill] sm:$0xff]  ;;  %v8328_v51 = vld [vmem:[#allocation47_spill] sm:$0xff] }
 0x9a8   :  { %v2962_v50 = vpack.c.bf16 %v2953_v54, %v2952_v14  ;;  %v8329_v14 = vld [vmem:[#allocation59_spill] sm:$0xff]  ;;  %v8330_v54 = vld [vmem:[#allocation49_spill] sm:$0xff] }
 0x9aa   :  { %2996 = vmatmul.mubr.bf16.vlgmr.msra.gmra.mxu0 %v2962_v50  ;;  %3039 = vmatmul.mubr.bf16.vlgmr.msra.gmra.mxu1 %v2962_v50  ;;  %v8331_v50 = vld [vmem:[#allocation16_spill] sm:$0xff] }
 0x9ab   :  { %3115 = vmatpush1.bf16.msra.mxu0 %v6605_v2  ;;  %3158 = vmatpush1.bf16.msra.mxu1 %v6617_v41 }
 0x9ac   :  { %3116 = vmatprep.subr.bf16.mxu0 %v6613_v30  ;;  %3159 = vmatprep.subr.bf16.mxu1 %v6619_v5 }
 0x9ad   :  { %3146 = vmatprep.mubr.bf16.mxu0 %v8103_v24  ;;  %3189 = vmatprep.mubr.bf16.mxu1 %v8103_v24 }
 0x9af   :  { %3117 = vmatpush1.bf16.msra.mxu0 %v6623_v4  ;;  %3160 = vmatpush1.bf16.msra.mxu1 %v6630_v60 }
 0x9b0   :  { %3118 = vmatprep.subr.bf16.mxu0 %v6627_v7  ;;  %3161 = vmatprep.subr.bf16.mxu1 %v6637_v46 }
 0x9b3   :  { %3119 = vmatpush1.bf16.msra.mxu0 %v6635_v10  ;;  %3162 = vmatpush1.bf16.msra.mxu1 %v6642_v59 }
 0x9b4   :  { %3120 = vmatprep.subr.bf16.mxu0 %v6639_v47  ;;  %3163 = vmatprep.subr.bf16.mxu1 %v6646_v27 }
 0x9b7   :  { %3121 = vmatpush1.bf16.msra.mxu0 %v8314_v56  ;;  %3164 = vmatpush1.bf16.msra.mxu1 %v8315_v6 }
 0x9b8   :  { %3122 = vmatprep.subr.bf16.mxu0 %v8316_v1  ;;  %3165 = vmatprep.subr.bf16.mxu1 %v8317_v49 }
 0x9bb   :  { %3123 = vmatpush1.bf16.msra.mxu0 %v8318_v26  ;;  %3166 = vmatpush1.bf16.msra.mxu1 %v8319_v22 }
 0x9bc   :  { %3124 = vmatprep.subr.bf16.mxu0 %v8320_v57  ;;  %3167 = vmatprep.subr.bf16.mxu1 %v8321_v9 }
 0x9bf   :  { %3125 = vmatpush1.bf16.msra.mxu0 %v8322_v3  ;;  %3168 = vmatpush1.bf16.msra.mxu1 %v8323_v11 }
 0x9c0   :  { %3126 = vmatprep.subr.bf16.mxu0 %v8324_v63  ;;  %3169 = vmatprep.subr.bf16.mxu1 %v8325_v38 }
 0x9c3   :  { %3127 = vmatpush1.bf16.msra.mxu0 %v8326_v25  ;;  %3170 = vmatpush1.bf16.msra.mxu1 %v8327_v13 }
 0x9c4   :  { %3128 = vmatprep.subr.bf16.mxu0 %v8328_v51  ;;  %3171 = vmatprep.subr.bf16.mxu1 %v8329_v14 }
 0x9c7   :  { %3129 = vmatpush1.bf16.msra.mxu0 %v8330_v54  ;;  %3172 = vmatpush1.bf16.msra.mxu1 %v8331_v50 }
 0x9c8   :  { %3265 = vmatprep.subr.bf16.mxu0 %v8332_v23  ;;  %3308 = vmatprep.subr.bf16.mxu1 %v8333_v36 }
 0xa6a   :  { %v2997_v16 = vpop.f32.mrf.mxu0  ;;  %v3040_v39 = vpop.f32.mrf.mxu1 }
 0xa6b   :  { %v3049_v52 = vadd.f32 %v2997_v16, %v7063_v43 }
 0xa6c   :  { %v2999_v62 = vpop.f32.mrf.mxu0  ;;  %v3042_v36 = vpop.f32.mrf.mxu1 }
 0xa6d   :  { %v4300_v29 = vmul.f32 -1.442695, %v3049_v52  ;;  %v3050_v12 = vadd.f32 %v2999_v62, %v8334_v15  ;;  %v8335_v52 = vsel %vm5525_vm3, %v6829_v17, %v7099_v37  ;;  %v8336_v15 = vsel %vm5753_vm4, %v6814_v58, %v7036_v28 }
 0xa6e   :  { %v3001_v53 = vpop.f32.mrf.mxu0 }
 0xa6f   :  { %4832 = vpow2.f32 %v4300_v29  ;;  %v4301_v45 = vmul.f32 -1.442695, %v3050_v12  ;;  %v3053_v19 = vadd.f32 %v3001_v53, %v7107_v21  ;;  %v3051_v12 = vadd.f32 %v3040_v39, %v8336_v15  ;;  %v3044_v29 = vpop.f32.mrf.mxu1 }
 0xa70   :  { %v3003_v23 = vpop.f32.mrf.mxu0  ;;  %v8337_v53 = vsel %vm5753_vm4, %v6826_v0, %v7080_v31  ;;  %v8361_v31 = vld [vmem:[#allocation68_spill] sm:$0xff] }
 0xa71   :  { %4834 = vpow2.f32 %v4301_v45  ;;  %v4303_v48 = vmul.f32 -1.442695, %v3053_v19  ;;  %v3054_v43 = vadd.f32 %v3003_v23, %v8335_v52  ;;  %v3055_v19 = vadd.f32 %v3044_v29, %v8337_v53  ;;  %v3046_v62 = vpop.f32.mrf.mxu1 }
 0xa72   :  { %v4302_v45 = vmul.f32 -1.442695, %v3051_v12 }
 0xa73   :  { %4836 = vpow2.f32 %v4303_v48  ;;  %v4304_v16 = vmul.f32 -1.442695, %v3054_v43  ;;  %v8338_v48 = vsel %vm5768_vm5, %v6820_v18, %v7058_v44  ;;  %v4305_v52 = vmul.f32 -1.442695, %v3055_v19 }
 0xa74   :  { %v3052_v21 = vadd.f32 %v3042_v36, %v8338_v48 }
 0xa75   :  { %4838 = vpow2.f32 %v4304_v16  ;;  %v8339_v16 = vsel %vm5768_vm5, %v6832_v40, %v7102_v20  ;;  %v8360_v20 = vld [vmem:[#allocation22_spill] sm:$0xff] }
 0xa76   :  { %4840 = vpow2.f32 %v4302_v45  ;;  %v3056_v15 = vadd.f32 %v3046_v62, %v8339_v16  ;;  %v8362_v58 = vsel %vm5525_vm3, %v8360_v20, %v8361_v31 }
 0xa77   :  { %4842 = vtanh.f32 %v3052_v21 }
 0xa7c   :  { %v4833_v23 = vpop.eup %4832 }
 0xa7d   :  { %v3075_v43 = vadd.f32 1.0, %v4833_v23 }
 0xa7e   :  { %v4835_v39 = vpop.eup %4834 }
 0xa7f   :  { %4844 = vrcp.f32 %v3075_v43  ;;  %v3076_v12 = vadd.f32 1.0, %v4835_v39 }
 0xa80   :  { %v4837_v29 = vpop.eup %4836  ;;  %4846 = vpow2.f32 %v4305_v52 }
 0xa81   :  { %4848 = vrcp.f32 %v3076_v12  ;;  %v3078_v53 = vadd.f32 1.0, %v4837_v29 }
 0xa82   :  { %v4839_v36 = vpop.eup %4838  ;;  %4850 = vtanh.f32 %v3056_v15 }
 0xa83   :  { %4852 = vrcp.f32 %v3078_v53  ;;  %v3079_v19 = vadd.f32 1.0, %v4839_v36  ;;  %v4841_v45 = vpop.eup %4840 }
 0xa84   :  { %v4843_v48 = vpop.eup %4842  ;;  %v3077_v39 = vadd.f32 1.0, %v4841_v45 }
 0xa85   :  { %4854 = vrcp.f32 %v3079_v19 }
 0xa86   :  { %4856 = vrcp.f32 %v3077_v39 }
 0xa8c   :  { %v4845_v21 = vpop.eup %4844 }
 0xa8d   :  { %v4847_v23 = vpop.eup %4846  ;;  %v3097_v18 = vmul.f32 %v4845_v21, %v4843_v48  ;;  %v8353_v21 = vld [vmem:[#allocation41_spill] sm:$0xff] }
 0xa8e   :  { %v4849_v44 = vpop.eup %4848  ;;  %v3080_v29 = vadd.f32 1.0, %v4847_v23  ;;  %v8354_v23 = vld [vmem:[#allocation20_spill] sm:$0xff] }
 0xa8f   :  { %v4851_v0 = vpop.eup %4850  ;;  %v3095_v62 = vmul.f32 %v4849_v44, %v7234_v35 }
 0xa90   :  { %v4853_v43 = vpop.eup %4852 }
 0xa91   :  { %v7307_v16 = vadd.f32 %v3097_v18, %v3095_v62  ;;  %v3098_v52 = vmul.f32 %v4853_v43, %v4851_v0  ;;  %v8355_v62 = vsel %vm5768_vm5, %v8353_v21, %v8354_v23 }
 0xa92   :  { %v4855_v12 = vpop.eup %4854 }
 0xa93   :  { %v3096_v15 = vmul.f32 %v4855_v12, %v7237_v55  ;;  %4858 = vtanh.f32 %v7307_v16  ;;  %v4857_v36 = vpop.eup %4856  ;;  %v8343_v55 = vld [vmem:[#allocation73_spill] sm:$0xff] }
 0xa94   :  { %4860 = vrcp.f32 %v3080_v29 }
 0xa95   :  { %v7311_v53 = vadd.f32 %v3098_v52, %v3096_v15 }
 0xa97   :  { %4862 = vtanh.f32 %v7311_v53 }
 0xaa0   :  { %v4859_v19 = vpop.eup %4858 }
 0xaa1   :  { %v4861_v44 = vpop.eup %4860  ;;  %v3103_v45 = vmul.f32 %v4859_v19, %v4857_v36  ;;  %v8356_v36 = vld [vmem:[#allocation13_spill] sm:$0xff]  ;;  %v8357_v19 = vld [vmem:[#allocation24_spill] sm:$0xff] }
 0xaa4   :  { %v4863_v35 = vpop.eup %4862 }
 0xaa5   :  { %v3104_v18 = vmul.f32 %v4863_v35, %v4861_v44  ;;  %v8358_v44 = vsel %vm5768_vm5, %v8356_v36, %v8357_v19 }
 0xaa7   :  { %v3113_v48 = vpack.c.bf16 %v3104_v18, %v3103_v45 }
 0xaa9   :  { %3147 = vmatmul.mubr.bf16.vlgmr.msra.gmra.mxu0 %v3113_v48  ;;  %3190 = vmatmul.mubr.bf16.vlgmr.msra.gmra.mxu1 %v3113_v48 }
 0xaaa   :  { %3266 = vmatpush1.bf16.msra.mxu0 %v6605_v2  ;;  %3309 = vmatpush1.bf16.msra.mxu1 %v6617_v41  ;;  %v7346_v2 = vld [vmem:[#allocation8 + $0xe4] ss:$16 sps:$4 sm:$0xff]  }
 0xaab   :  { %3267 = vmatprep.subr.bf16.mxu0 %v6613_v30  ;;  %3310 = vmatprep.subr.bf16.mxu1 %v6619_v5  ;;  %v7349_v30 = vld [vmem:[#allocation8 + $0xec] ss:$16 sps:$4 sm:$0xff]  }
 0xaac   :  { %3297 = vmatprep.mubr.bf16.mxu0 %v8103_v24  ;;  %3340 = vmatprep.mubr.bf16.mxu1 %v8103_v24 }
 0xaae   :  { %3268 = vmatpush1.bf16.msra.mxu0 %v6623_v4  ;;  %3311 = vmatpush1.bf16.msra.mxu1 %v6630_v60 }
 0xaaf   :  { %3269 = vmatprep.subr.bf16.mxu0 %v6627_v7  ;;  %3312 = vmatprep.subr.bf16.mxu1 %v6637_v46  ;;  %v8341_v46 = vld [vmem:[#allocation23_spill] sm:$0xff] }
 0xab2   :  { %3270 = vmatpush1.bf16.msra.mxu0 %v6635_v10  ;;  %3313 = vmatpush1.bf16.msra.mxu1 %v6642_v59  ;;  %v8340_v10 = vld [vmem:[#allocation64_spill] sm:$0xff] }
 0xab3   :  { %3271 = vmatprep.subr.bf16.mxu0 %v6639_v47  ;;  %3314 = vmatprep.subr.bf16.mxu1 %v6646_v27  ;;  %v8342_v47 = vsel %vm5525_vm3, %v8340_v10, %v8341_v46 }
 0xab6   :  { %3272 = vmatpush1.bf16.msra.mxu0 %v8314_v56  ;;  %3315 = vmatpush1.bf16.msra.mxu1 %v8315_v6 }
 0xab7   :  { %3273 = vmatprep.subr.bf16.mxu0 %v8316_v1  ;;  %3316 = vmatprep.subr.bf16.mxu1 %v8317_v49 }
 0xaba   :  { %3274 = vmatpush1.bf16.msra.mxu0 %v8318_v26  ;;  %3317 = vmatpush1.bf16.msra.mxu1 %v8319_v22  ;;  %v8345_v26 = vld [vmem:[#allocation26_spill] sm:$0xff] }
 0xabb   :  { %3275 = vmatprep.subr.bf16.mxu0 %v8320_v57  ;;  %3318 = vmatprep.subr.bf16.mxu1 %v8321_v9 }
 0xabe   :  { %3276 = vmatpush1.bf16.msra.mxu0 %v8322_v3  ;;  %3319 = vmatpush1.bf16.msra.mxu1 %v8323_v11  ;;  %v8347_v3 = vld [vmem:[#allocation44_spill] sm:$0xff]  ;;  %v8348_v11 = vld [vmem:[#allocation14_spill] sm:$0xff] }
 0xabf   :  { %3277 = vmatprep.subr.bf16.mxu0 %v8324_v63  ;;  %3320 = vmatprep.subr.bf16.mxu1 %v8325_v38  ;;  %v8349_v63 = vsel %vm5753_vm4, %v8347_v3, %v8348_v11 }
 0xac2   :  { %3278 = vmatpush1.bf16.msra.mxu0 %v8326_v25  ;;  %3321 = vmatpush1.bf16.msra.mxu1 %v8327_v13  ;;  %v8350_v13 = vld [vmem:[#allocation67_spill] sm:$0xff] }
 0xac3   :  { %3279 = vmatprep.subr.bf16.mxu0 %v8328_v51  ;;  %3322 = vmatprep.subr.bf16.mxu1 %v8329_v14  ;;  %v8351_v51 = vld [vmem:[#allocation30_spill] sm:$0xff] }
 0xac4   :  { %v8352_v14 = vsel %vm5753_vm4, %v8350_v13, %v8351_v51 }
 0xac6   :  { %3280 = vmatpush1.bf16.msra.mxu0 %v8330_v54  ;;  %3323 = vmatpush1.bf16.msra.mxu1 %v8331_v50 }
 0xac7   :  { %3416 = vmatprep.subr.bf16.mxu0 %v7346_v2  ;;  %3459 = vmatprep.subr.bf16.mxu1 %v7349_v30 }
 0xb69   :  { %v3148_v41 = vpop.f32.mrf.mxu0  ;;  %v3191_v60 = vpop.f32.mrf.mxu1 }
 0xb6a   :  { %v3200_v5 = vadd.f32 %v3148_v41, %v6975_v8  ;;  %v8344_v8 = vld [vmem:[#allocation66_spill] sm:$0xff]  ;;  %v3202_v38 = vadd.f32 %v3191_v60, %v8349_v63 }
 0xb6b   :  { %v3150_v4 = vpop.f32.mrf.mxu0  ;;  %v3193_v1 = vpop.f32.mrf.mxu1  ;;  %v8346_v22 = vsel %vm5525_vm3, %v8344_v8, %v8345_v26 }
 0xb6c   :  { %v4306_v7 = vmul.f32 -1.442695, %v3200_v5  ;;  %v3201_v59 = vadd.f32 %v3150_v4, %v8342_v47  ;;  %v4308_v50 = vmul.f32 -1.442695, %v3202_v38  ;;  %v3203_v43 = vadd.f32 %v3193_v1, %v8355_v62 }
 0xb6d   :  { %v3152_v27 = vpop.f32.mrf.mxu0  ;;  %v3195_v25 = vpop.f32.mrf.mxu1 }
 0xb6e   :  { %4864 = vpow2.f32 %v4306_v7  ;;  %v4307_v0 = vmul.f32 -1.442695, %v3201_v59  ;;  %v3204_v56 = vadd.f32 %v3152_v27, %v8343_v55  ;;  %v3206_v54 = vadd.f32 %v3195_v25, %v8352_v14 }
 0xb6f   :  { %v3154_v6 = vpop.f32.mrf.mxu0  ;;  %v3197_v39 = vpop.f32.mrf.mxu1 }
 0xb70   :  { %4866 = vpow2.f32 %v4307_v0  ;;  %v4309_v49 = vmul.f32 -1.442695, %v3204_v56  ;;  %v3205_v57 = vadd.f32 %v3154_v6, %v8346_v22  ;;  %v4311_v12 = vmul.f32 -1.442695, %v3206_v54 }
 0xb71   :  { %v3207_v35 = vadd.f32 %v3197_v39, %v8358_v44  ;;  %v7398_v39 = vld [vmem:[#allocation8 + $0xc4] ss:$16 sps:$4 sm:$0xff]   ;;  %v7415_v44 = vld [vmem:[#allocation8 + $0xac] ss:$16 sps:$4 sm:$0xff]  }
 0xb72   :  { %4868 = vpow2.f32 %v4309_v49  ;;  %v4310_v9 = vmul.f32 -1.442695, %v3205_v57 }
 0xb74   :  { %4870 = vpow2.f32 %v4310_v9 }
 0xb75   :  { %4872 = vpow2.f32 %v4308_v50 }
 0xb76   :  { %4874 = vtanh.f32 %v3203_v43  ;;  %v7392_v43 = vld [vmem:[#allocation8 + $0xe0] ss:$16 sps:$4 sm:$0xff]  }
 0xb7b   :  { %v4865_v52 = vpop.eup %4864 }
 0xb7c   :  { %v3226_v29 = vadd.f32 1.0, %v4865_v52  ;;  %v7401_v52 = vld [vmem:[#allocation8 + $0xcc] ss:$16 sps:$4 sm:$0xff]  }
 0xb7d   :  { %v4867_v15 = vpop.eup %4866 }
 0xb7e   :  { %4876 = vrcp.f32 %v3226_v29  ;;  %v3227_v45 = vadd.f32 1.0, %v4867_v15  ;;  %v7409_v29 = vld [vmem:[#allocation8 + $0xc8] ss:$16 sps:$4 sm:$0xff]   ;;  %v7412_v15 = vld [vmem:[#allocation8 + $0xa4] ss:$16 sps:$4 sm:$0xff]  }
 0xb7f   :  { %v4869_v18 = vpop.eup %4868  ;;  %4878 = vpow2.f32 %v4311_v12  ;;  %v7406_v12 = vld [vmem:[#allocation8 + $0xc0] ss:$16 sps:$4 sm:$0xff]  }
 0xb80   :  { %4880 = vrcp.f32 %v3227_v45  ;;  %v3229_v48 = vadd.f32 1.0, %v4869_v18  ;;  %v7421_v45 = vld [vmem:[#allocation8 + $0xa8] ss:$16 sps:$4 sm:$0xff]   ;;  %v7424_v18 = vld [vmem:[#allocation8 + $0x84] ss:$16 sps:$4 sm:$0xff]  }
 0xb81   :  { %v4871_v41 = vpop.eup %4870  ;;  %4882 = vtanh.f32 %v3207_v35  ;;  %v7418_v35 = vld [vmem:[#allocation8 + $0xa0] ss:$16 sps:$4 sm:$0xff]  }
 0xb82   :  { %4884 = vrcp.f32 %v3229_v48  ;;  %v3230_v5 = vadd.f32 1.0, %v4871_v41  ;;  %v4873_v4 = vpop.eup %4872  ;;  %v7427_v48 = vld [vmem:[#allocation8 + $0x8c] ss:$16 sps:$4 sm:$0xff]   ;;  %v7430_v41 = vld [vmem:[#allocation8 + $0x80] ss:$16 sps:$4 sm:$0xff]  }
 0xb83   :  { %v4875_v7 = vpop.eup %4874  ;;  %v3228_v6 = vadd.f32 1.0, %v4873_v4  ;;  %v7436_v4 = vld [vmem:[#allocation8 + $0x64] ss:$16 sps:$4 sm:$0xff]  }
 0xb84   :  { %4886 = vrcp.f32 %v3230_v5  ;;  %v7433_v5 = vld [vmem:[#allocation8 + $0x88] ss:$16 sps:$4 sm:$0xff]  }
 0xb85   :  { %4888 = vrcp.f32 %v3228_v6  ;;  %v7463_v6 = vld [vmem:[#allocation8 + $0x2c] ss:$16 sps:$4 sm:$0xff]  }
 0xb8b   :  { %v4877_v60 = vpop.eup %4876 }
 0xb8c   :  { %v4879_v47 = vpop.eup %4878  ;;  %v3248_v59 = vmul.f32 %v4877_v60, %v4875_v7  ;;  %v7439_v7 = vld [vmem:[#allocation8 + $0x6c] ss:$16 sps:$4 sm:$0xff]   ;;  %v7442_v60 = vld [vmem:[#allocation8 + $0x60] ss:$16 sps:$4 sm:$0xff]  }
 0xb8d   :  { %v4881_v27 = vpop.eup %4880  ;;  %v3231_v57 = vadd.f32 1.0, %v4879_v47  ;;  %v7445_v47 = vld [vmem:[#allocation8 + $0x68] ss:$16 sps:$4 sm:$0xff]  }
 0xb8e   :  { %v4883_v0 = vpop.eup %4882  ;;  %v3246_v55 = vmul.f32 %v4881_v27, %v7307_v16  ;;  %v7451_v27 = vld [vmem:[#allocation8 + $0x4c] ss:$16 sps:$4 sm:$0xff]  }
 0xb8f   :  { %v4885_v56 = vpop.eup %4884 }
 0xb90   :  { %v7385_v1 = vadd.f32 %v3248_v59, %v3246_v55  ;;  %v3249_v49 = vmul.f32 %v4885_v56, %v4883_v0  ;;  %v7448_v59 = vld [vmem:[#allocation8 + $0x44] ss:$16 sps:$4 sm:$0xff]   ;;  %v7454_v0 = vld [vmem:[#allocation8 + $0x40] ss:$16 sps:$4 sm:$0xff]   ;;  %v7457_v55 = vld [vmem:[#allocation8 + $0x48] ss:$16 sps:$4 sm:$0xff]  }
 0xb91   :  { %v4887_v22 = vpop.eup %4886  ;;  %v7460_v56 = vld [vmem:[#allocation8 + $0x24] ss:$16 sps:$4 sm:$0xff]  }
 0xb92   :  { %v3247_v9 = vmul.f32 %v4887_v22, %v7311_v53  ;;  %4890 = vtanh.f32 %v7385_v1  ;;  %v4889_v38 = vpop.eup %4888  ;;  %v7395_v53 = vld [vmem:[#allocation8 + $0xe8] ss:$16 sps:$4 sm:$0xff]  }
 0xb93   :  { %4892 = vrcp.f32 %v3231_v57  ;;  %v7469_v22 = vld [vmem:[#allocation8 + $0x28] ss:$16 sps:$4 sm:$0xff]   ;;  %v7472_v57 = vld [vmem:[#allocation8 + $0x4] ss:$16 sps:$4 sm:$0xff]  }
 0xb94   :  { %v7389_v63 = vadd.f32 %v3249_v49, %v3247_v9  ;;  %v7466_v49 = vld [vmem:[#allocation8 + $0x20] ss:$16 sps:$4 sm:$0xff]   ;;  %v7475_v9 = vld [vmem:[#allocation8 + $0xc] ss:$16 sps:$4 sm:$0xff]  }
 0xb96   :  { %4894 = vtanh.f32 %v7389_v63 }
 0xb9f   :  { %v4891_v25 = vpop.eup %4890 }
 0xba0   :  { %v4893_v16 = vpop.eup %4892  ;;  %v3254_v54 = vmul.f32 %v4891_v25, %v4889_v38  ;;  %v7478_v38 = vld [vmem:[#allocation8] ss:$16 sps:$4 sm:$0xff]   ;;  %v7481_v25 = vld [vmem:[#allocation8 + $0x8] ss:$16 sps:$4 sm:$0xff]  }
 0xba3   :  { %v4895_v14 = vpop.eup %4894 }
 0xba4   :  { %v3255_v50 = vmul.f32 %v4895_v14, %v4893_v16  ;;  %v8359_v14 = vld [vmem:[#allocation70_spill] sm:$0xff] }
 0xba6   :  { %v3264_v62 = vpack.c.bf16 %v3255_v50, %v3254_v54 }
 0xba8   :  { %3298 = vmatmul.mubr.bf16.vlgmr.msra.gmra.mxu0 %v3264_v62  ;;  %3341 = vmatmul.mubr.bf16.vlgmr.msra.gmra.mxu1 %v3264_v62 }
 0xba9   :  { %3417 = vmatpush1.bf16.msra.mxu0 %v7392_v43  ;;  %3460 = vmatpush1.bf16.msra.mxu1 %v7395_v53 }
 0xbaa   :  { %3418 = vmatprep.subr.bf16.mxu0 %v7398_v39  ;;  %3461 = vmatprep.subr.bf16.mxu1 %v7401_v52 }
 0xbab   :  { %3448 = vmatprep.mubr.bf16.mxu0 %v8103_v24  ;;  %3491 = vmatprep.mubr.bf16.mxu1 %v8103_v24 }
 0xbad   :  { %3419 = vmatpush1.bf16.msra.mxu0 %v7406_v12  ;;  %3462 = vmatpush1.bf16.msra.mxu1 %v7409_v29 }
 0xbae   :  { %3420 = vmatprep.subr.bf16.mxu0 %v7412_v15  ;;  %3463 = vmatprep.subr.bf16.mxu1 %v7415_v44 }
 0xbb1   :  { %3421 = vmatpush1.bf16.msra.mxu0 %v7418_v35  ;;  %3464 = vmatpush1.bf16.msra.mxu1 %v7421_v45 }
 0xbb2   :  { %3422 = vmatprep.subr.bf16.mxu0 %v7424_v18  ;;  %3465 = vmatprep.subr.bf16.mxu1 %v7427_v48 }
 0xbb5   :  { %3423 = vmatpush1.bf16.msra.mxu0 %v7430_v41  ;;  %3466 = vmatpush1.bf16.msra.mxu1 %v7433_v5 }
 0xbb6   :  { %3424 = vmatprep.subr.bf16.mxu0 %v7436_v4  ;;  %3467 = vmatprep.subr.bf16.mxu1 %v7439_v7 }
 0xbb9   :  { %3425 = vmatpush1.bf16.msra.mxu0 %v7442_v60  ;;  %3468 = vmatpush1.bf16.msra.mxu1 %v7445_v47 }
 0xbba   :  { %3426 = vmatprep.subr.bf16.mxu0 %v7448_v59  ;;  %3469 = vmatprep.subr.bf16.mxu1 %v7451_v27 }
 0xbbd   :  { %3427 = vmatpush1.bf16.msra.mxu0 %v7454_v0  ;;  %3470 = vmatpush1.bf16.msra.mxu1 %v7457_v55 }
 0xbbe   :  { %3428 = vmatprep.subr.bf16.mxu0 %v7460_v56  ;;  %3471 = vmatprep.subr.bf16.mxu1 %v7463_v6 }
 0xbc1   :  { %3429 = vmatpush1.bf16.msra.mxu0 %v7466_v49  ;;  %3472 = vmatpush1.bf16.msra.mxu1 %v7469_v22 }
 0xbc2   :  { %3430 = vmatprep.subr.bf16.mxu0 %v7472_v57  ;;  %3473 = vmatprep.subr.bf16.mxu1 %v7475_v9 }
 0xbc5   :  { %3431 = vmatpush1.bf16.msra.mxu0 %v7478_v38  ;;  %3474 = vmatpush1.bf16.msra.mxu1 %v7481_v25 }
 0xbc6   :  { %3567 = vmatprep.subr.bf16.mxu0 %v7346_v2  ;;  %3610 = vmatprep.subr.bf16.mxu1 %v7349_v30 }
 0xc68   :  { %v3299_v16 = vpop.f32.mrf.mxu0  ;;  %v3342_v40 = vpop.f32.mrf.mxu1 }
 0xc69   :  { %v3351_v54 = vadd.f32 %v3299_v16, %v8359_v14  ;;  %v8364_v16 = vld [vmem:[#allocation29_spill] sm:$0xff]  ;;  %v8365_v14 = vld [vmem:[#allocation36_spill] sm:$0xff] }
 0xc6a   :  { %v3301_v50 = vpop.f32.mrf.mxu0  ;;  %v3344_v19 = vpop.f32.mrf.mxu1 }
 0xc6b   :  { %v4312_v62 = vmul.f32 -1.442695, %v3351_v54  ;;  %v3352_v28 = vadd.f32 %v3301_v50, %v8362_v58  ;;  %v8366_v54 = vsel %vm5525_vm3, %v8364_v16, %v8365_v14  ;;  %v8367_v58 = vld [vmem:[#allocation15_spill] sm:$0xff]  ;;  %v8368_v50 = vld [vmem:[#allocation25_spill] sm:$0xff] }
 0xc6c   :  { %v3303_v17 = vpop.f32.mrf.mxu0  ;;  %v3346_v51 = vpop.f32.mrf.mxu1 }
 0xc6d   :  { %4896 = vpow2.f32 %v4312_v62  ;;  %v4313_v37 = vmul.f32 -1.442695, %v3352_v28  ;;  %v3355_v33 = vadd.f32 %v3303_v17, %v8363_v42  ;;  %v8369_v62 = vsel %vm5753_vm4, %v8367_v58, %v8368_v50  ;;  %v8370_v42 = vld [vmem:[#allocation19_spill] sm:$0xff]  ;;  %v8371_v17 = vld [vmem:[#allocation69_spill] sm:$0xff] }
 0xc6e   :  { %v3305_v36 = vpop.f32.mrf.mxu0  ;;  %v3353_v28 = vadd.f32 %v3342_v40, %v8369_v62  ;;  %v3348_v11 = vpop.f32.mrf.mxu1  ;;  %v8377_v62 = vld [vmem:[#allocation72_spill] sm:$0xff] }
 0xc6f   :  { %4898 = vpow2.f32 %v4313_v37  ;;  %v4315_v21 = vmul.f32 -1.442695, %v3355_v33  ;;  %v3356_v23 = vadd.f32 %v3305_v36, %v8366_v54  ;;  %v8372_v33 = vsel %vm5753_vm4, %v8370_v42, %v8371_v17  ;;  %v8373_v36 = vld [vmem:[#allocation17_spill] sm:$0xff] }
 0xc70   :  { %v3357_v37 = vadd.f32 %v3346_v51, %v8372_v33  ;;  %v4314_v3 = vmul.f32 -1.442695, %v3353_v28 }
 0xc71   :  { %4900 = vpow2.f32 %v4315_v21  ;;  %v4316_v13 = vmul.f32 -1.442695, %v3356_v23  ;;  %v8374_v21 = vld [vmem:[#allocation34_spill] sm:$0xff] }
 0xc72   :  { %v8375_v23 = vsel %vm5768_vm5, %v8373_v36, %v8374_v21  ;;  %v4317_v26 = vmul.f32 -1.442695, %v3357_v37 }
 0xc73   :  { %4902 = vpow2.f32 %v4316_v13  ;;  %v3354_v54 = vadd.f32 %v3344_v19, %v8375_v23  ;;  %v8376_v13 = vld [vmem:[#allocation28_spill] sm:$0xff] }
 0xc74   :  { %4904 = vpow2.f32 %v4314_v3  ;;  %v8378_v46 = vsel %vm5768_vm5, %v8376_v13, %v8377_v62 }
 0xc75   :  { %4906 = vtanh.f32 %v3354_v54  ;;  %v3358_v51 = vadd.f32 %v3348_v11, %v8378_v46 }
 0xc7a   :  { %v4897_v8 = vpop.eup %4896 }
 0xc7b   :  { %v3377_v10 = vadd.f32 1.0, %v4897_v8 }
 0xc7c   :  { %v4899_v40 = vpop.eup %4898 }
 0xc7d   :  { %4908 = vrcp.f32 %v3377_v10  ;;  %v3378_v28 = vadd.f32 1.0, %v4899_v40 }
 0xc7e   :  { %v4901_v33 = vpop.eup %4900  ;;  %4910 = vpow2.f32 %v4317_v26 }
 0xc7f   :  { %4912 = vrcp.f32 %v3378_v28  ;;  %v3380_v36 = vadd.f32 1.0, %v4901_v33 }
 0xc80   :  { %v4903_v19 = vpop.eup %4902  ;;  %4914 = vtanh.f32 %v3358_v51 }
 0xc81   :  { %4916 = vrcp.f32 %v3380_v36  ;;  %v3381_v37 = vadd.f32 1.0, %v4903_v19  ;;  %v4905_v8 = vpop.eup %4904 }
 0xc82   :  { %v4907_v3 = vpop.eup %4906  ;;  %v3379_v11 = vadd.f32 1.0, %v4905_v8 }
 0xc83   :  { %4918 = vrcp.f32 %v3381_v37 }
 0xc84   :  { %4920 = vrcp.f32 %v3379_v11  ;;  %v8380_v11 = vsel %vm5525_vm3, %v8361_v31, %v8360_v20  ;;  %v8383_v31 = vsel %vm5753_vm4, %v8368_v50, %v8367_v58 }
 0xc8a   :  { %v4909_v23 = vpop.eup %4908 }
 0xc8b   :  { %v4911_v54 = vpop.eup %4910  ;;  %v3399_v21 = vmul.f32 %v4909_v23, %v4907_v3 }
 0xc8c   :  { %v4913_v61 = vpop.eup %4912  ;;  %v3382_v33 = vadd.f32 1.0, %v4911_v54 }
 0xc8d   :  { %v4915_v42 = vpop.eup %4914  ;;  %v3397_v46 = vmul.f32 %v4913_v61, %v7385_v1 }
 0xc8e   :  { %v4917_v10 = vpop.eup %4916 }
 0xc8f   :  { %v7519_v40 = vadd.f32 %v3399_v21, %v3397_v46  ;;  %v3400_v26 = vmul.f32 %v4917_v10, %v4915_v42  ;;  %v8379_v42 = vld [vmem:[#allocation37_spill] sm:$0xff] }
 0xc90   :  { %v4919_v28 = vpop.eup %4918 }
 0xc91   :  { %v3398_v36 = vmul.f32 %v4919_v28, %v7389_v63  ;;  %4922 = vtanh.f32 %v7519_v40  ;;  %v4921_v19 = vpop.eup %4920 }
 0xc92   :  { %4924 = vrcp.f32 %v3382_v33 }
 0xc93   :  { %v7523_v51 = vadd.f32 %v3400_v26, %v3398_v36  ;;  %v8381_v36 = vld [vmem:[#allocation12_spill] sm:$0xff] }
 0xc95   :  { %4926 = vtanh.f32 %v7523_v51 }
 0xc9e   :  { %v4923_v37 = vpop.eup %4922 }
 0xc9f   :  { %v4925_v61 = vpop.eup %4924  ;;  %v3405_v8 = vmul.f32 %v4923_v37, %v4921_v19 }
 0xca2   :  { %v4927_v1 = vpop.eup %4926 }
 0xca3   :  { %v3406_v21 = vmul.f32 %v4927_v1, %v4925_v61 }
 0xca5   :  { %v3415_v3 = vpack.c.bf16 %v3406_v21, %v3405_v8  ;;  %v8382_v8 = vsel %vm5525_vm3, %v8365_v14, %v8364_v16  ;;  %v8387_v16 = vld [vmem:[#allocation34_spill] sm:$0xff]  ;;  %v8388_v14 = vld [vmem:[#allocation17_spill] sm:$0xff] }
 0xca7   :  { %3449 = vmatmul.mubr.bf16.vlgmr.msra.gmra.mxu0 %v3415_v3  ;;  %3492 = vmatmul.mubr.bf16.vlgmr.msra.gmra.mxu1 %v3415_v3 }
 0xca8   :  { %3568 = vmatpush1.bf16.msra.mxu0 %v7392_v43  ;;  %3611 = vmatpush1.bf16.msra.mxu1 %v7395_v53 }
 0xca9   :  { %3569 = vmatprep.subr.bf16.mxu0 %v7398_v39  ;;  %3612 = vmatprep.subr.bf16.mxu1 %v7401_v52 }
 0xcaa   :  { %3599 = vmatprep.mubr.bf16.mxu0 %v8103_v24  ;;  %3642 = vmatprep.mubr.bf16.mxu1 %v8103_v24 }
 0xcac   :  { %3570 = vmatpush1.bf16.msra.mxu0 %v7406_v12  ;;  %3613 = vmatpush1.bf16.msra.mxu1 %v7409_v29 }
 0xcad   :  { %3571 = vmatprep.subr.bf16.mxu0 %v7412_v15  ;;  %3614 = vmatprep.subr.bf16.mxu1 %v7415_v44 }
 0xcb0   :  { %3572 = vmatpush1.bf16.msra.mxu0 %v7418_v35  ;;  %3615 = vmatpush1.bf16.msra.mxu1 %v7421_v45 }
 0xcb1   :  { %3573 = vmatprep.subr.bf16.mxu0 %v7424_v18  ;;  %3616 = vmatprep.subr.bf16.mxu1 %v7427_v48 }
 0xcb4   :  { %3574 = vmatpush1.bf16.msra.mxu0 %v7430_v41  ;;  %3617 = vmatpush1.bf16.msra.mxu1 %v7433_v5 }
 0xcb5   :  { %3575 = vmatprep.subr.bf16.mxu0 %v7436_v4  ;;  %3618 = vmatprep.subr.bf16.mxu1 %v7439_v7 }
 0xcb8   :  { %3576 = vmatpush1.bf16.msra.mxu0 %v7442_v60  ;;  %3619 = vmatpush1.bf16.msra.mxu1 %v7445_v47 }
 0xcb9   :  { %3577 = vmatprep.subr.bf16.mxu0 %v7448_v59  ;;  %3620 = vmatprep.subr.bf16.mxu1 %v7451_v27 }
 0xcbc   :  { %3578 = vmatpush1.bf16.msra.mxu0 %v7454_v0  ;;  %3621 = vmatpush1.bf16.msra.mxu1 %v7457_v55 }
 0xcbd   :  { %3579 = vmatprep.subr.bf16.mxu0 %v7460_v56  ;;  %3622 = vmatprep.subr.bf16.mxu1 %v7463_v6 }
 0xcc0   :  { %3580 = vmatpush1.bf16.msra.mxu0 %v7466_v49  ;;  %3623 = vmatpush1.bf16.msra.mxu1 %v7469_v22 }
 0xcc1   :  { %3581 = vmatprep.subr.bf16.mxu0 %v7472_v57  ;;  %3624 = vmatprep.subr.bf16.mxu1 %v7475_v9 }
 0xcc4   :  { %3582 = vmatpush1.bf16.msra.mxu0 %v7478_v38  ;;  %3625 = vmatpush1.bf16.msra.mxu1 %v7481_v25 }
 0xcc5   :  { %3718 = vmatprep.subr.bf16.mxu0 %v7346_v2  ;;  %3761 = vmatprep.subr.bf16.mxu1 %v7349_v30 }
 0xd67   :  { %v3450_v63 = vpop.f32.mrf.mxu0  ;;  %v3493_v10 = vpop.f32.mrf.mxu1 }
 0xd68   :  { %v3502_v23 = vadd.f32 %v3450_v63, %v8379_v42  ;;  %v3504_v20 = vadd.f32 %v3493_v10, %v8383_v31  ;;  %v8384_v42 = vld [vmem:[#allocation19_spill] sm:$0xff] }
 0xd69   :  { %v3452_v54 = vpop.f32.mrf.mxu0  ;;  %v3495_v61 = vpop.f32.mrf.mxu1 }
 0xd6a   :  { %v4318_v46 = vmul.f32 -1.442695, %v3502_v23  ;;  %v3503_v26 = vadd.f32 %v3452_v54, %v8380_v11  ;;  %v8385_v23 = vsel %vm5753_vm4, %v8371_v17, %v8384_v42  ;;  %v8390_v17 = vsel %vm5768_vm5, %v8377_v62, %v8376_v13 }
 0xd6b   :  { %v3454_v28 = vpop.f32.mrf.mxu0  ;;  %v3497_v63 = vpop.f32.mrf.mxu1 }
 0xd6c   :  { %4928 = vpow2.f32 %v4318_v46  ;;  %v4319_v33 = vmul.f32 -1.442695, %v3503_v26  ;;  %v3506_v19 = vadd.f32 %v3454_v28, %v8381_v36  ;;  %v3508_v54 = vadd.f32 %v3497_v63, %v8385_v23 }
 0xd6d   :  { %v3456_v37 = vpop.f32.mrf.mxu0  ;;  %v4320_v46 = vmul.f32 -1.442695, %v3504_v20  ;;  %v8389_v26 = vsel %vm5768_vm5, %v8387_v16, %v8388_v14 }
 0xd6e   :  { %4930 = vpow2.f32 %v4319_v33  ;;  %v4321_v1 = vmul.f32 -1.442695, %v3506_v19  ;;  %v3507_v21 = vadd.f32 %v3456_v37, %v8382_v8  ;;  %v3505_v28 = vadd.f32 %v3495_v61, %v8389_v26  ;;  %v3499_v33 = vpop.f32.mrf.mxu1 }
 0xd6f   :  { %v4323_v19 = vmul.f32 -1.442695, %v3508_v54  ;;  %v3509_v10 = vadd.f32 %v3499_v33, %v8390_v17 }
 0xd70   :  { %4932 = vpow2.f32 %v4321_v1  ;;  %v4322_v3 = vmul.f32 -1.442695, %v3507_v21 }
 0xd72   :  { %4934 = vpow2.f32 %v4322_v3 }
 0xd73   :  { %4936 = vpow2.f32 %v4320_v46 }
 0xd74   :  { %4938 = vtanh.f32 %v3505_v28 }
 0xd79   :  { %v4929_v36 = vpop.eup %4928 }
 0xd7a   :  { %v3528_v58 = vadd.f32 1.0, %v4929_v36 }
 0xd7b   :  { %v4931_v50 = vpop.eup %4930 }
 0xd7c   :  { %4940 = vrcp.f32 %v3528_v58  ;;  %v3529_v37 = vadd.f32 1.0, %v4931_v50 }
 0xd7d   :  { %v4933_v1 = vpop.eup %4932  ;;  %4942 = vpow2.f32 %v4323_v19 }
 0xd7e   :  { %4944 = vrcp.f32 %v3529_v37  ;;  %v3531_v8 = vadd.f32 1.0, %v4933_v1  ;;  %v8391_v1 = vld [vmem:[#allocation18_spill] sm:$0xff] }
 0xd7f   :  { %v4935_v61 = vpop.eup %4934  ;;  %4946 = vtanh.f32 %v3509_v10 }
 0xd80   :  { %4948 = vrcp.f32 %v3531_v8  ;;  %v3532_v21 = vadd.f32 1.0, %v4935_v61  ;;  %v4937_v3 = vpop.eup %4936 }
 0xd81   :  { %v4939_v31 = vpop.eup %4938  ;;  %v3530_v46 = vadd.f32 1.0, %v4937_v3 }
 0xd82   :  { %4950 = vrcp.f32 %v3532_v21 }
 0xd83   :  { %4952 = vrcp.f32 %v3530_v46 }
 0xd89   :  { %v4941_v20 = vpop.eup %4940 }
 0xd8a   :  { %v4943_v63 = vpop.eup %4942  ;;  %v3550_v42 = vmul.f32 %v4941_v20, %v4939_v31  ;;  %v8392_v31 = vld [vmem:[#allocation23_spill] sm:$0xff]  ;;  %v8393_v20 = vld [vmem:[#allocation64_spill] sm:$0xff] }
 0xd8b   :  { %v4945_v23 = vpop.eup %4944  ;;  %v3533_v28 = vadd.f32 1.0, %v4943_v63  ;;  %v8394_v63 = vsel %vm5525_vm3, %v8392_v31, %v8393_v20  ;;  %v8406_v31 = vld [vmem:[#allocation41_spill] sm:$0xff] }
 0xd8c   :  { %v4947_v54 = vpop.eup %4946  ;;  %v3548_v13 = vmul.f32 %v4945_v23, %v7519_v40 }
 0xd8d   :  { %v4949_v62 = vpop.eup %4948 }
 0xd8e   :  { %v7593_v16 = vadd.f32 %v3550_v42, %v3548_v13  ;;  %v3551_v14 = vmul.f32 %v4949_v62, %v4947_v54  ;;  %v8395_v13 = vld [vmem:[#allocation31_spill] sm:$0xff] }
 0xd8f   :  { %v4951_v26 = vpop.eup %4950 }
 0xd90   :  { %v3549_v33 = vmul.f32 %v4951_v26, %v7523_v51  ;;  %4954 = vtanh.f32 %v7593_v16  ;;  %v4953_v19 = vpop.eup %4952  ;;  %v8397_v26 = vld [vmem:[#allocation66_spill] sm:$0xff] }
 0xd91   :  { %4956 = vrcp.f32 %v3533_v28 }
 0xd92   :  { %v7597_v36 = vadd.f32 %v3551_v14, %v3549_v33  ;;  %v8396_v14 = vld [vmem:[#allocation26_spill] sm:$0xff] }
 0xd93   :  { %v8398_v28 = vsel %vm5525_vm3, %v8396_v14, %v8397_v26 }
 0xd94   :  { %4958 = vtanh.f32 %v7597_v36 }
 0xd9d   :  { %v4955_v58 = vpop.eup %4954 }
 0xd9e   :  { %v4957_v40 = vpop.eup %4956  ;;  %v3556_v17 = vmul.f32 %v4955_v58, %v4953_v19  ;;  %v8399_v58 = vld [vmem:[#allocation14_spill] sm:$0xff] }
 0xda1   :  { %v4959_v50 = vpop.eup %4958 }
 0xda2   :  { %v3557_v10 = vmul.f32 %v4959_v50, %v4957_v40  ;;  %v8400_v40 = vld [vmem:[#allocation44_spill] sm:$0xff] }
 0xda3   :  { %v8401_v50 = vsel %vm5753_vm4, %v8399_v58, %v8400_v40 }
 0xda4   :  { %v3566_v37 = vpack.c.bf16 %v3557_v10, %v3556_v17 }
 0xda6   :  { %3600 = vmatmul.mubr.bf16.vlgmr.msra.gmra.mxu0 %v3566_v37  ;;  %3643 = vmatmul.mubr.bf16.vlgmr.msra.gmra.mxu1 %v3566_v37  ;;  %v8402_v37 = vld [vmem:[#allocation30_spill] sm:$0xff] }
 0xda7   :  { %3719 = vmatpush1.bf16.msra.mxu0 %v7392_v43  ;;  %3762 = vmatpush1.bf16.msra.mxu1 %v7395_v53 }
 0xda8   :  { %3720 = vmatprep.subr.bf16.mxu0 %v7398_v39  ;;  %3763 = vmatprep.subr.bf16.mxu1 %v7401_v52 }
 0xda9   :  { %3750 = vmatprep.mubr.bf16.mxu0 %v8103_v24  ;;  %3793 = vmatprep.mubr.bf16.mxu1 %v8103_v24 }
 0xdab   :  { %3721 = vmatpush1.bf16.msra.mxu0 %v7406_v12  ;;  %3764 = vmatpush1.bf16.msra.mxu1 %v7409_v29 }
 0xdac   :  { %3722 = vmatprep.subr.bf16.mxu0 %v7412_v15  ;;  %3765 = vmatprep.subr.bf16.mxu1 %v7415_v44 }
 0xdaf   :  { %3723 = vmatpush1.bf16.msra.mxu0 %v7418_v35  ;;  %3766 = vmatpush1.bf16.msra.mxu1 %v7421_v45 }
 0xdb0   :  { %3724 = vmatprep.subr.bf16.mxu0 %v7424_v18  ;;  %3767 = vmatprep.subr.bf16.mxu1 %v7427_v48 }
 0xdb3   :  { %3725 = vmatpush1.bf16.msra.mxu0 %v7430_v41  ;;  %3768 = vmatpush1.bf16.msra.mxu1 %v7433_v5 }
 0xdb4   :  { %3726 = vmatprep.subr.bf16.mxu0 %v7436_v4  ;;  %3769 = vmatprep.subr.bf16.mxu1 %v7439_v7 }
 0xdb7   :  { %3727 = vmatpush1.bf16.msra.mxu0 %v7442_v60  ;;  %3770 = vmatpush1.bf16.msra.mxu1 %v7445_v47 }
 0xdb8   :  { %3728 = vmatprep.subr.bf16.mxu0 %v7448_v59  ;;  %3771 = vmatprep.subr.bf16.mxu1 %v7451_v27 }
 0xdbb   :  { %3729 = vmatpush1.bf16.msra.mxu0 %v7454_v0  ;;  %3772 = vmatpush1.bf16.msra.mxu1 %v7457_v55 }
 0xdbc   :  { %3730 = vmatprep.subr.bf16.mxu0 %v7460_v56  ;;  %3773 = vmatprep.subr.bf16.mxu1 %v7463_v6 }
 0xdbf   :  { %3731 = vmatpush1.bf16.msra.mxu0 %v7466_v49  ;;  %3774 = vmatpush1.bf16.msra.mxu1 %v7469_v22 }
 0xdc0   :  { %3732 = vmatprep.subr.bf16.mxu0 %v7472_v57  ;;  %3775 = vmatprep.subr.bf16.mxu1 %v7475_v9 }
 0xdc3   :  { %3733 = vmatpush1.bf16.msra.mxu0 %v7478_v38  ;;  %3776 = vmatpush1.bf16.msra.mxu1 %v7481_v25 }
 0xdc4   :  { %3869 = vmatprep.subr.bf16.mxu0 %v7346_v2  ;;  %3912 = vmatprep.subr.bf16.mxu1 %v7349_v30 }
 0xe66   :  { %v3601_v51 = vpop.f32.mrf.mxu0  ;;  %v3644_v3 = vpop.f32.mrf.mxu1 }
 0xe67   :  { %v3653_v8 = vadd.f32 %v3601_v51, %v8391_v1  ;;  %v3655_v17 = vadd.f32 %v3644_v3, %v8401_v50  ;;  %v8403_v51 = vld [vmem:[#allocation67_spill] sm:$0xff] }
 0xe68   :  { %v3603_v61 = vpop.f32.mrf.mxu0  ;;  %v3646_v30 = vpop.f32.mrf.mxu1  ;;  %v8404_v1 = vsel %vm5753_vm4, %v8402_v37, %v8403_v51 }
 0xe69   :  { %v4324_v21 = vmul.f32 -1.442695, %v3653_v8  ;;  %v3654_v42 = vadd.f32 %v3603_v61, %v8394_v63  ;;  %v4326_v61 = vmul.f32 -1.442695, %v3655_v17 }
 0xe6a   :  { %v3605_v23 = vpop.f32.mrf.mxu0  ;;  %v3648_v10 = vpop.f32.mrf.mxu1 }
 0xe6b   :  { %4960 = vpow2.f32 %v4324_v21  ;;  %v4325_v54 = vmul.f32 -1.442695, %v3654_v42  ;;  %v3657_v62 = vadd.f32 %v3605_v23, %v8395_v13  ;;  %v3659_v8 = vadd.f32 %v3648_v10, %v8404_v1  ;;  %v8405_v21 = vld [vmem:[#allocation20_spill] sm:$0xff] }
 0xe6c   :  { %v3607_v2 = vpop.f32.mrf.mxu0  ;;  %v8407_v20 = vsel %vm5768_vm5, %v8405_v21, %v8406_v31  ;;  %v3650_v42 = vpop.f32.mrf.mxu1 }
 0xe6d   :  { %4962 = vpow2.f32 %v4325_v54  ;;  %v4327_v46 = vmul.f32 -1.442695, %v3657_v62  ;;  %v3658_v33 = vadd.f32 %v3607_v2, %v8398_v28  ;;  %v3656_v63 = vadd.f32 %v3646_v30, %v8407_v20  ;;  %v8408_v62 = vld [vmem:[#allocation24_spill] sm:$0xff]  ;;  %v8409_v2 = vld [vmem:[#allocation13_spill] sm:$0xff] }
 0xe6e   :  { %v4329_v54 = vmul.f32 -1.442695, %v3659_v8 }
 0xe6f   :  { %4964 = vpow2.f32 %v4327_v46  ;;  %v4328_v19 = vmul.f32 -1.442695, %v3658_v33  ;;  %v8410_v46 = vsel %vm5768_vm5, %v8408_v62, %v8409_v2 }
 0xe70   :  { %v3660_v14 = vadd.f32 %v3650_v42, %v8410_v46 }
 0xe71   :  { %4966 = vpow2.f32 %v4328_v19 }
 0xe72   :  { %4968 = vpow2.f32 %v4326_v61 }
 0xe73   :  { %4970 = vtanh.f32 %v3656_v63 }
 0xe78   :  { %v4961_v23 = vpop.eup %4960 }
 0xe79   :  { %v3679_v13 = vadd.f32 1.0, %v4961_v23 }
 0xe7a   :  { %v4963_v3 = vpop.eup %4962 }
 0xe7b   :  { %4972 = vrcp.f32 %v3679_v13  ;;  %v3680_v26 = vadd.f32 1.0, %v4963_v3 }
 0xe7c   :  { %v4965_v28 = vpop.eup %4964  ;;  %4974 = vpow2.f32 %v4329_v54 }
 0xe7d   :  { %4976 = vrcp.f32 %v3680_v26  ;;  %v3682_v33 = vadd.f32 1.0, %v4965_v28  ;;  %v8426_v26 = vld [vmem:[#allocation53_spill] sm:$0xff] }
 0xe7e   :  { %v4967_v30 = vpop.eup %4966  ;;  %4978 = vtanh.f32 %v3660_v14  ;;  %v8425_v14 = vld [vmem:[#allocation74_spill] sm:$0xff] }
 0xe7f   :  { %4980 = vrcp.f32 %v3682_v33  ;;  %v3683_v19 = vadd.f32 1.0, %v4967_v30  ;;  %v4969_v58 = vpop.eup %4968  ;;  %v8427_v28 = vsel %vm5768_vm5, %v8425_v14, %v8426_v26  ;;  %v8435_v26 = vld [vmem:[#allocation90_spill] sm:$0xff] }
 0xe80   :  { %v4971_v40 = vpop.eup %4970  ;;  %v3681_v61 = vadd.f32 1.0, %v4969_v58 }
 0xe81   :  { %4982 = vrcp.f32 %v3683_v19 }
 0xe82   :  { %4984 = vrcp.f32 %v3681_v61 }
 0xe88   :  { %v4973_v50 = vpop.eup %4972 }
 0xe89   :  { %v4975_v17 = vpop.eup %4974  ;;  %v3701_v10 = vmul.f32 %v4973_v50, %v4971_v40 }
 0xe8a   :  { %v4977_v37 = vpop.eup %4976  ;;  %v3684_v63 = vadd.f32 1.0, %v4975_v17  ;;  %v8428_v17 = vld [vmem:[#allocation79_spill] sm:$0xff] }
 0xe8b   :  { %v4979_v51 = vpop.eup %4978  ;;  %v3699_v1 = vmul.f32 %v4977_v37, %v7593_v16 }
 0xe8c   :  { %v4981_v8 = vpop.eup %4980 }
 0xe8d   :  { %v7667_v21 = vadd.f32 %v3701_v10, %v3699_v1  ;;  %v3702_v31 = vmul.f32 %v4981_v8, %v4979_v51  ;;  %v8429_v10 = vld [vmem:[#allocation65_spill] sm:$0xff] }
 0xe8e   :  { %v4983_v20 = vpop.eup %4982  ;;  %v8430_v37 = vsel %vm5768_vm5, %v8428_v17, %v8429_v10 }
 0xe8f   :  { %v3700_v42 = vmul.f32 %v4983_v20, %v7597_v36  ;;  %4986 = vtanh.f32 %v7667_v21  ;;  %v4985_v54 = vpop.eup %4984 }
 0xe90   :  { %4988 = vrcp.f32 %v3684_v63 }
 0xe91   :  { %v7671_v23 = vadd.f32 %v3702_v31, %v3700_v42 }
 0xe93   :  { %4990 = vtanh.f32 %v7671_v23 }
 0xe9c   :  { %v4987_v13 = vpop.eup %4986 }
 0xe9d   :  { %v4989_v16 = vpop.eup %4988  ;;  %v3707_v62 = vmul.f32 %v4987_v13, %v4985_v54 }
 0xea0   :  { %v4991_v3 = vpop.eup %4990 }
 0xea1   :  { %v3708_v2 = vmul.f32 %v4991_v3, %v4989_v16 }
 0xea3   :  { %v3717_v46 = vpack.c.bf16 %v3708_v2, %v3707_v62 }
 0xea5   :  { %3751 = vmatmul.mubr.bf16.vlgmr.msra.gmra.mxu0 %v3717_v46  ;;  %3794 = vmatmul.mubr.bf16.vlgmr.msra.gmra.mxu1 %v3717_v46 }
 0xea6   :  { %3870 = vmatpush1.bf16.msra.mxu0 %v7392_v43  ;;  %3913 = vmatpush1.bf16.msra.mxu1 %v7395_v53  ;;  %v8411_v43 = vld [vmem:[#allocation33_spill] sm:$0xff] }
 0xea7   :  { %3871 = vmatprep.subr.bf16.mxu0 %v7398_v39  ;;  %3914 = vmatprep.subr.bf16.mxu1 %v7401_v52 }
 0xea8   :  { %3901 = vmatprep.mubr.bf16.mxu0 %v8103_v24  ;;  %3944 = vmatprep.mubr.bf16.mxu1 %v8103_v24 }
 0xeaa   :  { %3872 = vmatpush1.bf16.msra.mxu0 %v7406_v12  ;;  %3915 = vmatpush1.bf16.msra.mxu1 %v7409_v29  ;;  %v8412_v29 = vld [vmem:[#allocation75_spill] sm:$0xff] }
 0xeab   :  { %3873 = vmatprep.subr.bf16.mxu0 %v7412_v15  ;;  %3916 = vmatprep.subr.bf16.mxu1 %v7415_v44  ;;  %v8413_v15 = vld [vmem:[#allocation54_spill] sm:$0xff] }
 0xeac   :  { %v8414_v44 = vsel %vm5525_vm3, %v8412_v29, %v8413_v15 }
 0xeae   :  { %3874 = vmatpush1.bf16.msra.mxu0 %v7418_v35  ;;  %3917 = vmatpush1.bf16.msra.mxu1 %v7421_v45 }
 0xeaf   :  { %3875 = vmatprep.subr.bf16.mxu0 %v7424_v18  ;;  %3918 = vmatprep.subr.bf16.mxu1 %v7427_v48  ;;  %v8415_v48 = vld [vmem:[#allocation80_spill] sm:$0xff] }
 0xeb2   :  { %3876 = vmatpush1.bf16.msra.mxu0 %v7430_v41  ;;  %3919 = vmatpush1.bf16.msra.mxu1 %v7433_v5 }
 0xeb3   :  { %3877 = vmatprep.subr.bf16.mxu0 %v7436_v4  ;;  %3920 = vmatprep.subr.bf16.mxu1 %v7439_v7 }
 0xeb6   :  { %3878 = vmatpush1.bf16.msra.mxu0 %v7442_v60  ;;  %3921 = vmatpush1.bf16.msra.mxu1 %v7445_v47  ;;  %v8416_v60 = vld [vmem:[#allocation77_spill] sm:$0xff]  ;;  %v8417_v47 = vld [vmem:[#allocation39_spill] sm:$0xff] }
 0xeb7   :  { %3879 = vmatprep.subr.bf16.mxu0 %v7448_v59  ;;  %3922 = vmatprep.subr.bf16.mxu1 %v7451_v27  ;;  %v8418_v59 = vsel %vm5525_vm3, %v8416_v60, %v8417_v47  ;;  %v4540_v60 = vld [vmem:[%s7820_s7 + $0x18] sm:$0xff]   ;;  %v4541_v47 = vld [vmem:[%s7820_s7 + $0x10] sm:$0xff]  }
 0xeba   :  { %3880 = vmatpush1.bf16.msra.mxu0 %v7454_v0  ;;  %3923 = vmatpush1.bf16.msra.mxu1 %v7457_v55  ;;  %v8419_v55 = vld [vmem:[#allocation76_spill] sm:$0xff] }
 0xebb   :  { %3881 = vmatprep.subr.bf16.mxu0 %v7460_v56  ;;  %3924 = vmatprep.subr.bf16.mxu1 %v7463_v6  ;;  %v8420_v56 = vld [vmem:[#allocation56_spill] sm:$0xff] }
 0xebc   :  { %v8421_v6 = vsel %vm5753_vm4, %v8419_v55, %v8420_v56  ;;  %v8431_v55 = vld [vmem:[#allocation83_spill] sm:$0xff] }
 0xebe   :  { %3882 = vmatpush1.bf16.msra.mxu0 %v7466_v49  ;;  %3925 = vmatpush1.bf16.msra.mxu1 %v7469_v22 }
 0xebf   :  { %3883 = vmatprep.subr.bf16.mxu0 %v7472_v57  ;;  %3926 = vmatprep.subr.bf16.mxu1 %v7475_v9  ;;  %v8422_v57 = vld [vmem:[#allocation78_spill] sm:$0xff]  ;;  %v8423_v9 = vld [vmem:[#allocation63_spill] sm:$0xff] }
 0xec2   :  { %3884 = vmatpush1.bf16.msra.mxu0 %v7478_v38  ;;  %3927 = vmatpush1.bf16.msra.mxu1 %v7481_v25  ;;  %v8424_v38 = vsel %vm5753_vm4, %v8422_v57, %v8423_v9  ;;  %v8432_v57 = vld [vmem:[#allocation81_spill] sm:$0xff]  ;;  %v8433_v9 = vld [vmem:[#allocation48_spill] sm:$0xff] }
 0xf65   :  { %v3752_v24 = vpop.f32.mrf.mxu0  ;;  %v3795_v12 = vpop.f32.mrf.mxu1 }
 0xf66   :  { %v3804_v53 = vadd.f32 %v3752_v24, %v8411_v43  ;;  %v3806_v49 = vadd.f32 %v3795_v12, %v8421_v6 }
 0xf67   :  { %v3754_v39 = vpop.f32.mrf.mxu0  ;;  %v3797_v4 = vpop.f32.mrf.mxu1 }
 0xf68   :  { %v4330_v52 = vmul.f32 -1.442695, %v3804_v53  ;;  %v3805_v35 = vadd.f32 %v3754_v39, %v8414_v44  ;;  %v4332_v36 = vmul.f32 -1.442695, %v3806_v49  ;;  %v3807_v33 = vadd.f32 %v3797_v4, %v8427_v28  ;;  %v4538_v4 = vld [vmem:[%s7820_s7 + $0x28] sm:$0xff]  }
 0xf69   :  { %v3756_v45 = vpop.f32.mrf.mxu0  ;;  %v3799_v22 = vpop.f32.mrf.mxu1 }
 0xf6a   :  { %4992 = vpow2.f32 %v4330_v52  ;;  %v4331_v18 = vmul.f32 -1.442695, %v3805_v35  ;;  %v3808_v41 = vadd.f32 %v3756_v45, %v8415_v48  ;;  %v3810_v25 = vadd.f32 %v3799_v22, %v8424_v38 }
 0xf6b   :  { %v3758_v5 = vpop.f32.mrf.mxu0  ;;  %v3801_v30 = vpop.f32.mrf.mxu1  ;;  %v8434_v38 = vsel %vm5525_vm3, %v8432_v57, %v8433_v9 }
 0xf6c   :  { %4994 = vpow2.f32 %v4331_v18  ;;  %v4333_v7 = vmul.f32 -1.442695, %v3808_v41  ;;  %v3809_v27 = vadd.f32 %v3758_v5, %v8418_v59  ;;  %v4335_v58 = vmul.f32 -1.442695, %v3810_v25  ;;  %v4537_v5 = vld [vmem:[%s7820_s7 + $0x30] sm:$0xff]   ;;  %v4542_v59 = vld [vmem:[%s7820_s7 + $0x8] sm:$0xff]  }
 0xf6d   :  { %v3811_v51 = vadd.f32 %v3801_v30, %v8430_v37  ;;  %v5197_v41 = vmov 0.0   ;;  %v8439_v37 = vld [vmem:[#allocation11_spill] sm:$0xff] }
 0xf6e   :  { %4996 = vpow2.f32 %v4333_v7  ;;  %v4334_v0 = vmul.f32 -1.442695, %v3809_v27  ;;  %4360 = vmatprep.subr.bf16.mxu0 %v5197_v41  ;;  %v4539_v7 = vld [vmem:[%s7820_s7 + $0x20] sm:$0xff]  }
 0xf6f   :  { %v4543_v27 = vld [vmem:[%s7820_s7] sm:$0xff]  }
 0xf70   :  { %4998 = vpow2.f32 %v4334_v0 }
 0xf71   :  { %5000 = vpow2.f32 %v4332_v36 }
 0xf72   :  { %5002 = vtanh.f32 %v3807_v33 }
 0xf77   :  { %v4993_v19 = vpop.eup %4992 }
 0xf78   :  { %v3830_v40 = vadd.f32 1.0, %v4993_v19 }
 0xf79   :  { %v4995_v50 = vpop.eup %4994 }
 0xf7a   :  { %5004 = vrcp.f32 %v3830_v40  ;;  %v3831_v1 = vadd.f32 1.0, %v4995_v50  ;;  %v8437_v40 = vld [vmem:[#allocation88_spill] sm:$0xff] }
 0xf7b   :  { %v4997_v8 = vpop.eup %4996  ;;  %5006 = vpow2.f32 %v4335_v58  ;;  %v8436_v58 = vld [vmem:[#allocation86_spill] sm:$0xff] }
 0xf7c   :  { %5008 = vrcp.f32 %v3831_v1  ;;  %v3833_v61 = vadd.f32 1.0, %v4997_v8  ;;  %v8438_v50 = vsel %vm5525_vm3, %v8436_v58, %v8437_v40 }
 0xf7d   :  { %v4999_v31 = vpop.eup %4998  ;;  %5010 = vtanh.f32 %v3811_v51  ;;  %v8440_v51 = vld [vmem:[#allocation51_spill] sm:$0xff] }
 0xf7e   :  { %5012 = vrcp.f32 %v3833_v61  ;;  %v3834_v20 = vadd.f32 1.0, %v4999_v31  ;;  %v5001_v63 = vpop.eup %5000  ;;  %v8441_v1 = vsel %vm5753_vm4, %v8439_v37, %v8440_v51  ;;  %v8442_v31 = vld [vmem:[#allocation84_spill] sm:$0xff] }
 0xf7f   :  { %v5003_v42 = vpop.eup %5002  ;;  %v3832_v24 = vadd.f32 1.0, %v5001_v63 }
 0xf80   :  { %5014 = vrcp.f32 %v3834_v20  ;;  %v8443_v20 = vld [vmem:[#allocation85_spill] sm:$0xff] }
 0xf81   :  { %5016 = vrcp.f32 %v3832_v24  ;;  %v8444_v63 = vsel %vm5753_vm4, %v8442_v31, %v8443_v20 }
 0xf87   :  { %v5005_v54 = vpop.eup %5004 }
 0xf88   :  { %v5007_v13 = vpop.eup %5006  ;;  %v3852_v16 = vmul.f32 %v5005_v54, %v5003_v42  ;;  %v8445_v54 = vld [vmem:[#allocation82_spill] sm:$0xff] }
 0xf89   :  { %v5009_v3 = vpop.eup %5008  ;;  %v3835_v52 = vadd.f32 1.0, %v5007_v13  ;;  %v8446_v13 = vld [vmem:[#allocation32_spill] sm:$0xff] }
 0xf8a   :  { %v5011_v62 = vpop.eup %5010  ;;  %v3850_v2 = vmul.f32 %v5009_v3, %v7667_v21 }
 0xf8b   :  { %v5013_v46 = vpop.eup %5012 }
 0xf8c   :  { %v7739_v43 = vadd.f32 %v3852_v16, %v3850_v2  ;;  %v3853_v53 = vmul.f32 %v5013_v46, %v5011_v62  ;;  %v8447_v16 = vsel %vm5768_vm5, %v8445_v54, %v8446_v13 }
 0xf8d   :  { %v5015_v39 = vpop.eup %5014 }
 0xf8e   :  { %v3851_v12 = vmul.f32 %v5015_v39, %v7671_v23  ;;  %5018 = vtanh.f32 %v7739_v43  ;;  %v5017_v15 = vpop.eup %5016  ;;  %v4536_v23 = vld [vmem:[%s7820_s7 + $0x38] sm:$0xff]   ;;  %v8449_v39 = vld [vmem:[#allocation89_spill] sm:$0xff] }
 0xf8f   :  { %5020 = vrcp.f32 %v3835_v52  ;;  %v8450_v52 = vsel %vm5768_vm5, %v8448_v32, %v8449_v39 }
 0xf90   :  { %v7743_v29 = vadd.f32 %v3853_v53, %v3851_v12 }
 0xf92   :  { %5022 = vtanh.f32 %v7743_v29 }
 0xf9b   :  { %v5019_v44 = vpop.eup %5018 }
 0xf9c   :  { %v5021_v21 = vpop.eup %5020  ;;  %v3858_v45 = vmul.f32 %v5019_v44, %v5017_v15 }
 0xf9f   :  { %v5023_v35 = vpop.eup %5022 }
 0xfa0   :  { %v3859_v18 = vmul.f32 %v5023_v35, %v5021_v21 }
 0xfa2   :  { %v3868_v48 = vpack.c.bf16 %v3859_v18, %v3858_v45 }
 0xfa4   :  { %3902 = vmatmul.mubr.bf16.vlgmr.msra.gmra.mxu0 %v3868_v48  ;;  %3945 = vmatmul.mubr.bf16.vlgmr.msra.gmra.mxu1 %v3868_v48 }
 0xfa5   :  { %4361 = vmatpush3.bf16.msra.mxu0 %v4536_v23  ;;  %4376 = vmatprep.mubr.msk.bf16.mxu0 %vm5198_vm6, %v5197_v41 }
 0xfa6   :  { %4362 = vmatprep.subr.bf16.mxu0 %v5197_v41 }
 0xfa9   :  { %4363 = vmatpush3.bf16.msra.mxu0 %v4537_v5 }
 0xfaa   :  { %4364 = vmatprep.subr.bf16.mxu0 %v5197_v41 }
 0xfad   :  { %4365 = vmatpush3.bf16.msra.mxu0 %v4538_v4 }
 0xfae   :  { %4366 = vmatprep.subr.bf16.mxu0 %v5197_v41 }
 0xfb1   :  { %4367 = vmatpush3.bf16.msra.mxu0 %v4539_v7 }
 0xfb2   :  { %4368 = vmatprep.subr.bf16.mxu0 %v5197_v41 }
 0xfb5   :  { %4369 = vmatpush3.bf16.msra.mxu0 %v4540_v60 }
 0xfb6   :  { %4370 = vmatprep.subr.bf16.mxu0 %v5197_v41 }
 0xfb9   :  { %4371 = vmatpush3.bf16.msra.mxu0 %v4541_v47 }
 0xfba   :  { %4372 = vmatprep.subr.bf16.mxu0 %v5197_v41 }
 0xfbd   :  { %4373 = vmatpush3.bf16.msra.mxu0 %v4542_v59 }
 0xfbe   :  { %4374 = vmatprep.subr.bf16.mxu0 %v5197_v41 }
 0xfc1   :  { %4375 = vmatpush3.bf16.msra.mxu0 %v4543_v27 }
0x1064   :  { %v3903_v0 = vpop.f32.mrf.mxu0  ;;  %v3946_v22 = vpop.f32.mrf.mxu1 }
0x1065   :  { %v3955_v56 = vadd.f32 %v3903_v0, %v8431_v55  ;;  %v3957_v8 = vadd.f32 %v3946_v22, %v8441_v1 }
0x1066   :  { %v3905_v6 = vpop.f32.mrf.mxu0  ;;  %v3948_v30 = vpop.f32.mrf.mxu1 }
0x1067   :  { %v4336_v49 = vmul.f32 -1.442695, %v3955_v56  ;;  %v3956_v25 = vadd.f32 %v3905_v6, %v8434_v38  ;;  %v4338_v42 = vmul.f32 -1.442695, %v3957_v8  ;;  %v3958_v3 = vadd.f32 %v3948_v30, %v8447_v16 }
0x1068   :  { %v3907_v36 = vpop.f32.mrf.mxu0  ;;  %v3950_v61 = vpop.f32.mrf.mxu1 }
0x1069   :  { %5024 = vpow2.f32 %v4336_v49  ;;  %v4337_v14 = vmul.f32 -1.442695, %v3956_v25  ;;  %v3959_v28 = vadd.f32 %v3907_v36, %v8435_v26  ;;  %v3961_v34 = vadd.f32 %v3950_v61, %v8444_v63 }
0x106a   :  { %v3909_v33 = vpop.f32.mrf.mxu0  ;;  %v3952_v62 = vpop.f32.mrf.mxu1 }
0x106b   :  { %5026 = vpow2.f32 %v4337_v14  ;;  %v4339_v19 = vmul.f32 -1.442695, %v3959_v28  ;;  %v3960_v17 = vadd.f32 %v3909_v33, %v8438_v50  ;;  %v4341_v46 = vmul.f32 -1.442695, %v3961_v34 }
0x106c   :  { %v3962_v12 = vadd.f32 %v3952_v62, %v8450_v52 }
0x106d   :  { %5028 = vpow2.f32 %v4339_v19  ;;  %v4340_v10 = vmul.f32 -1.442695, %v3960_v17 }
0x106f   :  { %5030 = vpow2.f32 %v4340_v10 }
0x1070   :  { %5032 = vpow2.f32 %v4338_v42 }
0x1071   :  { %5034 = vtanh.f32 %v3958_v3 }
0x1076   :  { %v5025_v2 = vpop.eup %5024 }
0x1077   :  { %v3981_v24 = vadd.f32 1.0, %v5025_v2 }
0x1078   :  { %v5027_v53 = vpop.eup %5026 }
0x1079   :  { %5036 = vrcp.f32 %v3981_v24  ;;  %v3982_v15 = vadd.f32 1.0, %v5027_v53 }
0x107a   :  { %v5029_v44 = vpop.eup %5028  ;;  %5038 = vpow2.f32 %v4341_v46 }
0x107b   :  { %5040 = vrcp.f32 %v3982_v15  ;;  %v3984_v21 = vadd.f32 1.0, %v5029_v44 }
0x107c   :  { %v5031_v35 = vpop.eup %5030  ;;  %5042 = vtanh.f32 %v3962_v12 }
0x107d   :  { %5044 = vrcp.f32 %v3984_v21  ;;  %v3985_v45 = vadd.f32 1.0, %v5031_v35  ;;  %v5033_v18 = vpop.eup %5032 }
0x107e   :  { %v5035_v48 = vpop.eup %5034  ;;  %v3983_v4 = vadd.f32 1.0, %v5033_v18 }
0x107f   :  { %5046 = vrcp.f32 %v3985_v45 }
0x1080   :  { %5048 = vrcp.f32 %v3983_v4 }
0x1086   :  { %v5037_v23 = vpop.eup %5036 }
0x1087   :  { %v5039_v41 = vpop.eup %5038  ;;  %v4003_v11 = vmul.f32 %v5037_v23, %v5035_v48 }
0x1088   :  { %v5041_v5 = vpop.eup %5040  ;;  %v3986_v55 = vadd.f32 1.0, %v5039_v41 }
0x1089   :  { %v5043_v7 = vpop.eup %5042  ;;  %v4001_v60 = vmul.f32 %v5041_v5, %v7739_v43  ;;  %v4342_v43 = vld [vmem:[%s7821_s8] ss:$0 sm:$0xff] }
0x108a   :  { %v5045_v47 = vpop.eup %5044 }
0x108b   :  { %v4005_v59 = vadd.f32 %v4003_v11, %v4001_v60  ;;  %v4004_v27 = vmul.f32 %v5045_v47, %v5043_v7 }
0x108c   :  { %v5047_v0 = vpop.eup %5046 }
0x108d   :  { %5050 = vtanh.f32 %v4005_v59  ;;  %v4002_v56 = vmul.f32 %v5047_v0, %v7743_v29  ;;  %v5049_v49 = vpop.eup %5048 }
0x108e   :  { %5052 = vrcp.f32 %v3986_v55 }
0x108f   :  { %v4006_v6 = vadd.f32 %v4004_v27, %v4002_v56 }
0x1091   :  { %5054 = vtanh.f32 %v4006_v6 }
0x109a   :  { %v5051_v22 = vpop.eup %5050 }
0x109b   :  { %v4009_v57 = vmul.f32 %v5051_v22, %v5049_v49  ;;  %v5053_v9 = vpop.eup %5052 }
0x109e   :  { %v5055_v38 = vpop.eup %5054 }
0x109f   :  { %v4010_v25 = vmul.f32 %v5055_v38, %v5053_v9 }
0x10a1   :  { %v4011_v36 = vpack.c.bf16 %v4010_v25, %v4009_v57 }
0x10a3   :  { %4377 = vmatmul.mubr.bf16.vlgmr.msra.gmra.mxu0 %v4011_v36 }
0x1163   :  { %v4117_v14 = vpop.f32.mrf.mxu0 }
0x1164   :  { %v4118_v26 = vadd.f32 %v4342_v43, %v4117_v14 }
0x1165   :  { %v4378_v28 = vpop.f32.mrf.mxu0 }
0x1166   :  { %4124 = vst [vmem:[%s7822_s9] sm:$0xff] %v4118_v26 }
0x1167   :  { %v4120_v29 = vpop.f32.mrf.mxu0 }
0x1168   :  { %v4121_v33 = vadd.f32 %v4342_v43, %v4120_v29 }
0x1169   :  { %v4379_v30 = vpop.f32.mrf.mxu0 }
0x116a   :  { %4125 = vst [vmem:[%s7822_s9 + $0x8] sm:$0xff] %v4121_v33 }
0x116b   :  { %4130 = vsyncpa [#allocation5], 1 }
0x116c   :  { %4131 = vsyncpa [#allocation7], 1 }

</bundles_post_ra>
